<compile_context>
chip_gen: v7x
topology: tpu7x:2x2x1
jax: 0.10.0
libtpu: 0.0.40
codegen_flags: <defaults>
</compile_context>

<pallas_src>
import functools

import jax
import jax.numpy as jnp
from jax import lax
from jax.experimental import pallas as pl
from jax.experimental.pallas import tpu as pltpu


# ----------------------------- fused Pallas kernel -----------------------------

def _bottleneck_kernel(x_ref, oh_ref, w1_ref, b1_ref, wqkv_ref, krel_ref,
                       wconv_ref, b2_ref, wproj_ref, w3a_ref, w3b_ref, b3_ref,
                       o_ref, pad_ref, *, H, W, nh, dk, dv, cdt):
    HW = H * W
    dkh = dk // nh
    dvh = dv // nh
    width = wqkv_ref.shape[0]
    n_conv = wconv_ref.shape[2]

    # ---- input NCHW slab (Cin, H*W) -> rows (H*W, Cin); layout handled in-kernel
    x_slab = x_ref[0]                                # (Cin, HW) f32, also the residual
    x_rows = jnp.transpose(x_slab)                   # (HW, Cin) f32

    # ---- conv1 (1x1) + BN1 (scale folded into w1) + ReLU
    out1 = jnp.dot(x_rows.astype(cdt), w1_ref[...],
                   preferred_element_type=jnp.float32) + b1_ref[...]
    out1 = jnp.maximum(out1, 0.0)                    # (HW, width) f32
    out1_c = out1.astype(cdt)

    # ---- AAConv2d: qkv projection (dkh**-0.5 q-scale folded into wqkv columns)
    qkv = jnp.dot(out1_c, wqkv_ref[...], preferred_element_type=jnp.float32)
    q = qkv[:, :dk].astype(cdt)
    k = qkv[:, dk:2 * dk].astype(cdt)
    v = qkv[:, 2 * dk:].astype(cdt)

    onehot = oh_ref[...]                             # (HW, W+H)
    krel = krel_ref[...]                             # ((W+H)*dkh, HW)

    # ---- multi-head attention with relative position logits (heads unrolled)
    attn_heads = []
    for n in range(nh):
        qn = q[:, n * dkh:(n + 1) * dkh]             # (HW, dkh)
        kn = k[:, n * dkh:(n + 1) * dkh]
        vn = v[:, n * dvh:(n + 1) * dvh]
        # content logits: q @ k^T without materializing a transpose
        logits = lax.dot_general(qn, kn, (((1,), (1,)), ((), ())),
                                 preferred_element_type=jnp.float32)
        # relative logits: spread q over (w_q, h_q) one-hot slots, then one matmul
        # against the precomputed relative-key matrix.
        q_aug = jnp.concatenate(
            [qn * onehot[:, s:s + 1] for s in range(W + H)], axis=-1)
        logits = logits + jnp.dot(q_aug, krel, preferred_element_type=jnp.float32)
        # softmax (stable; EUP exp + approx reciprocal)
        m = jnp.max(logits, axis=-1, keepdims=True)
        p = jnp.exp(logits - m)
        probs = p * pl.reciprocal(jnp.sum(p, axis=-1, keepdims=True), approx=True)
        attn_heads.append(jnp.dot(probs.astype(cdt), vn,
                                  preferred_element_type=jnp.float32))
    attn = jnp.concatenate(attn_heads, axis=-1)      # (HW, dv), channel = head*dvh + d

    # ---- AAConv2d conv branch: 3x3/s1/p1 conv as 9 shifted matmuls over a halo
    pad_ref[...] = jnp.zeros(pad_ref.shape, pad_ref.dtype)
    pad_ref[1:H + 1, 1:W + 1, :] = out1.reshape(H, W, width)
    conv_acc = jnp.zeros((HW, n_conv), jnp.float32)
    for t in range(9):
        kh, kw = t // 3, t % 3
        patch = pad_ref[kh:kh + H, kw:kw + W, :]     # (H, W, width) shifted view
        conv_acc = conv_acc + jnp.dot(patch.reshape(HW, width).astype(cdt),
                                      wconv_ref[t],
                                      preferred_element_type=jnp.float32)
    b2 = b2_ref[...]                                 # (1, width)
    conv_br = jnp.maximum(conv_acc + b2[:, :n_conv], 0.0)          # BN2 + ReLU

    # ---- AAConv2d attention branch: out_proj (1x1) + BN2 + ReLU
    attn_br = jnp.dot(attn.astype(cdt), wproj_ref[...],
                      preferred_element_type=jnp.float32)
    attn_br = jnp.maximum(attn_br + b2[:, n_conv:], 0.0)

    # ---- conv3 (1x1) + BN3 + identity + ReLU; w3 split so no concat is needed
    out3 = jnp.dot(conv_br.astype(cdt), w3a_ref[...],
                   preferred_element_type=jnp.float32)
    out3 = out3 + jnp.dot(attn_br.astype(cdt), w3b_ref[...],
                          preferred_element_type=jnp.float32)
    out3 = out3 + b3_ref[...]                        # (HW, Cout)
    out3 = jnp.maximum(jnp.transpose(out3) + x_slab, 0.0)          # (Cout, HW)
    o_ref[0] = out3.astype(o_ref.dtype)


# ----------------------------- wrapper -----------------------------

def bottleneck_forward(x_nchw, kp, cfg):
    """x_nchw: (B, Cin, H, W) float32 -> (B, 4*planes, H, W) float32."""
    B, Cin, H, W = x_nchw.shape
    nh, dk, dv, width = cfg["nh"], cfg["dk"], cfg["dv"], cfg["width"]
    cdt = cfg["compute_dtype"]
    dkh = dk // nh
    n_conv = width - dv
    HW = H * W
    Cout = kp["w3a"].shape[1]
    assert Cin == Cout, "identity residual requires inplanes == expansion*planes"
    # TODO(synk): downsample / stride != 1 not implemented.

    x2 = x_nchw.reshape(B, Cin, HW)    # free reshape: same memory layout as NCHW

    def rep2(shape):
        return pl.BlockSpec(shape, lambda b: (0, 0))

    kernel = functools.partial(_bottleneck_kernel, H=H, W=W, nh=nh, dk=dk,
                               dv=dv, cdt=cdt)
    out = pl.pallas_call(
        kernel,
        grid=(B,),
        in_specs=[
            pl.BlockSpec((1, Cin, HW), lambda b: (b, 0, 0)),        # x (NCHW slab)
            rep2((HW, W + H)),                                      # (w_q, h_q) one-hot
            rep2((Cin, width)),                                     # w1 (BN1 folded)
            rep2((1, width)),                                       # b1
            rep2((width, 2 * dk + dv)),                             # w_qkv (q-scale folded)
            rep2(((W + H) * dkh, HW)),                              # relative-key matrix
            pl.BlockSpec((9, width, n_conv), lambda b: (0, 0, 0)),  # 3x3 taps (BN2 folded)
            rep2((1, width)),                                       # b2
            rep2((dv, dv)),                                         # out_proj (BN2 folded)
            rep2((n_conv, Cout)),                                   # w3 rows, conv branch
            rep2((dv, Cout)),                                       # w3 rows, attn branch
            rep2((1, Cout)),                                        # b3
        ],
        out_specs=pl.BlockSpec((1, Cout, HW), lambda b: (b, 0, 0)),
        out_shape=jax.ShapeDtypeStruct((B, Cout, HW), x_nchw.dtype),
        scratch_shapes=[pltpu.VMEM((H + 2, W + 2, width), jnp.float32)],
        compiler_params=pltpu.CompilerParams(
            dimension_semantics=("parallel",),
            vmem_limit_bytes=32 * 1024 * 1024),
    )(x2, kp["onehot"], kp["w1"], kp["b1"], kp["wqkv"], kp["krel"],
      kp["wconv"], kp["b2"], kp["wproj"], kp["w3a"], kp["w3b"], kp["b3"])
    return out.reshape(B, Cout, H, W)


# ----------------------------- parameter preparation -----------------------------

def bn_fold(gamma, beta, mean, var, eps=1e-5):
    scale = gamma / jnp.sqrt(var + eps)
    return scale, beta - mean * scale


def _build_onehot(H, W, dtype):
    """(HW, W+H): columns [0:W] one-hot of w_q = i % W, [W:W+H] one-hot of h_q = i // W."""
    i = jnp.arange(H * W)
    ow = (i[:, None] % W) == jnp.arange(W)[None, :]
    oh = (i[:, None] // W) == jnp.arange(H)[None, :]
    return jnp.concatenate([ow, oh], axis=1).astype(dtype)


def _build_rel_key_matrix(key_rel_w, key_rel_h, H, W):
    """M[(s*dkh + d), h_k*W + w_k] = key_rel_w[d, w_k - s + W - 1]      for s <  W
                                   = key_rel_h[d, h_k - (s-W) + H - 1]  for s >= W
    so that (q spread over one-hot slots) @ M == h_rel + w_rel logits."""
    dkh = key_rel_w.shape[0]
    idx_w = jnp.arange(W)[None, :] - jnp.arange(W)[:, None] + (W - 1)   # (s, w_k)
    idx_h = jnp.arange(H)[None, :] - jnp.arange(H)[:, None] + (H - 1)   # (s, h_k)
    kw = key_rel_w[:, idx_w]                       # (dkh, s, w_k)
    kh = key_rel_h[:, idx_h]                       # (dkh, s, h_k)
    kw_blk = jnp.broadcast_to(kw.transpose(1, 0, 2)[:, :, None, :], (W, dkh, H, W))
    kh_blk = jnp.broadcast_to(kh.transpose(1, 0, 2)[:, :, :, None], (H, dkh, H, W))
    return jnp.concatenate([kw_blk, kh_blk], axis=0).reshape((W + H) * dkh, H * W)


def fold_params(p, cfg, H, W):
    """Fold BN scales / q-scale into weights; build kernel-ready operands."""
    nh, dk, dv, width = cfg["nh"], cfg["dk"], cfg["dv"], cfg["width"]
    cdt = cfg["compute_dtype"]
    dkh = dk // nh
    n_conv = width - dv

    s1, b1 = bn_fold(*p["bn1"])
    s2, b2 = bn_fold(*p["bn2"])
    s3, b3 = bn_fold(*p["bn3"])

    w1 = p["w1"][:, :, 0, 0].T * s1[None, :]                         # (Cin, width)
    qscale = jnp.concatenate([jnp.full((dk,), dkh ** -0.5, jnp.float32),
                              jnp.ones((dk + dv,), jnp.float32)])
    wqkv = p["w_qkv"][:, :, 0, 0].T * qscale[None, :]                # (width, 2dk+dv)
    wconv = (p["w_conv3x3"].transpose(2, 3, 1, 0).reshape(9, width, n_conv)
             * s2[:n_conv][None, None, :])                           # (9, width, n_conv)
    wproj = p["w_out_proj"][:, :, 0, 0].T * s2[n_conv:][None, :]     # (dv, dv)
    w3 = p["w3"][:, :, 0, 0].T * s3[None, :]                         # (width, 4*planes)

    return {
        "onehot": _build_onehot(H, W, cdt),
        "w1": w1.astype(cdt),
        "b1": b1.reshape(1, -1).astype(jnp.float32),
        "wqkv": wqkv.astype(cdt),
        "krel": _build_rel_key_matrix(p["key_rel_w"], p["key_rel_h"], H, W).astype(cdt),
        "wconv": wconv.astype(cdt),
        "b2": b2.reshape(1, -1).astype(jnp.float32),
        "wproj": wproj.astype(cdt),
        "w3a": w3[:n_conv].astype(cdt),
        "w3b": w3[n_conv:].astype(cdt),
        "b3": b3.reshape(1, -1).astype(jnp.float32),
    }


def init_params(key, inplanes, planes, nh, dk, dv, H, W):
    width = planes                                   # base_width=64, groups=1
    exp_out = planes * 4
    dkh = dk // nh
    ks = jax.random.split(key, 10)

    def conv_w(kk, cout, cin, kh=1, kw=1):
        fan_in = cin * kh * kw
        return jax.random.normal(kk, (cout, cin, kh, kw), jnp.float32) / jnp.sqrt(fan_in)

    def bn(kk, c):
        k1, k2, k3, k4 = jax.random.split(kk, 4)
        return (1.0 + 0.1 * jax.random.normal(k1, (c,), jnp.float32),
                0.1 * jax.random.normal(k2, (c,), jnp.float32),
                0.1 * jax.random.normal(k3, (c,), jnp.float32),
                0.9 + 0.2 * jax.random.uniform(k4, (c,), jnp.float32))

    return {
        "w1": conv_w(ks[0], width, inplanes),
        "w_qkv": conv_w(ks[1], 2 * dk + dv, width),
        "w_conv3x3": conv_w(ks[2], width - dv, width, 3, 3),
        "w_out_proj": conv_w(ks[3], dv, dv),
        "w3": conv_w(ks[4], exp_out, width),
        # PyTorch reference: key_rel_* = dk**-0.5 + randn(dkh, 2*dim - 1)
        "key_rel_h": dk ** (-0.5) + jax.random.normal(ks[5], (dkh, 2 * H - 1), jnp.float32),
        "key_rel_w": dk ** (-0.5) + jax.random.normal(ks[6], (dkh, 2 * W - 1), jnp.float32),
        "bn1": bn(ks[7], width),
        "bn2": bn(ks[8], width),
        "bn3": bn(ks[9], exp_out),
    }


# ----------------------------- demo -----------------------------

if __name__ == "__main__":
    # Bottleneck(inplanes=64, planes=16, stride=1, downsample=None,
    #            attn_params={'nh': 2, 'k': 0.5, 'v': 0.5, 'relative': True,
    #                         'input_dims': (8, 8)})
    B, inplanes, planes = 2, 64, 16
    H = W = 8
    nh = 2
    width = planes
    dk = max(20 * nh, int(0.5 * width // nh * nh))   # 40
    dv = int(0.5 * width // nh * nh)                 # 8

    key = jax.random.PRNGKey(0)
    kx, kp = jax.random.split(key)
    x = jax.random.normal(kx, (B, inplanes, H, W), jnp.float32)

    raw = init_params(kp, inplanes, planes, nh, dk, dv, H, W)
    cfg = {"nh": nh, "dk": dk, "dv": dv, "width": width,
           "compute_dtype": jnp.bfloat16}
    kparams = fold_params(raw, cfg, H, W)            # one-time parameter prep

    fwd = jax.jit(functools.partial(bottleneck_forward, cfg=cfg))
    out = fwd(x, kparams)
    jax.block_until_ready(out)
    assert out.shape == (B, planes * 4, H, W)
    assert bool(jnp.all(jnp.isfinite(out)))
    print("KERNEL_OK")
</pallas_src>

<mosaic_0001>
module attributes {stable_mosaic.version = 11 : i64} {
  func.func @_bottleneck_kernel(%arg0: i32, %arg1: memref<1x64x64xf32, #tpu.memory_space<vmem>>, %arg2: memref<64x16xbf16, #tpu.memory_space<vmem>>, %arg3: memref<64x16xbf16, #tpu.memory_space<vmem>>, %arg4: memref<1x16xf32, #tpu.memory_space<vmem>>, %arg5: memref<16x88xbf16, #tpu.memory_space<vmem>>, %arg6: memref<320x64xbf16, #tpu.memory_space<vmem>>, %arg7: memref<9x16x8xbf16, #tpu.memory_space<vmem>>, %arg8: memref<1x16xf32, #tpu.memory_space<vmem>>, %arg9: memref<8x8xbf16, #tpu.memory_space<vmem>>, %arg10: memref<8x64xbf16, #tpu.memory_space<vmem>>, %arg11: memref<8x64xbf16, #tpu.memory_space<vmem>>, %arg12: memref<1x64xf32, #tpu.memory_space<vmem>>, %arg13: memref<1x64x64xf32, #tpu.memory_space<vmem>>, %arg14: memref<10x10x16xf32, #tpu.memory_space<vmem>>) attributes {dimension_semantics = [#tpu.dimension_semantics<parallel>], iteration_bounds = array<i64: 2>, scalar_prefetch = 0 : i64, scratch_operands = 1 : i64, tpu.core_type = #tpu.core_type<tc>, window_params = [{transform_indices = @transform_0, window_bounds = array<i64: 1, 64, 64>}, {pipeline_mode = #tpu.pipeline_mode<synchronous>, transform_indices = @transform_1, window_bounds = array<i64: 64, 16>}, {pipeline_mode = #tpu.pipeline_mode<synchronous>, transform_indices = @transform_2, window_bounds = array<i64: 64, 16>}, {pipeline_mode = #tpu.pipeline_mode<synchronous>, transform_indices = @transform_3, window_bounds = array<i64: 1, 16>}, {pipeline_mode = #tpu.pipeline_mode<synchronous>, transform_indices = @transform_4, window_bounds = array<i64: 16, 88>}, {pipeline_mode = #tpu.pipeline_mode<synchronous>, transform_indices = @transform_5, window_bounds = array<i64: 320, 64>}, {pipeline_mode = #tpu.pipeline_mode<synchronous>, transform_indices = @transform_6, window_bounds = array<i64: 9, 16, 8>}, {pipeline_mode = #tpu.pipeline_mode<synchronous>, transform_indices = @transform_7, window_bounds = array<i64: 1, 16>}, {pipeline_mode = #tpu.pipeline_mode<synchronous>, transform_indices = @transform_8, window_bounds = array<i64: 8, 8>}, {pipeline_mode = #tpu.pipeline_mode<synchronous>, transform_indices = @transform_9, window_bounds = array<i64: 8, 64>}, {pipeline_mode = #tpu.pipeline_mode<synchronous>, transform_indices = @transform_10, window_bounds = array<i64: 8, 64>}, {pipeline_mode = #tpu.pipeline_mode<synchronous>, transform_indices = @transform_11, window_bounds = array<i64: 1, 64>}, {transform_indices = @transform_12, window_bounds = array<i64: 1, 64, 64>}]} {
    %c0 = arith.constant 0 : index
    %c0_0 = arith.constant 0 : index
    %c0_1 = arith.constant 0 : index
    %0 = vector.load %arg1[%c0, %c0_0, %c0_1] : memref<1x64x64xf32, #tpu.memory_space<vmem>>, vector<1x64x64xf32>
    %1 = vector.shape_cast %0 : vector<1x64x64xf32> to vector<64x64xf32>
    %2 = tpu.transpose %1, [1, 0] : vector<64x64xf32> -> vector<64x64xf32>
    %3 = arith.truncf %2 : vector<64x64xf32> to vector<64x64xbf16>
    %c0_2 = arith.constant 0 : index
    %c0_3 = arith.constant 0 : index
    %4 = vector.load %arg3[%c0_2, %c0_3] : memref<64x16xbf16, #tpu.memory_space<vmem>>, vector<64x16xbf16>
    %cst = arith.constant dense<0.000000e+00> : vector<64x16xf32>
    %5 = tpu.matmul %3, %4, %cst {dimension_numbers = #tpu.dot_dimension_numbers<[1], [0], [0], [1], [0, 0, 1, 1], [], []>} : vector<64x64xbf16>, vector<64x16xbf16>, vector<64x16xf32> -> vector<64x16xf32>
    %c0_4 = arith.constant 0 : index
    %c0_5 = arith.constant 0 : index
    %6 = vector.load %arg4[%c0_4, %c0_5] : memref<1x16xf32, #tpu.memory_space<vmem>>, vector<1x16xf32>
    %7 = vector.broadcast %6 : vector<1x16xf32> to vector<64x16xf32>
    %8 = arith.addf %5, %7 : vector<64x16xf32>
    %cst_6 = arith.constant 0.000000e+00 : f32
    %9 = vector.broadcast %cst_6 : f32 to vector<64x16xf32>
    %10 = arith.maximumf %8, %9 : vector<64x16xf32>
    %11 = arith.truncf %10 : vector<64x16xf32> to vector<64x16xbf16>
    %c0_7 = arith.constant 0 : index
    %c0_8 = arith.constant 0 : index
    %12 = vector.load %arg5[%c0_7, %c0_8] : memref<16x88xbf16, #tpu.memory_space<vmem>>, vector<16x88xbf16>
    %cst_9 = arith.constant dense<0.000000e+00> : vector<64x88xf32>
    %13 = tpu.matmul %11, %12, %cst_9 {dimension_numbers = #tpu.dot_dimension_numbers<[1], [0], [0], [1], [0, 0, 1, 1], [], []>} : vector<64x16xbf16>, vector<16x88xbf16>, vector<64x88xf32> -> vector<64x88xf32>
    %14 = vector.extract_strided_slice %13 {offsets = [0, 0], sizes = [64, 40], strides = [1, 1]} : vector<64x88xf32> to vector<64x40xf32>
    %15 = arith.truncf %14 : vector<64x40xf32> to vector<64x40xbf16>
    %16 = vector.extract_strided_slice %13 {offsets = [0, 40], sizes = [64, 40], strides = [1, 1]} : vector<64x88xf32> to vector<64x40xf32>
    %17 = arith.truncf %16 : vector<64x40xf32> to vector<64x40xbf16>
    %18 = vector.extract_strided_slice %13 {offsets = [0, 80], sizes = [64, 8], strides = [1, 1]} : vector<64x88xf32> to vector<64x8xf32>
    %19 = arith.truncf %18 : vector<64x8xf32> to vector<64x8xbf16>
    %c0_10 = arith.constant 0 : index
    %c0_11 = arith.constant 0 : index
    %20 = vector.load %arg2[%c0_10, %c0_11] : memref<64x16xbf16, #tpu.memory_space<vmem>>, vector<64x16xbf16>
    %c0_12 = arith.constant 0 : index
    %c0_13 = arith.constant 0 : index
    %21 = vector.load %arg6[%c0_12, %c0_13] : memref<320x64xbf16, #tpu.memory_space<vmem>>, vector<320x64xbf16>
    %22 = vector.extract_strided_slice %15 {offsets = [0, 0], sizes = [64, 20], strides = [1, 1]} : vector<64x40xbf16> to vector<64x20xbf16>
    %23 = vector.extract_strided_slice %17 {offsets = [0, 0], sizes = [64, 20], strides = [1, 1]} : vector<64x40xbf16> to vector<64x20xbf16>
    %24 = vector.extract_strided_slice %19 {offsets = [0, 0], sizes = [64, 4], strides = [1, 1]} : vector<64x8xbf16> to vector<64x4xbf16>
    %cst_14 = arith.constant dense<0.000000e+00> : vector<64x64xf32>
    %25 = tpu.matmul %22, %23, %cst_14 {dimension_numbers = #tpu.dot_dimension_numbers<[1], [1], [0], [0], [0, 0, 1, 0], [], []>} : vector<64x20xbf16>, vector<64x20xbf16>, vector<64x64xf32> -> vector<64x64xf32>
    %26 = vector.extract_strided_slice %20 {offsets = [0, 0], sizes = [64, 1], strides = [1, 1]} : vector<64x16xbf16> to vector<64x1xbf16>
    %27 = vector.broadcast %26 : vector<64x1xbf16> to vector<64x20xbf16>
    %28 = arith.mulf %22, %27 : vector<64x20xbf16>
    %29 = vector.extract_strided_slice %20 {offsets = [0, 1], sizes = [64, 1], strides = [1, 1]} : vector<64x16xbf16> to vector<64x1xbf16>
    %30 = vector.broadcast %29 : vector<64x1xbf16> to vector<64x20xbf16>
    %31 = arith.mulf %22, %30 : vector<64x20xbf16>
    %32 = vector.extract_strided_slice %20 {offsets = [0, 2], sizes = [64, 1], strides = [1, 1]} : vector<64x16xbf16> to vector<64x1xbf16>
    %33 = vector.broadcast %32 : vector<64x1xbf16> to vector<64x20xbf16>
    %34 = arith.mulf %22, %33 : vector<64x20xbf16>
    %35 = vector.extract_strided_slice %20 {offsets = [0, 3], sizes = [64, 1], strides = [1, 1]} : vector<64x16xbf16> to vector<64x1xbf16>
    %36 = vector.broadcast %35 : vector<64x1xbf16> to vector<64x20xbf16>
    %37 = arith.mulf %22, %36 : vector<64x20xbf16>
    %38 = vector.extract_strided_slice %20 {offsets = [0, 4], sizes = [64, 1], strides = [1, 1]} : vector<64x16xbf16> to vector<64x1xbf16>
    %39 = vector.broadcast %38 : vector<64x1xbf16> to vector<64x20xbf16>
    %40 = arith.mulf %22, %39 : vector<64x20xbf16>
    %41 = vector.extract_strided_slice %20 {offsets = [0, 5], sizes = [64, 1], strides = [1, 1]} : vector<64x16xbf16> to vector<64x1xbf16>
    %42 = vector.broadcast %41 : vector<64x1xbf16> to vector<64x20xbf16>
    %43 = arith.mulf %22, %42 : vector<64x20xbf16>
    %44 = vector.extract_strided_slice %20 {offsets = [0, 6], sizes = [64, 1], strides = [1, 1]} : vector<64x16xbf16> to vector<64x1xbf16>
    %45 = vector.broadcast %44 : vector<64x1xbf16> to vector<64x20xbf16>
    %46 = arith.mulf %22, %45 : vector<64x20xbf16>
    %47 = vector.extract_strided_slice %20 {offsets = [0, 7], sizes = [64, 1], strides = [1, 1]} : vector<64x16xbf16> to vector<64x1xbf16>
    %48 = vector.broadcast %47 : vector<64x1xbf16> to vector<64x20xbf16>
    %49 = arith.mulf %22, %48 : vector<64x20xbf16>
    %50 = vector.extract_strided_slice %20 {offsets = [0, 8], sizes = [64, 1], strides = [1, 1]} : vector<64x16xbf16> to vector<64x1xbf16>
    %51 = vector.broadcast %50 : vector<64x1xbf16> to vector<64x20xbf16>
    %52 = arith.mulf %22, %51 : vector<64x20xbf16>
    %53 = vector.extract_strided_slice %20 {offsets = [0, 9], sizes = [64, 1], strides = [1, 1]} : vector<64x16xbf16> to vector<64x1xbf16>
    %54 = vector.broadcast %53 : vector<64x1xbf16> to vector<64x20xbf16>
    %55 = arith.mulf %22, %54 : vector<64x20xbf16>
    %56 = vector.extract_strided_slice %20 {offsets = [0, 10], sizes = [64, 1], strides = [1, 1]} : vector<64x16xbf16> to vector<64x1xbf16>
    %57 = vector.broadcast %56 : vector<64x1xbf16> to vector<64x20xbf16>
    %58 = arith.mulf %22, %57 : vector<64x20xbf16>
    %59 = vector.extract_strided_slice %20 {offsets = [0, 11], sizes = [64, 1], strides = [1, 1]} : vector<64x16xbf16> to vector<64x1xbf16>
    %60 = vector.broadcast %59 : vector<64x1xbf16> to vector<64x20xbf16>
    %61 = arith.mulf %22, %60 : vector<64x20xbf16>
    %62 = vector.extract_strided_slice %20 {offsets = [0, 12], sizes = [64, 1], strides = [1, 1]} : vector<64x16xbf16> to vector<64x1xbf16>
    %63 = vector.broadcast %62 : vector<64x1xbf16> to vector<64x20xbf16>
    %64 = arith.mulf %22, %63 : vector<64x20xbf16>
    %65 = vector.extract_strided_slice %20 {offsets = [0, 13], sizes = [64, 1], strides = [1, 1]} : vector<64x16xbf16> to vector<64x1xbf16>
    %66 = vector.broadcast %65 : vector<64x1xbf16> to vector<64x20xbf16>
    %67 = arith.mulf %22, %66 : vector<64x20xbf16>
    %68 = vector.extract_strided_slice %20 {offsets = [0, 14], sizes = [64, 1], strides = [1, 1]} : vector<64x16xbf16> to vector<64x1xbf16>
    %69 = vector.broadcast %68 : vector<64x1xbf16> to vector<64x20xbf16>
    %70 = arith.mulf %22, %69 : vector<64x20xbf16>
    %71 = vector.extract_strided_slice %20 {offsets = [0, 15], sizes = [64, 1], strides = [1, 1]} : vector<64x16xbf16> to vector<64x1xbf16>
    %72 = vector.broadcast %71 : vector<64x1xbf16> to vector<64x20xbf16>
    %73 = arith.mulf %22, %72 : vector<64x20xbf16>
    %74 = tpu.concatenate %28, %31, %34, %37, %40, %43, %46, %49, %52, %55, %58, %61, %64, %67, %70, %73 in 1 : vector<64x20xbf16>, vector<64x20xbf16>, vector<64x20xbf16>, vector<64x20xbf16>, vector<64x20xbf16>, vector<64x20xbf16>, vector<64x20xbf16>, vector<64x20xbf16>, vector<64x20xbf16>, vector<64x20xbf16>, vector<64x20xbf16>, vector<64x20xbf16>, vector<64x20xbf16>, vector<64x20xbf16>, vector<64x20xbf16>, vector<64x20xbf16> -> vector<64x320xbf16>
    %cst_15 = arith.constant dense<0.000000e+00> : vector<64x64xf32>
    %75 = tpu.matmul %74, %21, %cst_15 {dimension_numbers = #tpu.dot_dimension_numbers<[1], [0], [0], [1], [0, 0, 1, 1], [], []>} : vector<64x320xbf16>, vector<320x64xbf16>, vector<64x64xf32> -> vector<64x64xf32>
    %76 = arith.addf %25, %75 : vector<64x64xf32>
    %cst_16 = arith.constant dense<0xFF800000> : vector<64xf32>
    %77 = vector.multi_reduction <maximumf>, %76, %cst_16 [1] : vector<64x64xf32> to vector<64xf32>
    %78 = vector.shape_cast %77 : vector<64xf32> to vector<64x1xf32>
    %79 = vector.broadcast %78 : vector<64x1xf32> to vector<64x64xf32>
    %80 = arith.subf %76, %79 : vector<64x64xf32>
    %81 = math.exp %80 : vector<64x64xf32>
    %cst_17 = arith.constant dense<0.000000e+00> : vector<64xf32>
    %82 = vector.multi_reduction <add>, %81, %cst_17 [1] : vector<64x64xf32> to vector<64xf32>
    %83 = vector.shape_cast %82 : vector<64xf32> to vector<64x1xf32>
    %84 = tpu.reciprocal %83 {approx = true} : vector<64x1xf32> -> vector<64x1xf32>
    %85 = vector.broadcast %84 : vector<64x1xf32> to vector<64x64xf32>
    %86 = arith.mulf %81, %85 : vector<64x64xf32>
    %87 = arith.truncf %86 : vector<64x64xf32> to vector<64x64xbf16>
    %cst_18 = arith.constant dense<0.000000e+00> : vector<64x4xf32>
    %88 = tpu.matmul %87, %24, %cst_18 {dimension_numbers = #tpu.dot_dimension_numbers<[1], [0], [0], [1], [0, 0, 1, 1], [], []>} : vector<64x64xbf16>, vector<64x4xbf16>, vector<64x4xf32> -> vector<64x4xf32>
    %89 = vector.extract_strided_slice %15 {offsets = [0, 20], sizes = [64, 20], strides = [1, 1]} : vector<64x40xbf16> to vector<64x20xbf16>
    %90 = vector.extract_strided_slice %17 {offsets = [0, 20], sizes = [64, 20], strides = [1, 1]} : vector<64x40xbf16> to vector<64x20xbf16>
    %91 = vector.extract_strided_slice %19 {offsets = [0, 4], sizes = [64, 4], strides = [1, 1]} : vector<64x8xbf16> to vector<64x4xbf16>
    %cst_19 = arith.constant dense<0.000000e+00> : vector<64x64xf32>
    %92 = tpu.matmul %89, %90, %cst_19 {dimension_numbers = #tpu.dot_dimension_numbers<[1], [1], [0], [0], [0, 0, 1, 0], [], []>} : vector<64x20xbf16>, vector<64x20xbf16>, vector<64x64xf32> -> vector<64x64xf32>
    %93 = vector.extract_strided_slice %20 {offsets = [0, 0], sizes = [64, 1], strides = [1, 1]} : vector<64x16xbf16> to vector<64x1xbf16>
    %94 = vector.broadcast %93 : vector<64x1xbf16> to vector<64x20xbf16>
    %95 = arith.mulf %89, %94 : vector<64x20xbf16>
    %96 = vector.extract_strided_slice %20 {offsets = [0, 1], sizes = [64, 1], strides = [1, 1]} : vector<64x16xbf16> to vector<64x1xbf16>
    %97 = vector.broadcast %96 : vector<64x1xbf16> to vector<64x20xbf16>
    %98 = arith.mulf %89, %97 : vector<64x20xbf16>
    %99 = vector.extract_strided_slice %20 {offsets = [0, 2], sizes = [64, 1], strides = [1, 1]} : vector<64x16xbf16> to vector<64x1xbf16>
    %100 = vector.broadcast %99 : vector<64x1xbf16> to vector<64x20xbf16>
    %101 = arith.mulf %89, %100 : vector<64x20xbf16>
    %102 = vector.extract_strided_slice %20 {offsets = [0, 3], sizes = [64, 1], strides = [1, 1]} : vector<64x16xbf16> to vector<64x1xbf16>
    %103 = vector.broadcast %102 : vector<64x1xbf16> to vector<64x20xbf16>
    %104 = arith.mulf %89, %103 : vector<64x20xbf16>
    %105 = vector.extract_strided_slice %20 {offsets = [0, 4], sizes = [64, 1], strides = [1, 1]} : vector<64x16xbf16> to vector<64x1xbf16>
    %106 = vector.broadcast %105 : vector<64x1xbf16> to vector<64x20xbf16>
    %107 = arith.mulf %89, %106 : vector<64x20xbf16>
    %108 = vector.extract_strided_slice %20 {offsets = [0, 5], sizes = [64, 1], strides = [1, 1]} : vector<64x16xbf16> to vector<64x1xbf16>
    %109 = vector.broadcast %108 : vector<64x1xbf16> to vector<64x20xbf16>
    %110 = arith.mulf %89, %109 : vector<64x20xbf16>
    %111 = vector.extract_strided_slice %20 {offsets = [0, 6], sizes = [64, 1], strides = [1, 1]} : vector<64x16xbf16> to vector<64x1xbf16>
    %112 = vector.broadcast %111 : vector<64x1xbf16> to vector<64x20xbf16>
    %113 = arith.mulf %89, %112 : vector<64x20xbf16>
    %114 = vector.extract_strided_slice %20 {offsets = [0, 7], sizes = [64, 1], strides = [1, 1]} : vector<64x16xbf16> to vector<64x1xbf16>
    %115 = vector.broadcast %114 : vector<64x1xbf16> to vector<64x20xbf16>
    %116 = arith.mulf %89, %115 : vector<64x20xbf16>
    %117 = vector.extract_strided_slice %20 {offsets = [0, 8], sizes = [64, 1], strides = [1, 1]} : vector<64x16xbf16> to vector<64x1xbf16>
    %118 = vector.broadcast %117 : vector<64x1xbf16> to vector<64x20xbf16>
    %119 = arith.mulf %89, %118 : vector<64x20xbf16>
    %120 = vector.extract_strided_slice %20 {offsets = [0, 9], sizes = [64, 1], strides = [1, 1]} : vector<64x16xbf16> to vector<64x1xbf16>
    %121 = vector.broadcast %120 : vector<64x1xbf16> to vector<64x20xbf16>
    %122 = arith.mulf %89, %121 : vector<64x20xbf16>
    %123 = vector.extract_strided_slice %20 {offsets = [0, 10], sizes = [64, 1], strides = [1, 1]} : vector<64x16xbf16> to vector<64x1xbf16>
    %124 = vector.broadcast %123 : vector<64x1xbf16> to vector<64x20xbf16>
    %125 = arith.mulf %89, %124 : vector<64x20xbf16>
    %126 = vector.extract_strided_slice %20 {offsets = [0, 11], sizes = [64, 1], strides = [1, 1]} : vector<64x16xbf16> to vector<64x1xbf16>
    %127 = vector.broadcast %126 : vector<64x1xbf16> to vector<64x20xbf16>
    %128 = arith.mulf %89, %127 : vector<64x20xbf16>
    %129 = vector.extract_strided_slice %20 {offsets = [0, 12], sizes = [64, 1], strides = [1, 1]} : vector<64x16xbf16> to vector<64x1xbf16>
    %130 = vector.broadcast %129 : vector<64x1xbf16> to vector<64x20xbf16>
    %131 = arith.mulf %89, %130 : vector<64x20xbf16>
    %132 = vector.extract_strided_slice %20 {offsets = [0, 13], sizes = [64, 1], strides = [1, 1]} : vector<64x16xbf16> to vector<64x1xbf16>
    %133 = vector.broadcast %132 : vector<64x1xbf16> to vector<64x20xbf16>
    %134 = arith.mulf %89, %133 : vector<64x20xbf16>
    %135 = vector.extract_strided_slice %20 {offsets = [0, 14], sizes = [64, 1], strides = [1, 1]} : vector<64x16xbf16> to vector<64x1xbf16>
    %136 = vector.broadcast %135 : vector<64x1xbf16> to vector<64x20xbf16>
    %137 = arith.mulf %89, %136 : vector<64x20xbf16>
    %138 = vector.extract_strided_slice %20 {offsets = [0, 15], sizes = [64, 1], strides = [1, 1]} : vector<64x16xbf16> to vector<64x1xbf16>
    %139 = vector.broadcast %138 : vector<64x1xbf16> to vector<64x20xbf16>
    %140 = arith.mulf %89, %139 : vector<64x20xbf16>
    %141 = tpu.concatenate %95, %98, %101, %104, %107, %110, %113, %116, %119, %122, %125, %128, %131, %134, %137, %140 in 1 : vector<64x20xbf16>, vector<64x20xbf16>, vector<64x20xbf16>, vector<64x20xbf16>, vector<64x20xbf16>, vector<64x20xbf16>, vector<64x20xbf16>, vector<64x20xbf16>, vector<64x20xbf16>, vector<64x20xbf16>, vector<64x20xbf16>, vector<64x20xbf16>, vector<64x20xbf16>, vector<64x20xbf16>, vector<64x20xbf16>, vector<64x20xbf16> -> vector<64x320xbf16>
    %cst_20 = arith.constant dense<0.000000e+00> : vector<64x64xf32>
    %142 = tpu.matmul %141, %21, %cst_20 {dimension_numbers = #tpu.dot_dimension_numbers<[1], [0], [0], [1], [0, 0, 1, 1], [], []>} : vector<64x320xbf16>, vector<320x64xbf16>, vector<64x64xf32> -> vector<64x64xf32>
    %143 = arith.addf %92, %142 : vector<64x64xf32>
    %cst_21 = arith.constant dense<0xFF800000> : vector<64xf32>
    %144 = vector.multi_reduction <maximumf>, %143, %cst_21 [1] : vector<64x64xf32> to vector<64xf32>
    %145 = vector.shape_cast %144 : vector<64xf32> to vector<64x1xf32>
    %146 = vector.broadcast %145 : vector<64x1xf32> to vector<64x64xf32>
    %147 = arith.subf %143, %146 : vector<64x64xf32>
    %148 = math.exp %147 : vector<64x64xf32>
    %cst_22 = arith.constant dense<0.000000e+00> : vector<64xf32>
    %149 = vector.multi_reduction <add>, %148, %cst_22 [1] : vector<64x64xf32> to vector<64xf32>
    %150 = vector.shape_cast %149 : vector<64xf32> to vector<64x1xf32>
    %151 = tpu.reciprocal %150 {approx = true} : vector<64x1xf32> -> vector<64x1xf32>
    %152 = vector.broadcast %151 : vector<64x1xf32> to vector<64x64xf32>
    %153 = arith.mulf %148, %152 : vector<64x64xf32>
    %154 = arith.truncf %153 : vector<64x64xf32> to vector<64x64xbf16>
    %cst_23 = arith.constant dense<0.000000e+00> : vector<64x4xf32>
    %155 = tpu.matmul %154, %91, %cst_23 {dimension_numbers = #tpu.dot_dimension_numbers<[1], [0], [0], [1], [0, 0, 1, 1], [], []>} : vector<64x64xbf16>, vector<64x4xbf16>, vector<64x4xf32> -> vector<64x4xf32>
    %156 = tpu.concatenate %88, %155 in 1 : vector<64x4xf32>, vector<64x4xf32> -> vector<64x8xf32>
    %cst_24 = arith.constant 0.000000e+00 : f32
    %157 = vector.broadcast %cst_24 : f32 to vector<10x10x16xf32>
    %c0_25 = arith.constant 0 : index
    %c0_26 = arith.constant 0 : index
    %c0_27 = arith.constant 0 : index
    %158 = vector.load %arg14[%c0_25, %c0_26, %c0_27] : memref<10x10x16xf32, #tpu.memory_space<vmem>>, vector<10x10x16xf32>
    tpu.vector_store %arg14[%c0_25, %c0_26, %c0_27], %157 {strides = array<i32>} : memref<10x10x16xf32, #tpu.memory_space<vmem>>, vector<10x10x16xf32>,
    %159 = vector.shape_cast %10 : vector<64x16xf32> to vector<8x8x16xf32>
    %c1 = arith.constant 1 : index
    %c1_28 = arith.constant 1 : index
    %c0_29 = arith.constant 0 : index
    %160 = vector.load %arg14[%c1, %c1_28, %c0_29] : memref<10x10x16xf32, #tpu.memory_space<vmem>>, vector<8x8x16xf32>
    tpu.vector_store %arg14[%c1, %c1_28, %c0_29], %159 {strides = array<i32>} : memref<10x10x16xf32, #tpu.memory_space<vmem>>, vector<8x8x16xf32>,
    %cst_30 = arith.constant 0.000000e+00 : f32
    %161 = vector.broadcast %cst_30 : f32 to vector<64x8xf32>
    %c0_31 = arith.constant 0 : index
    %c0_32 = arith.constant 0 : index
    %c0_33 = arith.constant 0 : index
    %162 = vector.load %arg14[%c0_31, %c0_32, %c0_33] : memref<10x10x16xf32, #tpu.memory_space<vmem>>, vector<8x8x16xf32>
    %163 = vector.shape_cast %162 : vector<8x8x16xf32> to vector<64x16xf32>
    %164 = arith.truncf %163 : vector<64x16xf32> to vector<64x16xbf16>
    %c0_34 = arith.constant 0 : index
    %c0_35 = arith.constant 0 : index
    %c0_36 = arith.constant 0 : index
    %165 = vector.load %arg7[%c0_34, %c0_35, %c0_36] : memref<9x16x8xbf16, #tpu.memory_space<vmem>>, vector<1x16x8xbf16>
    %166 = vector.shape_cast %165 : vector<1x16x8xbf16> to vector<16x8xbf16>
    %cst_37 = arith.constant dense<0.000000e+00> : vector<64x8xf32>
    %167 = tpu.matmul %164, %166, %cst_37 {dimension_numbers = #tpu.dot_dimension_numbers<[1], [0], [0], [1], [0, 0, 1, 1], [], []>} : vector<64x16xbf16>, vector<16x8xbf16>, vector<64x8xf32> -> vector<64x8xf32>
    %168 = arith.addf %161, %167 : vector<64x8xf32>
    %c0_38 = arith.constant 0 : index
    %c1_39 = arith.constant 1 : index
    %c0_40 = arith.constant 0 : index
    %169 = vector.load %arg14[%c0_38, %c1_39, %c0_40] : memref<10x10x16xf32, #tpu.memory_space<vmem>>, vector<8x8x16xf32>
    %170 = vector.shape_cast %169 : vector<8x8x16xf32> to vector<64x16xf32>
    %171 = arith.truncf %170 : vector<64x16xf32> to vector<64x16xbf16>
    %c1_41 = arith.constant 1 : index
    %c0_42 = arith.constant 0 : index
    %c0_43 = arith.constant 0 : index
    %172 = vector.load %arg7[%c1_41, %c0_42, %c0_43] : memref<9x16x8xbf16, #tpu.memory_space<vmem>>, vector<1x16x8xbf16>
    %173 = vector.shape_cast %172 : vector<1x16x8xbf16> to vector<16x8xbf16>
    %cst_44 = arith.constant dense<0.000000e+00> : vector<64x8xf32>
    %174 = tpu.matmul %171, %173, %cst_44 {dimension_numbers = #tpu.dot_dimension_numbers<[1], [0], [0], [1], [0, 0, 1, 1], [], []>} : vector<64x16xbf16>, vector<16x8xbf16>, vector<64x8xf32> -> vector<64x8xf32>
    %175 = arith.addf %168, %174 : vector<64x8xf32>
    %c0_45 = arith.constant 0 : index
    %c2 = arith.constant 2 : index
    %c0_46 = arith.constant 0 : index
    %176 = vector.load %arg14[%c0_45, %c2, %c0_46] : memref<10x10x16xf32, #tpu.memory_space<vmem>>, vector<8x8x16xf32>
    %177 = vector.shape_cast %176 : vector<8x8x16xf32> to vector<64x16xf32>
    %178 = arith.truncf %177 : vector<64x16xf32> to vector<64x16xbf16>
    %c2_47 = arith.constant 2 : index
    %c0_48 = arith.constant 0 : index
    %c0_49 = arith.constant 0 : index
    %179 = vector.load %arg7[%c2_47, %c0_48, %c0_49] : memref<9x16x8xbf16, #tpu.memory_space<vmem>>, vector<1x16x8xbf16>
    %180 = vector.shape_cast %179 : vector<1x16x8xbf16> to vector<16x8xbf16>
    %cst_50 = arith.constant dense<0.000000e+00> : vector<64x8xf32>
    %181 = tpu.matmul %178, %180, %cst_50 {dimension_numbers = #tpu.dot_dimension_numbers<[1], [0], [0], [1], [0, 0, 1, 1], [], []>} : vector<64x16xbf16>, vector<16x8xbf16>, vector<64x8xf32> -> vector<64x8xf32>
    %182 = arith.addf %175, %181 : vector<64x8xf32>
    %c1_51 = arith.constant 1 : index
    %c0_52 = arith.constant 0 : index
    %c0_53 = arith.constant 0 : index
    %183 = vector.load %arg14[%c1_51, %c0_52, %c0_53] : memref<10x10x16xf32, #tpu.memory_space<vmem>>, vector<8x8x16xf32>
    %184 = vector.shape_cast %183 : vector<8x8x16xf32> to vector<64x16xf32>
    %185 = arith.truncf %184 : vector<64x16xf32> to vector<64x16xbf16>
    %c3 = arith.constant 3 : index
    %c0_54 = arith.constant 0 : index
    %c0_55 = arith.constant 0 : index
    %186 = vector.load %arg7[%c3, %c0_54, %c0_55] : memref<9x16x8xbf16, #tpu.memory_space<vmem>>, vector<1x16x8xbf16>
    %187 = vector.shape_cast %186 : vector<1x16x8xbf16> to vector<16x8xbf16>
    %cst_56 = arith.constant dense<0.000000e+00> : vector<64x8xf32>
    %188 = tpu.matmul %185, %187, %cst_56 {dimension_numbers = #tpu.dot_dimension_numbers<[1], [0], [0], [1], [0, 0, 1, 1], [], []>} : vector<64x16xbf16>, vector<16x8xbf16>, vector<64x8xf32> -> vector<64x8xf32>
    %189 = arith.addf %182, %188 : vector<64x8xf32>
    %c1_57 = arith.constant 1 : index
    %c1_58 = arith.constant 1 : index
    %c0_59 = arith.constant 0 : index
    %190 = vector.load %arg14[%c1_57, %c1_58, %c0_59] : memref<10x10x16xf32, #tpu.memory_space<vmem>>, vector<8x8x16xf32>
    %191 = vector.shape_cast %190 : vector<8x8x16xf32> to vector<64x16xf32>
    %192 = arith.truncf %191 : vector<64x16xf32> to vector<64x16xbf16>
    %c4 = arith.constant 4 : index
    %c0_60 = arith.constant 0 : index
    %c0_61 = arith.constant 0 : index
    %193 = vector.load %arg7[%c4, %c0_60, %c0_61] : memref<9x16x8xbf16, #tpu.memory_space<vmem>>, vector<1x16x8xbf16>
    %194 = vector.shape_cast %193 : vector<1x16x8xbf16> to vector<16x8xbf16>
    %cst_62 = arith.constant dense<0.000000e+00> : vector<64x8xf32>
    %195 = tpu.matmul %192, %194, %cst_62 {dimension_numbers = #tpu.dot_dimension_numbers<[1], [0], [0], [1], [0, 0, 1, 1], [], []>} : vector<64x16xbf16>, vector<16x8xbf16>, vector<64x8xf32> -> vector<64x8xf32>
    %196 = arith.addf %189, %195 : vector<64x8xf32>
    %c1_63 = arith.constant 1 : index
    %c2_64 = arith.constant 2 : index
    %c0_65 = arith.constant 0 : index
    %197 = vector.load %arg14[%c1_63, %c2_64, %c0_65] : memref<10x10x16xf32, #tpu.memory_space<vmem>>, vector<8x8x16xf32>
    %198 = vector.shape_cast %197 : vector<8x8x16xf32> to vector<64x16xf32>
    %199 = arith.truncf %198 : vector<64x16xf32> to vector<64x16xbf16>
    %c5 = arith.constant 5 : index
    %c0_66 = arith.constant 0 : index
    %c0_67 = arith.constant 0 : index
    %200 = vector.load %arg7[%c5, %c0_66, %c0_67] : memref<9x16x8xbf16, #tpu.memory_space<vmem>>, vector<1x16x8xbf16>
    %201 = vector.shape_cast %200 : vector<1x16x8xbf16> to vector<16x8xbf16>
    %cst_68 = arith.constant dense<0.000000e+00> : vector<64x8xf32>
    %202 = tpu.matmul %199, %201, %cst_68 {dimension_numbers = #tpu.dot_dimension_numbers<[1], [0], [0], [1], [0, 0, 1, 1], [], []>} : vector<64x16xbf16>, vector<16x8xbf16>, vector<64x8xf32> -> vector<64x8xf32>
    %203 = arith.addf %196, %202 : vector<64x8xf32>
    %c2_69 = arith.constant 2 : index
    %c0_70 = arith.constant 0 : index
    %c0_71 = arith.constant 0 : index
    %204 = vector.load %arg14[%c2_69, %c0_70, %c0_71] : memref<10x10x16xf32, #tpu.memory_space<vmem>>, vector<8x8x16xf32>
    %205 = vector.shape_cast %204 : vector<8x8x16xf32> to vector<64x16xf32>
    %206 = arith.truncf %205 : vector<64x16xf32> to vector<64x16xbf16>
    %c6 = arith.constant 6 : index
    %c0_72 = arith.constant 0 : index
    %c0_73 = arith.constant 0 : index
    %207 = vector.load %arg7[%c6, %c0_72, %c0_73] : memref<9x16x8xbf16, #tpu.memory_space<vmem>>, vector<1x16x8xbf16>
    %208 = vector.shape_cast %207 : vector<1x16x8xbf16> to vector<16x8xbf16>
    %cst_74 = arith.constant dense<0.000000e+00> : vector<64x8xf32>
    %209 = tpu.matmul %206, %208, %cst_74 {dimension_numbers = #tpu.dot_dimension_numbers<[1], [0], [0], [1], [0, 0, 1, 1], [], []>} : vector<64x16xbf16>, vector<16x8xbf16>, vector<64x8xf32> -> vector<64x8xf32>
    %210 = arith.addf %203, %209 : vector<64x8xf32>
    %c2_75 = arith.constant 2 : index
    %c1_76 = arith.constant 1 : index
    %c0_77 = arith.constant 0 : index
    %211 = vector.load %arg14[%c2_75, %c1_76, %c0_77] : memref<10x10x16xf32, #tpu.memory_space<vmem>>, vector<8x8x16xf32>
    %212 = vector.shape_cast %211 : vector<8x8x16xf32> to vector<64x16xf32>
    %213 = arith.truncf %212 : vector<64x16xf32> to vector<64x16xbf16>
    %c7 = arith.constant 7 : index
    %c0_78 = arith.constant 0 : index
    %c0_79 = arith.constant 0 : index
    %214 = vector.load %arg7[%c7, %c0_78, %c0_79] : memref<9x16x8xbf16, #tpu.memory_space<vmem>>, vector<1x16x8xbf16>
    %215 = vector.shape_cast %214 : vector<1x16x8xbf16> to vector<16x8xbf16>
    %cst_80 = arith.constant dense<0.000000e+00> : vector<64x8xf32>
    %216 = tpu.matmul %213, %215, %cst_80 {dimension_numbers = #tpu.dot_dimension_numbers<[1], [0], [0], [1], [0, 0, 1, 1], [], []>} : vector<64x16xbf16>, vector<16x8xbf16>, vector<64x8xf32> -> vector<64x8xf32>
    %217 = arith.addf %210, %216 : vector<64x8xf32>
    %c2_81 = arith.constant 2 : index
    %c2_82 = arith.constant 2 : index
    %c0_83 = arith.constant 0 : index
    %218 = vector.load %arg14[%c2_81, %c2_82, %c0_83] : memref<10x10x16xf32, #tpu.memory_space<vmem>>, vector<8x8x16xf32>
    %219 = vector.shape_cast %218 : vector<8x8x16xf32> to vector<64x16xf32>
    %220 = arith.truncf %219 : vector<64x16xf32> to vector<64x16xbf16>
    %c8 = arith.constant 8 : index
    %c0_84 = arith.constant 0 : index
    %c0_85 = arith.constant 0 : index
    %221 = vector.load %arg7[%c8, %c0_84, %c0_85] : memref<9x16x8xbf16, #tpu.memory_space<vmem>>, vector<1x16x8xbf16>
    %222 = vector.shape_cast %221 : vector<1x16x8xbf16> to vector<16x8xbf16>
    %cst_86 = arith.constant dense<0.000000e+00> : vector<64x8xf32>
    %223 = tpu.matmul %220, %222, %cst_86 {dimension_numbers = #tpu.dot_dimension_numbers<[1], [0], [0], [1], [0, 0, 1, 1], [], []>} : vector<64x16xbf16>, vector<16x8xbf16>, vector<64x8xf32> -> vector<64x8xf32>
    %224 = arith.addf %217, %223 : vector<64x8xf32>
    %c0_87 = arith.constant 0 : index
    %c0_88 = arith.constant 0 : index
    %225 = vector.load %arg8[%c0_87, %c0_88] : memref<1x16xf32, #tpu.memory_space<vmem>>, vector<1x16xf32>
    %226 = vector.extract_strided_slice %225 {offsets = [0, 0], sizes = [1, 8], strides = [1, 1]} : vector<1x16xf32> to vector<1x8xf32>
    %227 = vector.broadcast %226 : vector<1x8xf32> to vector<64x8xf32>
    %228 = arith.addf %224, %227 : vector<64x8xf32>
    %cst_89 = arith.constant 0.000000e+00 : f32
    %229 = vector.broadcast %cst_89 : f32 to vector<64x8xf32>
    %230 = arith.maximumf %228, %229 : vector<64x8xf32>
    %231 = arith.truncf %156 : vector<64x8xf32> to vector<64x8xbf16>
    %c0_90 = arith.constant 0 : index
    %c0_91 = arith.constant 0 : index
    %232 = vector.load %arg9[%c0_90, %c0_91] : memref<8x8xbf16, #tpu.memory_space<vmem>>, vector<8x8xbf16>
    %cst_92 = arith.constant dense<0.000000e+00> : vector<64x8xf32>
    %233 = tpu.matmul %231, %232, %cst_92 {dimension_numbers = #tpu.dot_dimension_numbers<[1], [0], [0], [1], [0, 0, 1, 1], [], []>} : vector<64x8xbf16>, vector<8x8xbf16>, vector<64x8xf32> -> vector<64x8xf32>
    %234 = vector.extract_strided_slice %225 {offsets = [0, 8], sizes = [1, 8], strides = [1, 1]} : vector<1x16xf32> to vector<1x8xf32>
    %235 = vector.broadcast %234 : vector<1x8xf32> to vector<64x8xf32>
    %236 = arith.addf %233, %235 : vector<64x8xf32>
    %cst_93 = arith.constant 0.000000e+00 : f32
    %237 = vector.broadcast %cst_93 : f32 to vector<64x8xf32>
    %238 = arith.maximumf %236, %237 : vector<64x8xf32>
    %239 = arith.truncf %230 : vector<64x8xf32> to vector<64x8xbf16>
    %c0_94 = arith.constant 0 : index
    %c0_95 = arith.constant 0 : index
    %240 = vector.load %arg10[%c0_94, %c0_95] : memref<8x64xbf16, #tpu.memory_space<vmem>>, vector<8x64xbf16>
    %cst_96 = arith.constant dense<0.000000e+00> : vector<64x64xf32>
    %241 = tpu.matmul %239, %240, %cst_96 {dimension_numbers = #tpu.dot_dimension_numbers<[1], [0], [0], [1], [0, 0, 1, 1], [], []>} : vector<64x8xbf16>, vector<8x64xbf16>, vector<64x64xf32> -> vector<64x64xf32>
    %242 = arith.truncf %238 : vector<64x8xf32> to vector<64x8xbf16>
    %c0_97 = arith.constant 0 : index
    %c0_98 = arith.constant 0 : index
    %243 = vector.load %arg11[%c0_97, %c0_98] : memref<8x64xbf16, #tpu.memory_space<vmem>>, vector<8x64xbf16>
    %cst_99 = arith.constant dense<0.000000e+00> : vector<64x64xf32>
    %244 = tpu.matmul %242, %243, %cst_99 {dimension_numbers = #tpu.dot_dimension_numbers<[1], [0], [0], [1], [0, 0, 1, 1], [], []>} : vector<64x8xbf16>, vector<8x64xbf16>, vector<64x64xf32> -> vector<64x64xf32>
    %245 = arith.addf %241, %244 : vector<64x64xf32>
    %c0_100 = arith.constant 0 : index
    %c0_101 = arith.constant 0 : index
    %246 = vector.load %arg12[%c0_100, %c0_101] : memref<1x64xf32, #tpu.memory_space<vmem>>, vector<1x64xf32>
    %247 = vector.broadcast %246 : vector<1x64xf32> to vector<64x64xf32>
    %248 = arith.addf %245, %247 : vector<64x64xf32>
    %249 = tpu.transpose %248, [1, 0] : vector<64x64xf32> -> vector<64x64xf32>
    %250 = arith.addf %249, %1 : vector<64x64xf32>
    %cst_102 = arith.constant 0.000000e+00 : f32
    %251 = vector.broadcast %cst_102 : f32 to vector<64x64xf32>
    %252 = arith.maximumf %250, %251 : vector<64x64xf32>
    %c0_103 = arith.constant 0 : index
    %c0_104 = arith.constant 0 : index
    %c0_105 = arith.constant 0 : index
    %253 = vector.load %arg13[%c0_103, %c0_104, %c0_105] : memref<1x64x64xf32, #tpu.memory_space<vmem>>, vector<1x64x64xf32>
    %254 = vector.shape_cast %253 : vector<1x64x64xf32> to vector<64x64xf32>
    %255 = vector.shape_cast %252 : vector<64x64xf32> to vector<1x64x64xf32>
    tpu.vector_store %arg13[%c0_103, %c0_104, %c0_105], %255 {strides = array<i32>} : memref<1x64x64xf32, #tpu.memory_space<vmem>>, vector<1x64x64xf32>,
    return
  }
  func.func @transform_0(%arg0: i32) -> (i32, i32, i32) {
    %c0_i32 = arith.constant 0 : i32
    %c0_i32_0 = arith.constant 0 : i32
    %c0_i32_1 = arith.constant 0 : i32
    return %arg0, %c0_i32, %c0_i32_0 : i32, i32, i32
  }
  func.func @transform_1(%arg0: i32) -> (i32, i32) {
    %c0_i32 = arith.constant 0 : i32
    %c0_i32_0 = arith.constant 0 : i32
    %c0_i32_1 = arith.constant 0 : i32
    return %c0_i32, %c0_i32_0 : i32, i32
  }
  func.func @transform_2(%arg0: i32) -> (i32, i32) {
    %c0_i32 = arith.constant 0 : i32
    %c0_i32_0 = arith.constant 0 : i32
    %c0_i32_1 = arith.constant 0 : i32
    return %c0_i32, %c0_i32_0 : i32, i32
  }
  func.func @transform_3(%arg0: i32) -> (i32, i32) {
    %c0_i32 = arith.constant 0 : i32
    %c0_i32_0 = arith.constant 0 : i32
    %c0_i32_1 = arith.constant 0 : i32
    return %c0_i32, %c0_i32_0 : i32, i32
  }
  func.func @transform_4(%arg0: i32) -> (i32, i32) {
    %c0_i32 = arith.constant 0 : i32
    %c0_i32_0 = arith.constant 0 : i32
    %c0_i32_1 = arith.constant 0 : i32
    return %c0_i32, %c0_i32_0 : i32, i32
  }
  func.func @transform_5(%arg0: i32) -> (i32, i32) {
    %c0_i32 = arith.constant 0 : i32
    %c0_i32_0 = arith.constant 0 : i32
    %c0_i32_1 = arith.constant 0 : i32
    return %c0_i32, %c0_i32_0 : i32, i32
  }
  func.func @transform_6(%arg0: i32) -> (i32, i32, i32) {
    %c0_i32 = arith.constant 0 : i32
    %c0_i32_0 = arith.constant 0 : i32
    %c0_i32_1 = arith.constant 0 : i32
    %c0_i32_2 = arith.constant 0 : i32
    return %c0_i32, %c0_i32_0, %c0_i32_1 : i32, i32, i32
  }
  func.func @transform_7(%arg0: i32) -> (i32, i32) {
    %c0_i32 = arith.constant 0 : i32
    %c0_i32_0 = arith.constant 0 : i32
    %c0_i32_1 = arith.constant 0 : i32
    return %c0_i32, %c0_i32_0 : i32, i32
  }
  func.func @transform_8(%arg0: i32) -> (i32, i32) {
    %c0_i32 = arith.constant 0 : i32
    %c0_i32_0 = arith.constant 0 : i32
    %c0_i32_1 = arith.constant 0 : i32
    return %c0_i32, %c0_i32_0 : i32, i32
  }
  func.func @transform_9(%arg0: i32) -> (i32, i32) {
    %c0_i32 = arith.constant 0 : i32
    %c0_i32_0 = arith.constant 0 : i32
    %c0_i32_1 = arith.constant 0 : i32
    return %c0_i32, %c0_i32_0 : i32, i32
  }
  func.func @transform_10(%arg0: i32) -> (i32, i32) {
    %c0_i32 = arith.constant 0 : i32
    %c0_i32_0 = arith.constant 0 : i32
    %c0_i32_1 = arith.constant 0 : i32
    return %c0_i32, %c0_i32_0 : i32, i32
  }
  func.func @transform_11(%arg0: i32) -> (i32, i32) {
    %c0_i32 = arith.constant 0 : i32
    %c0_i32_0 = arith.constant 0 : i32
    %c0_i32_1 = arith.constant 0 : i32
    return %c0_i32, %c0_i32_0 : i32, i32
  }
  func.func @transform_12(%arg0: i32) -> (i32, i32, i32) {
    %c0_i32 = arith.constant 0 : i32
    %c0_i32_0 = arith.constant 0 : i32
    %c0_i32_1 = arith.constant 0 : i32
    return %arg0, %c0_i32, %c0_i32_0 : i32, i32, i32
  }
}

</mosaic_0001>

<bundles_post_ra>
// kernel: bottleneck_forward.1
= control target key start
LH: loop header
LB: loop body
LE: loop exit
PB: predicated region body
PF: predicated region fallthrough
CT: control target
= control target key end

     0   :  { %s6706_s21 = smov 0   ;;  %s8724_s0 = inlined_call_operand.vmem [shape: f32[2,64,64], index: 0, kind: input, shape index: {}]   ;;  %s8725_s1 = inlined_call_operand.vmem [shape: bf16[64,16], index: 1, kind: input, shape index: {}]   ;;  %s8726_s2 = inlined_call_operand.vmem [shape: bf16[64,16], index: 2, kind: input, shape index: {}]   ;;  %s8727_s3 = inlined_call_operand.vmem [shape: f32[1,16], index: 3, kind: input, shape index: {}]   ;;  %s8728_s4 = inlined_call_operand.vmem [shape: bf16[16,88], index: 4, kind: input, shape index: {}]   ;;  %s8729_s5 = inlined_call_operand.vmem [shape: bf16[320,64], index: 5, kind: input, shape index: {}]   ;;  %s8730_s6 = inlined_call_operand.vmem [shape: bf16[9,16,8], index: 6, kind: input, shape index: {}]   ;;  %s8731_s7 = inlined_call_operand.vmem [shape: f32[1,16], index: 7, kind: input, shape index: {}]   ;;  %s8732_s8 = inlined_call_operand.vmem [shape: bf16[8,8], index: 8, kind: input, shape index: {}]   ;;  %s8733_s9 = inlined_call_operand.vmem [shape: bf16[8,64], index: 9, kind: input, shape index: {}]   ;;  %s8734_s10 = inlined_call_operand.vmem [shape: bf16[8,64], index: 10, kind: input, shape index: {}]   ;;  %s8735_s11 = inlined_call_operand.vmem [shape: f32[1,64], index: 11, kind: input, shape index: {}]   ;;  %s8736_s12 = inlined_call_operand.vmem [shape: f32[2,64,64], index: 12, kind: output, shape index: {}]  }
   0x1 LB: > { %s5562_s22 = sadd.s32 4294967295, %s6602_s21   ;;  %p5566_p0 = scmp.ge.s32.totalorder %s6602_s21, 1  ;;  %s6602_s21 = sphi %s6706_s21, %s22_s21  }
   0x2   : > { %p362_p1 = scmp.lt.s32.totalorder %s6602_s21, 3 }
   0x4   : > { %p363_p2 = pnand %p5566_p0, %p362_p1 }
   0x6   : > { %366 = sbr.rel (%p363_p2) target bundleno = 2998 (0xbb6), region = 68 }
   0xd   : > { %p404_p3 = scmp.lt.s32.totalorder %s5562_s22, 1  ;;  %v6717_v0 = vld [vmem:[%s8725_s1] sm:$0xf]  ;;  %v6604_v1 = vmov 6   ;;  %v6729_v3 = vld [vmem:[%s8725_s1 + $0x4] sm:$0xf] }
   0xe   : > { %6383 = vset.pattern.permute.xlu1 %v6604_v1  ;;  %v6473_v2 = vld [vmem:[%s8726_s2] sm:$0xff]   ;;  %v6474_v6 = vld [vmem:[%s8726_s2 + $0x8] sm:$0xff]   ;;  %v6605_v7 = vmov 7   ;;  %v6475_v8 = vld [vmem:[%s8726_s2 + $0x10] sm:$0xff]   ;;  %v6606_v13 = vmov 1   ;;  %v6607_v16 = vmov 8  }
   0xf   : > { %s8981_s22 = smov (!%p404_p3, %s5562_s22), 1  ;;  %1431 = vperm.xlu1 %6383, %v6717_v0   ;;  %5973 = vmatprep.subr.bf16.mxu0 %v6473_v2  ;;  %v6476_v11 = vld [vmem:[%s8726_s2 + $0x18] sm:$0xff]   ;;  %v6608_v18 = vmov 2   ;;  %v6609_v19 = vmov 9   ;;  %v6610_v20 = vmov 3   ;;  %v6611_v21 = vmov 10  }
  0x10   : > { %s8738_s29 = sshll.u32 %s8981_s22, 6  ;;  %5974 = vmatpush3.bf16.msra.mxu0 %v6473_v2  ;;  %v6612_v22 = vmov 4   ;;  %v6783_v23 = vld [vmem:[%s8725_s1 + $0x8] sm:$0xf]  ;;  %v6613_v24 = vmov 11   ;;  %v6614_v27 = vmov 5  }
  0x11   : > { %s6737_s14 = scalar_lea.vmem %s8724_s0, %s8738_s29  ;;  %5975 = vmatprep.subr.bf16.mxu0 %v6474_v6  ;;  %v6791_v25 = vld [vmem:[%s8725_s1 + $0x10] sm:$0xf]  ;;  %v6798_v26 = vld [vmem:[%s8725_s1 + $0x18] sm:$0xf]  ;;  %v6807_v28 = vld [vmem:[%s8725_s1 + $0xc] sm:$0xf] }
  0x12   : > { %v415_v4 = vld [vmem:[%s6737_s14] sm:$0xff]  ;;  %v416_v5 = vld [vmem:[%s6737_s14 + $0x8] sm:$0xff]  ;;  %v417_v9 = vld [vmem:[%s6737_s14 + $0x10] sm:$0xff]  ;;  %v6615_v30 = vmov 12   ;;  %vm498_vm0 = vcmask 523264   ;;  %vm8777_vm1 = vcmask 130048  }
  0x13   : > { %1442 = vperm.xlu1 %6383, %v6729_v3   ;;  %423 = vxpose.xlu0.b32.start [1/8] (short) (narrow) %v415_v4, 64  ;;  %v418_v10 = vld [vmem:[%s6737_s14 + $0x18] sm:$0xff]  ;;  %v419_v12 = vld [vmem:[%s6737_s14 + $0x20] sm:$0xff]  ;;  %v420_v14 = vld [vmem:[%s6737_s14 + $0x28] sm:$0xff]  ;;  %vm4178_vm2 = vcmask 123904   ;;  %v6616_v55 = vmov 0.0  }
  0x14   : > { %5976 = vmatpush3.bf16.msra.mxu0 %v6474_v6  ;;  %v421_v15 = vld [vmem:[%s6737_s14 + $0x30] sm:$0xff]  ;;  %v422_v17 = vld [vmem:[%s6737_s14 + $0x38] sm:$0xff]  ;;  %4184 = vst.msk [vmem:[#allocation2 + $0x30] sm:$0xff] %vm8777_vm1, %v6616_v55  ;;  %4177 = vst.msk [vmem:[#allocation2] sm:$0xff] %vm8777_vm1, %v6616_v55  ;;  %v6617_v59 = vmov 13   ;;  %v6618_v63 = vmov 14  }
  0x15   : > { %5977 = vmatprep.subr.bf16.mxu0 %v6475_v8  ;;  %v6814_v29 = vld [vmem:[%s8725_s1 + $0x14] sm:$0xf]  ;;  %v6822_v31 = vld [vmem:[%s8725_s1 + $0x1c] sm:$0xf]  ;;  %4185 = vst.msk [vmem:[#allocation2 + $0x38] sm:$0x3] %vm4178_vm2, %v6616_v55 }
  0x16   : > { %4179 = vst.msk [vmem:[#allocation2 + $0x8] sm:$0x3] %vm4178_vm2, %v6616_v55  ;;  %4181 = vst.msk [vmem:[#allocation2 + $0x18] sm:$0x3] %vm4178_vm2, %v6616_v55  ;;  %v6477_v56 = vld [vmem:[%s8728_s4] sm:$0xff]   ;;  %v8737_v4 = vmov 15  }
  0x17   : > { %6384 = vset.pattern.permute.xlu1 %v6605_v7  ;;  %424 = vxpose.xlu0.b32.cont [2/8] (short) (narrow) %v416_v5, 64  ;;  %4180 = vst.msk [vmem:[#allocation2 + $0x10] sm:$0xff] %vm8777_vm1, %v6616_v55  ;;  %4182 = vst.msk [vmem:[#allocation2 + $0x20] sm:$0xff] %vm8777_vm1, %v6616_v55  ;;  %s8789_s25 = smov 120   ;;  %s8780_s26 = smov 12   ;;  %vm2832_vm3 = vcmask 97280  }
  0x18   : > { %1547 = vperm.xlu1 %6384, %v6717_v0   ;;  %5978 = vmatpush3.bf16.msra.mxu0 %v6475_v8  ;;  %4183 = vst.msk [vmem:[#allocation2 + $0x28] sm:$0x3] %vm4178_vm2, %v6616_v55  ;;  %4187 = vst.msk [vmem:[#allocation2 + $0x48] sm:$0x3] %vm4178_vm2, %v6616_v55  ;;  %s8778_s15 = smov 32   ;;  %s8785_s16 = smov 20  }
  0x19   : > { %5979 = vmatprep.subr.bf16.mxu0 %v6476_v11  ;;  %4186 = vst.msk [vmem:[#allocation2 + $0x40] sm:$0xff] %vm8777_vm1, %v6616_v55  ;;  %4188 = vst.msk [vmem:[#allocation2 + $0x50] sm:$0xff] %vm8777_vm1, %v6616_v55  ;;  %5989 = vmatprep.subr.bf16.mxu1 %v6477_v56  ;;  %s8783_s23 = smov 40   ;;  %s6627_s24 = smov 52   ;;  %vm2770_vm4 = vcmask 162816   ;;  %vm2841_vm5 = vcmask 261120  }
  0x1a   : > { %4189 = vst.msk [vmem:[#allocation2 + $0x58] sm:$0x3] %vm4178_vm2, %v6616_v55  ;;  %4191 = vst.msk [vmem:[#allocation2 + $0x68] sm:$0x3] %vm4178_vm2, %v6616_v55  ;;  %5990 = vmatpush3.bf16.msra.mxu1 %v6477_v56  ;;  %s8766_s17 = smov 60   ;;  %s6629_s18 = smov 72  }
  0x1b   : > { %425 = vxpose.xlu0.b32.cont [3/8] (short) (narrow) %v417_v9, 64  ;;  %4190 = vst.msk [vmem:[#allocation2 + $0x60] sm:$0xff] %vm8777_vm1, %v6616_v55  ;;  %4192 = vst.msk [vmem:[#allocation2 + $0x70] sm:$0xff] %vm8777_vm1, %v6616_v55  ;;  %s8739_s30 = smov 92   ;;  %s8764_s13 = smov 80   ;;  %vm2783_vm6 = vcmask 326656  }
  0x1c   : > { %1558 = vperm.xlu1 %6384, %v6729_v3   ;;  %5980 = vmatpush3.bf16.msra.mxu0 %v6476_v11  ;;  %4193 = vst.msk [vmem:[#allocation2 + $0x78] sm:$0x3] %vm4178_vm2, %v6616_v55  ;;  %4195 = vst.msk [vmem:[#allocation2 + $0x88] sm:$0x3] %vm4178_vm2, %v6616_v55  ;;  %s8791_s19 = smov 100   ;;  %s6633_s20 = smov 112  }
  0x1d   : > { %4194 = vst.msk [vmem:[#allocation2 + $0x80] sm:$0xff] %vm8777_vm1, %v6616_v55  ;;  %4196 = vst.msk [vmem:[#allocation2 + $0x90] sm:$0xff] %vm8777_vm1, %v6616_v55  ;;  %s8840_s29 = smov 92   ;;  %s6634_s28 = smov 4   ;;  %vm2850_vm7 = vcmask 424960   ;;  %vm2792_vm8 = vcmask 490496  }
  0x1e   : > { %4197 = vst.msk [vmem:[#allocation2 + $0x98] sm:$0x3] %vm4178_vm2, %v6616_v55  ;;  %s8773_s27 = smov 44   ;;  %vm2859_vm9 = vcmask 588800   ;;  %vm2801_vm10 = vcmask 654336   ;;  %vm2868_vm11 = vcmask 752640  }
  0x1f   : > { %426 = vxpose.xlu0.b32.cont [4/8] (short) (narrow) %v418_v10, 64  ;;  %vm2810_vm12 = vcmask 818176   ;;  %vm2877_vm13 = vcmask 916480   ;;  %vm2819_vm14 = vcmask 982016   ;;  %vm2890_vm15 = vcmask 31744  }
  0x20   : > { %6385 = vset.pattern.permute.xlu1 %v6606_v13  ;;  %vm2899_vm2 = vcmask 195584  }
  0x21   : > { %851 = vperm.xlu1 %6385, %v6717_v0  }
  0x23   : > { %427 = vxpose.xlu0.b32.cont [5/8] (short) (narrow) %v419_v12, 64 }
  0x25   : > { %862 = vperm.xlu1 %6385, %v6729_v3  }
  0x27   : > { %428 = vxpose.xlu0.b32.cont [6/8] (short) (narrow) %v420_v14, 64 }
  0x29   : > { %6386 = vset.pattern.permute.xlu1 %v6607_v16 }
  0x2a   : > { %1663 = vperm.xlu1 %6386, %v6717_v0  }
  0x2b   : > { %429 = vxpose.xlu0.b32.cont [7/8] (short) (narrow) %v421_v15, 64 }
  0x2e   : > { %1674 = vperm.xlu1 %6386, %v6729_v3  }
  0x2f   : > { %430 = vxpose.xlu0.b32.end [8/8] (short) (narrow) %v422_v17, 64 }
  0x32   : > { %6387 = vset.pattern.permute.xlu1 %v6608_v18 }
  0x33   : > { %978 = vperm.xlu1 %6387, %v6729_v3  }
  0x37   : > { %6388 = vset.pattern.permute.xlu1 %v6609_v19 }
  0x38   : > { %1779 = vperm.xlu1 %6388, %v6717_v0  }
  0x3c   : > { %1790 = vperm.xlu1 %6388, %v6729_v3  }
  0x40   : > { %6389 = vset.pattern.permute.xlu1 %v6610_v20 }
  0x41   : > { %1083 = vperm.xlu1 %6389, %v6717_v0  }
  0x45   : > { %1094 = vperm.xlu1 %6389, %v6729_v3  }
  0x49   : > { %6390 = vset.pattern.permute.xlu1 %v6611_v21 }
  0x4a   : > { %1895 = vperm.xlu1 %6390, %v6717_v0  }
  0x4e   : > { %1906 = vperm.xlu1 %6390, %v6729_v3  }
  0x52   : > { %6391 = vset.pattern.permute.xlu1 %v6612_v22 }
  0x53   : > { %1199 = vperm.xlu1 %6391, %v6717_v0  }
  0x57   : > { %1210 = vperm.xlu1 %6391, %v6729_v3  }
  0x58   : > { %6396 = vset.pattern.permute.xlu0 %v6605_v7 }
  0x59   : > { %1569 = vperm.xlu0 %6396, %v6783_v23  }
  0x5b   : > { %6392 = vset.pattern.permute.xlu1 %v6613_v24 }
  0x5c   : > { %2011 = vperm.xlu1 %6392, %v6717_v0  }
  0x5d   : > { %1591 = vperm.xlu0 %6396, %v6791_v25  }
  0x60   : > { %2022 = vperm.xlu1 %6392, %v6729_v3  }
  0x61   : > { %1613 = vperm.xlu0 %6396, %v6798_v26  }
  0x64   : > { %6393 = vset.pattern.permute.xlu1 %v6614_v27 }
  0x65   : > { %1326 = vperm.xlu1 %6393, %v6729_v3   ;;  %6421 = vset.pattern.permute.xlu0 %v6606_v13 }
  0x66   : > { %884 = vperm.xlu0 %6421, %v6807_v28  }
  0x69   : > { %6394 = vset.pattern.permute.xlu1 %v6615_v30 }
  0x6a   : > { %2127 = vperm.xlu1 %6394, %v6717_v0   ;;  %906 = vperm.xlu0 %6421, %v6814_v29  }
  0x6e   : > { %6395 = vset.pattern.permute.xlu1 %v6604_v1  ;;  %928 = vperm.xlu0 %6421, %v6822_v31  }
  0x6f   : > { %1453 = vperm.xlu1 %6395, %v6783_v23  }
  0x72   : > { %6424 = vset.pattern.permute.xlu0 %v6608_v18 }
  0x73   : > { %1464 = vperm.xlu1 %6395, %v6807_v28   ;;  %967 = vperm.xlu0 %6424, %v6717_v0  }
  0x77   : > { %6397 = vset.pattern.permute.xlu1 %v6605_v7  ;;  %989 = vperm.xlu0 %6424, %v6783_v23  }
  0x78   : > { %1580 = vperm.xlu1 %6397, %v6807_v28  }
  0x7b   : > { %1011 = vperm.xlu0 %6424, %v6791_v25  }
  0x7c   : > { %6398 = vset.pattern.permute.xlu1 %v6606_v13 }
  0x7d   : > { %873 = vperm.xlu1 %6398, %v6783_v23  }
  0x7f   : > { %1033 = vperm.xlu0 %6424, %v6798_v26  }
  0x81   : > { %6399 = vset.pattern.permute.xlu1 %v6607_v16 }
  0x82   : > { %1685 = vperm.xlu1 %6399, %v6783_v23  }
  0x83   : > { %6426 = vset.pattern.permute.xlu0 %v6609_v19 }
  0x84   : > { %1812 = vperm.xlu0 %6426, %v6807_v28  }
  0x86   : > { %1696 = vperm.xlu1 %6399, %v6807_v28  }
  0x88   : > { %1834 = vperm.xlu0 %6426, %v6814_v29  }
  0x8a   : > { %6400 = vset.pattern.permute.xlu1 %v6608_v18 }
  0x8b   : > { %1000 = vperm.xlu1 %6400, %v6807_v28  }
  0x8c   : > { %1856 = vperm.xlu0 %6426, %v6822_v31  }
  0x8e   : > { %v6881_v44 = vpop.permute.xlu1 %1431 }
  0x8f   : > { %6401 = vset.pattern.permute.xlu1 %v6609_v19 }
  0x90   : > { %1801 = vperm.xlu1 %6401, %v6783_v23   ;;  %6429 = vset.pattern.permute.xlu0 %v6611_v21 }
  0x91   : > { %1917 = vperm.xlu0 %6429, %v6783_v23  }
  0x92   : > { %v6886_v45 = vpop.permute.xlu1 %1442 }
  0x93   : > { %v439_v32 = vpop.trf.xlu0 }
  0x94   : > { %6402 = vset.pattern.permute.xlu1 %v6610_v20 }
  0x95   : > { %1105 = vperm.xlu1 %6402, %v6783_v23   ;;  %1939 = vperm.xlu0 %6429, %v6791_v25  }
  0x97   : > { %v440_v33 = vpop.trf.xlu0  ;;  %v6892_v46 = vpop.permute.xlu1 %1547 }
  0x98   : > { %v455_v34 = vpack.c.bf16 %v440_v33, %v439_v32 }
  0x99   : > { %1116 = vperm.xlu1 %6402, %v6807_v28   ;;  %1961 = vperm.xlu0 %6429, %v6798_v26  }
  0x9a   : > { %5981 = vmatprep.mubr.msk.bf16.mxu0 %vm498_vm0, %v455_v34 }
  0x9b   : > { %v441_v35 = vpop.trf.xlu0  ;;  %v6898_v47 = vpop.permute.xlu1 %1558 }
  0x9d   : > { %6403 = vset.pattern.permute.xlu1 %v6611_v21  ;;  %6431 = vset.pattern.permute.xlu0 %v6612_v22 }
  0x9e   : > { %1928 = vperm.xlu1 %6403, %v6807_v28   ;;  %1232 = vperm.xlu0 %6431, %v6807_v28  }
  0x9f   : > { %v442_v36 = vpop.trf.xlu0 }
  0xa0   : > { %v456_v37 = vpack.c.bf16 %v442_v36, %v441_v35  ;;  %v6902_v48 = vpop.permute.xlu1 %851 }
  0xa2   : > { %6404 = vset.pattern.permute.xlu1 %v6612_v22  ;;  %5982 = vmatmul.mubr.msk.bf16.vlgmr.msra.gmra.mrb[0].mxu0 %vm498_vm0, %v456_v37 }
  0xa3   : > { %1221 = vperm.xlu1 %6404, %v6783_v23   ;;  %v443_v38 = vpop.trf.xlu0  ;;  %1254 = vperm.xlu0 %6431, %v6814_v29  }
  0xa4   : > { %v6906_v49 = vpop.permute.xlu1 %862 }
  0xa7   : > { %6405 = vset.pattern.permute.xlu1 %v6613_v24  ;;  %v444_v39 = vpop.trf.xlu0  ;;  %1276 = vperm.xlu0 %6431, %v6822_v31  }
  0xa8   : > { %2033 = vperm.xlu1 %6405, %v6783_v23   ;;  %v457_v40 = vpack.c.bf16 %v444_v39, %v443_v38 }
  0xa9   : > { %v6910_v50 = vpop.permute.xlu1 %1663 }
  0xaa   : > { %5985 = vmatprep.mubr.msk.bf16.mxu0 %vm498_vm0, %v457_v40 }
  0xab   : > { %v445_v41 = vpop.trf.xlu0  ;;  %6434 = vset.pattern.permute.xlu0 %v6614_v27 }
  0xac   : > { %2044 = vperm.xlu1 %6405, %v6807_v28   ;;  %1315 = vperm.xlu0 %6434, %v6717_v0  }
  0xad   : > { %v6914_v51 = vpop.permute.xlu1 %1674 }
  0xaf   : > { %v446_v42 = vpop.trf.xlu0 }
  0xb0   : > { %6406 = vset.pattern.permute.xlu1 %v6614_v27  ;;  %v458_v43 = vpack.c.bf16 %v446_v42, %v445_v41  ;;  %1337 = vperm.xlu0 %6434, %v6783_v23  }
  0xb1   : > { %1348 = vperm.xlu1 %6406, %v6807_v28  }
  0xb2   : > { %5986 = vmatmul.mubr.msk.bf16.gmra.mrb[4].mxu0 %vm498_vm0, %v458_v43  ;;  %v6919_v52 = vpop.permute.xlu1 %978 }
  0xb4   : > { %1359 = vperm.xlu0 %6434, %v6791_v25  }
  0xb5   : > { %6407 = vset.pattern.permute.xlu1 %v6615_v30 }
  0xb6   : > { %2149 = vperm.xlu1 %6407, %v6783_v23  }
  0xb7   : > { %v6923_v53 = vpop.permute.xlu1 %1779 }
  0xb8   : > { %1381 = vperm.xlu0 %6434, %v6798_v26  }
  0xba   : > { %6408 = vset.pattern.permute.xlu1 %v6604_v1 }
  0xbb   : > { %1475 = vperm.xlu1 %6408, %v6791_v25   ;;  %v6927_v54 = vpop.permute.xlu1 %1790 }
  0xbc   : > { %6436 = vset.pattern.permute.xlu0 %v6615_v30 }
  0xbd   : > { %2138 = vperm.xlu0 %6436, %v6729_v3  }
  0xbf   : > { %1486 = vperm.xlu1 %6408, %v6814_v29  }
  0xc0   : > { %v6954_v57 = vpop.permute.xlu1 %1083 }
  0xc1   : > { %2160 = vperm.xlu0 %6436, %v6807_v28  }
  0xc3   : > { %6409 = vset.pattern.permute.xlu1 %v6605_v7 }
  0xc4   : > { %1602 = vperm.xlu1 %6409, %v6814_v29   ;;  %v6959_v58 = vpop.permute.xlu1 %1094 }
  0xc5   : > { %2182 = vperm.xlu0 %6436, %v6814_v29  }
  0xc8   : > { %6410 = vset.pattern.permute.xlu1 %v6606_v13 }
  0xc9   : > { %895 = vperm.xlu1 %6410, %v6791_v25   ;;  %2204 = vperm.xlu0 %6436, %v6822_v31   ;;  %v6964_v60 = vpop.permute.xlu1 %1895 }
  0xcd   : > { %6411 = vset.pattern.permute.xlu1 %v6607_v16  ;;  %6440 = vset.pattern.permute.xlu0 %v6617_v59  ;;  %v6969_v61 = vpop.permute.xlu1 %1906 }
  0xce   : > { %1707 = vperm.xlu1 %6411, %v6791_v25   ;;  %2265 = vperm.xlu0 %6440, %v6783_v23  }
  0xd2   : > { %1718 = vperm.xlu1 %6411, %v6814_v29   ;;  %2298 = vperm.xlu0 %6440, %v6814_v29   ;;  %v6975_v62 = vpop.permute.xlu1 %1199 }
  0xd6   : > { %6412 = vset.pattern.permute.xlu1 %v6608_v18  ;;  %2309 = vperm.xlu0 %6440, %v6798_v26  }
  0xd7   : > { %1022 = vperm.xlu1 %6412, %v6814_v29  }
  0xda   : > { %6445 = vset.pattern.permute.xlu0 %v6618_v63 }
  0xdb   : > { %6413 = vset.pattern.permute.xlu1 %v6609_v19  ;;  %2370 = vperm.xlu0 %6445, %v6729_v3  }
  0xdc   : > { %1823 = vperm.xlu1 %6413, %v6791_v25  }
  0xdf   : > { %2403 = vperm.xlu0 %6445, %v6791_v25  }
  0xe0   : > { %6414 = vset.pattern.permute.xlu1 %v6610_v20 }
  0xe1   : > { %1127 = vperm.xlu1 %6414, %v6791_v25  }
  0xe3   : > { %2436 = vperm.xlu0 %6445, %v6822_v31  }
  0xe5   : > { %1138 = vperm.xlu1 %6414, %v6814_v29  }
  0xe7   : > { %6448 = vset.pattern.permute.xlu0 %v8737_v4 }
  0xe8   : > { %2475 = vperm.xlu0 %6448, %v6717_v0  }
  0xe9   : > { %6415 = vset.pattern.permute.xlu1 %v6611_v21 }
  0xea   : > { %1950 = vperm.xlu1 %6415, %v6814_v29  }
  0xec   : > { %2508 = vperm.xlu0 %6448, %v6807_v28  }
  0xee   : > { %6416 = vset.pattern.permute.xlu1 %v6612_v22 }
  0xef   : > { %1243 = vperm.xlu1 %6416, %v6791_v25  }
  0xf0   : > { %2530 = vperm.xlu0 %6448, %v6814_v29  }
  0xf3   : > { %6417 = vset.pattern.permute.xlu1 %v6613_v24 }
  0xf4   : > { %2055 = vperm.xlu1 %6417, %v6791_v25  }
  0xf8   : > { %2066 = vperm.xlu1 %6417, %v6814_v29  }
  0xfc   : > { %6418 = vset.pattern.permute.xlu1 %v6614_v27 }
  0xfd   : > { %1370 = vperm.xlu1 %6418, %v6814_v29  }
 0x101   : > { %6419 = vset.pattern.permute.xlu1 %v6615_v30 }
 0x102   : > { %2171 = vperm.xlu1 %6419, %v6791_v25  }
 0x106   : > { %6420 = vset.pattern.permute.xlu1 %v6604_v1  ;;  %v6983_v1 = vpop.permute.xlu1 %1210 }
 0x107   : > { %1497 = vperm.xlu1 %6420, %v6798_v26  }
 0x10a   : > { %v6987_v2 = vpop.permute.xlu1 %2011 }
 0x10b   : > { %1508 = vperm.xlu1 %6420, %v6822_v31  }
 0x10e   : > { %v6993_v5 = vpop.permute.xlu1 %2022 }
 0x10f   : > { %6422 = vset.pattern.permute.xlu1 %v6605_v7  ;;  %v6620_v7 = vmov 0  }
 0x110   : > { %1624 = vperm.xlu1 %6422, %v6822_v31   ;;  %6450 = vset.pattern.permute.xlu0 %v6620_v7 }
 0x111   : > { %752 = vperm.xlu0 %6450, %v6783_v23  }
 0x112   : > { %v7000_v6 = vpop.permute.xlu1 %1326 }
 0x114   : > { %6423 = vset.pattern.permute.xlu1 %v6606_v13 }
 0x115   : > { %917 = vperm.xlu1 %6423, %v6798_v26   ;;  %788 = vperm.xlu0 %6450, %v6814_v29  }
 0x116   : > { %v7006_v8 = vpop.permute.xlu1 %2127 }
 0x119   : > { %6425 = vset.pattern.permute.xlu1 %v6607_v16  ;;  %812 = vperm.xlu0 %6450, %v6822_v31  }
 0x11a   : > { %1729 = vperm.xlu1 %6425, %v6798_v26   ;;  %v7012_v9 = vpop.permute.xlu1 %1453 }
 0x11e   : > { %1740 = vperm.xlu1 %6425, %v6822_v31   ;;  %v7016_v10 = vpop.permute.xlu1 %1464 }
 0x122   : > { %6427 = vset.pattern.permute.xlu1 %v6608_v18  ;;  %v7021_v11 = vpop.permute.xlu1 %1580 }
 0x123   : > { %1044 = vperm.xlu1 %6427, %v6822_v31  }
 0x126   : > { %v7025_v12 = vpop.permute.xlu1 %873 }
 0x127   : > { %6428 = vset.pattern.permute.xlu1 %v6609_v19  ;;  %v5571_v19 = vld [vmem:[%s8727_s3] ss:$0 sm:$0xff] }
 0x128   : > { %1845 = vperm.xlu1 %6428, %v6798_v26  }
 0x12a   : > { %v7029_v13 = vpop.permute.xlu1 %1685 }
 0x12c   : > { %6430 = vset.pattern.permute.xlu1 %v6610_v20 }
 0x12d   : > { %1149 = vperm.xlu1 %6430, %v6798_v26  }
 0x12e   : > { %v7033_v14 = vpop.permute.xlu1 %1696 }
 0x131   : > { %1160 = vperm.xlu1 %6430, %v6822_v31  }
 0x132   : > { %v7037_v15 = vpop.permute.xlu1 %1000 }
 0x135   : > { %6432 = vset.pattern.permute.xlu1 %v6611_v21 }
 0x136   : > { %1972 = vperm.xlu1 %6432, %v6822_v31   ;;  %v7041_v16 = vpop.permute.xlu1 %1801 }
 0x13a   : > { %6433 = vset.pattern.permute.xlu1 %v6612_v22  ;;  %v7045_v17 = vpop.permute.xlu1 %1105 }
 0x13b   : > { %1265 = vperm.xlu1 %6433, %v6798_v26  }
 0x13e   : > { %v7049_v18 = vpop.permute.xlu1 %1116 }
 0x13f   : > { %6435 = vset.pattern.permute.xlu1 %v6613_v24 }
 0x140   : > { %2077 = vperm.xlu1 %6435, %v6798_v26  }
 0x142   : > { %v7055_v20 = vpop.permute.xlu1 %1928 }
 0x144   : > { %2088 = vperm.xlu1 %6435, %v6822_v31  }
 0x146   : > { %v7061_v37 = vpop.permute.xlu1 %1221 }
 0x148   : > { %6437 = vset.pattern.permute.xlu1 %v6614_v27 }
 0x149   : > { %1392 = vperm.xlu1 %6437, %v6822_v31  }
 0x14a   : > { %v7069_v41 = vpop.permute.xlu1 %2033 }
 0x14d   : > { %6438 = vset.pattern.permute.xlu1 %v6615_v30 }
 0x14e   : > { %2193 = vperm.xlu1 %6438, %v6798_v26   ;;  %v7074_v42 = vpop.permute.xlu1 %2044 }
 0x152   : > { %6439 = vset.pattern.permute.xlu1 %v6617_v59 }
 0x153   : > { %2243 = vperm.xlu1 %6439, %v6717_v0  }
 0x157   : > { %2254 = vperm.xlu1 %6439, %v6729_v3  }
 0x15b   : > { %2276 = vperm.xlu1 %6439, %v6807_v28  }
 0x15f   : > { %6441 = vset.pattern.permute.xlu1 %v6618_v63 }
 0x160   : > { %2359 = vperm.xlu1 %6441, %v6717_v0  }
 0x164   : > { %2381 = vperm.xlu1 %6441, %v6783_v23  }
 0x168   : > { %2392 = vperm.xlu1 %6441, %v6807_v28  }
 0x16c   : > { %6442 = vset.pattern.permute.xlu1 %v8737_v4 }
 0x16d   : > { %2486 = vperm.xlu1 %6442, %v6729_v3  }
 0x171   : > { %2497 = vperm.xlu1 %6442, %v6783_v23  }
 0x175   : > { %6443 = vset.pattern.permute.xlu1 %v6617_v59  ;;  %v5983_v21 = vpop.f32.mrb[0].mxu0 }
 0x176   : > { %2287 = vperm.xlu1 %6443, %v6791_v25   ;;  %v554_v22 = vadd.f32 %v5983_v21, %v5571_v19  ;;  %v545_v24 = vpop.f32.mrb[1].mxu0 }
 0x177   : > { %v546_v27 = vadd.f32 %v5571_v19, %v545_v24  ;;  %v5984_v30 = vpop.f32.mrb[2].mxu0 }
 0x178   : > { %v578_v32 = vmax.f32 %v554_v22, 0.0  ;;  %v557_v33 = vadd.f32 %v5984_v30, %v5571_v19  ;;  %v548_v34 = vpop.f32.mrb[3].mxu0 }
 0x179   : > { %v576_v35 = vmax.f32 %v546_v27, 0.0  ;;  %v549_v23 = vadd.f32 %v5571_v19, %v548_v34 }
 0x17a   : > { %6444 = vset.pattern.permute.xlu1 %v6620_v7  ;;  %4201 = vst.msk [vmem:[#allocation2 + $0x31] sm:$0xff] %vm8777_vm1, %v578_v32  ;;  %v579_v36 = vmax.f32 %v557_v33, 0.0  ;;  %v7080_v33 = vpop.permute.xlu1 %1348 }
 0x17b   : > { %728 = vperm.xlu1 %6444, %v6717_v0   ;;  %4199 = vst.msk [vmem:[#allocation2 + $0x11] sm:$0xff] %vm8777_vm1, %v576_v35  ;;  %v577_v38 = vmax.f32 %v549_v23, 0.0 }
 0x17c   : > { %v585_v39 = vpack.c.bf16 %v579_v36, %v578_v32  ;;  %4202 = vst.msk [vmem:[#allocation2 + $0x41] sm:$0xff] %vm8777_vm1, %v579_v36 }
 0x17d   : > { %4200 = vst.msk [vmem:[#allocation2 + $0x21] sm:$0xff] %vm8777_vm1, %v577_v38  ;;  %v584_v40 = vpack.c.bf16 %v577_v38, %v576_v35 }
 0x17f   : > { %740 = vperm.xlu1 %6444, %v6729_v3   ;;  %5991 = vmatprep.mubr.msk.bf16.mxu1 %vm8777_vm1, %v584_v40 }
 0x180   : > { %5992 = vmatmul.mubr.msk.bf16.vlgmr.msra.gmra.mrb[0].mxu1 %vm8777_vm1, %v585_v39 }
 0x183   : > { %6446 = vset.pattern.permute.xlu1 %v6617_v59 }
 0x184   : > { %2320 = vperm.xlu1 %6446, %v6822_v31  }
 0x185   : > { %v5987_v0 = vpop.f32.mrb[4].mxu0 }
 0x186   : > { %v570_v43 = vadd.f32 %v5987_v0, %v5571_v19  ;;  %v561_v55 = vpop.f32.mrb[5].mxu0 }
 0x187   : > { %v562_v56 = vadd.f32 %v5571_v19, %v561_v55  ;;  %v5988_v21 = vpop.f32.mrb[6].mxu0 }
 0x188   : > { %6447 = vset.pattern.permute.xlu1 %v6618_v63  ;;  %v582_v3 = vmax.f32 %v570_v43, 0.0  ;;  %v573_v22 = vadd.f32 %v5988_v21, %v5571_v19  ;;  %v564_v24 = vpop.f32.mrb[7].mxu0 }
 0x189   : > { %2414 = vperm.xlu1 %6447, %v6814_v29   ;;  %v580_v27 = vmax.f32 %v562_v56, 0.0  ;;  %v565_v30 = vadd.f32 %v5571_v19, %v564_v24  ;;  %v7089_v29 = vpop.permute.xlu1 %2149 }
 0x18a   : > { %4205 = vst.msk [vmem:[#allocation2 + $0x71] sm:$0xff] %vm8777_vm1, %v582_v3  ;;  %v583_v59 = vmax.f32 %v573_v22, 0.0 }
 0x18b   : > { %4203 = vst.msk [vmem:[#allocation2 + $0x51] sm:$0xff] %vm8777_vm1, %v580_v27  ;;  %v581_v32 = vmax.f32 %v565_v30, 0.0 }
 0x18c   : > { %v587_v34 = vpack.c.bf16 %v583_v59, %v582_v3  ;;  %4206 = vst.msk [vmem:[#allocation2 + $0x81] sm:$0xff] %vm8777_vm1, %v583_v59 }
 0x18d   : > { %2425 = vperm.xlu1 %6447, %v6798_v26   ;;  %v586_v63 = vpack.c.bf16 %v581_v32, %v580_v27  ;;  %4204 = vst.msk [vmem:[#allocation2 + $0x61] sm:$0xff] %vm8777_vm1, %v581_v32  ;;  %v7092_v19 = vpop.permute.xlu1 %1475 }
 0x18e   : > { %8793 = vst [vmem:[#allocation3_spill] sm:$0xff] %v7092_v19 }
 0x18f   : > { %5995 = vmatprep.mubr.msk.bf16.mxu1 %vm8777_vm1, %v586_v63 }
 0x190   : > { %5996 = vmatmul.mubr.msk.bf16.gmra.mrb[4].mxu1 %vm8777_vm1, %v587_v34  ;;  %vm2908_vm1 = vcmask 359424  }
 0x191   : > { %6449 = vset.pattern.permute.xlu1 %v8737_v4  ;;  %v7096_v35 = vpop.permute.xlu1 %1486 }
 0x192   : > { %2519 = vperm.xlu1 %6449, %v6791_v25   ;;  %8794 = vst [vmem:[#allocation4_spill] sm:$0xff] %v7096_v35 }
 0x195   : > { %v7100_v23 = vpop.permute.xlu1 %1602 }
 0x196   : > { %2541 = vperm.xlu1 %6449, %v6798_v26   ;;  %8795 = vst [vmem:[#allocation5_spill] sm:$0xff] %v7100_v23 }
 0x199   : > { %v7103_v36 = vpop.permute.xlu1 %895 }
 0x19a   : > { %2552 = vperm.xlu1 %6449, %v6822_v31   ;;  %8796 = vst [vmem:[#allocation6_spill] sm:$0xff] %v7103_v36 }
 0x19d   : > { %v7105_v38 = vpop.permute.xlu1 %1707 }
 0x19e   : > { %6451 = vset.pattern.permute.xlu1 %v6620_v7  ;;  %8797 = vst [vmem:[#allocation7_spill] sm:$0xff] %v7105_v38 }
 0x19f   : > { %764 = vperm.xlu1 %6451, %v6807_v28  }
 0x1a1   : > { %v7107_v39 = vpop.permute.xlu1 %1718 }
 0x1a2   : > { %8798 = vst [vmem:[#allocation8_spill] sm:$0xff] %v7107_v39 }
 0x1a3   : > { %776 = vperm.xlu1 %6451, %v6791_v25   ;;  %v1570_v25 = vpop.permute.xlu0 %1569 }
 0x1a5   : > { %v7109_v40 = vpop.permute.xlu1 %1022 }
 0x1a6   : > { %8799 = vst [vmem:[#allocation9_spill] sm:$0xff] %v7109_v40 }
 0x1a7   : > { %800 = vperm.xlu1 %6451, %v6798_v26   ;;  %v7121_v26 = vpop.permute.xlu0 %1591 }
 0x1a8   : > { %8805 = vst [vmem:[#allocation15_spill] sm:$0xff] %v7121_v26 }
 0x1a9   : > { %v7111_v31 = vpop.permute.xlu1 %1823 }
 0x1aa   : > { %8800 = vst [vmem:[#allocation10_spill] sm:$0xff] %v7111_v31 }
 0x1ab   : > { %v7125_v56 = vpop.permute.xlu0 %1613 }
 0x1ad   : > { %v7113_v7 = vpop.permute.xlu1 %1127 }
 0x1ae   : > { %8801 = vst [vmem:[#allocation11_spill] sm:$0xff] %v7113_v7 }
 0x1af   : > { %v7129_v3 = vpop.permute.xlu0 %884 }
 0x1b1   : > { %v7115_v0 = vpop.permute.xlu1 %1138 }
 0x1b2   : > { %8802 = vst [vmem:[#allocation12_spill] sm:$0xff] %v7115_v0 }
 0x1b3   : > { %v7133_v24 = vpop.permute.xlu0 %906 }
 0x1b4   : > { %8809 = vst [vmem:[#allocation19_spill] sm:$0xff] %v7133_v24 }
 0x1b5   : > { %v7117_v28 = vpop.permute.xlu1 %1950 }
 0x1b6   : > { %8803 = vst [vmem:[#allocation13_spill] sm:$0xff] %v7117_v28 }
 0x1b7   : > { %v7137_v30 = vpop.permute.xlu0 %928 }
 0x1b8   : > { %8811 = vst [vmem:[#allocation21_spill] sm:$0xff] %v7137_v30 }
 0x1b9   : > { %v7119_v43 = vpop.permute.xlu1 %1243 }
 0x1ba   : > { %8804 = vst [vmem:[#allocation14_spill] sm:$0xff] %v7119_v43 }
 0x1bb   : > { %v7141_v32 = vpop.permute.xlu0 %967 }
 0x1bd   : > { %v7123_v55 = vpop.permute.xlu1 %2055 }
 0x1be   : > { %8806 = vst [vmem:[#allocation16_spill] sm:$0xff] %v7123_v55 }
 0x1bf   : > { %v7145_v63 = vpop.permute.xlu0 %989 }
 0x1c1   : > { %v7127_v21 = vpop.permute.xlu1 %2066 }
 0x1c2   : > { %8807 = vst [vmem:[#allocation17_spill] sm:$0xff] %v7127_v21 }
 0x1c3   : > { %v7149_v43 = vpop.permute.xlu0 %1011 }
 0x1c4   : > { %8812 = vst [vmem:[#allocation22_spill] sm:$0xff] %v7149_v43 }
 0x1c5   : > { %v7131_v22 = vpop.permute.xlu1 %1370 }
 0x1c6   : > { %8808 = vst [vmem:[#allocation18_spill] sm:$0xff] %v7131_v22 }
 0x1c7   : > { %v7153_v22 = vpop.permute.xlu0 %1033 }
 0x1c8   : > { %8814 = vst [vmem:[#allocation24_spill] sm:$0xff] %v7153_v22 }
 0x1c9   : > { %v7135_v27 = vpop.permute.xlu1 %2171 }
 0x1ca   : > { %8810 = vst [vmem:[#allocation20_spill] sm:$0xff] %v7135_v27 }
 0x1cb   : > { %v7157_v27 = vpop.permute.xlu0 %1812 }
 0x1cd   : > { %v7139_v59 = vpop.permute.xlu1 %1497 }
 0x1cf   : > { %v7161_v7 = vpop.permute.xlu0 %1834 }
 0x1d0   : > { %8817 = vst [vmem:[#allocation27_spill] sm:$0xff] %v7161_v7 }
 0x1d1   : > { %v7143_v34 = vpop.permute.xlu1 %1508 }
 0x1d3   : > { %v7165_v40 = vpop.permute.xlu0 %1856 }
 0x1d4   : > { %8819 = vst [vmem:[#allocation29_spill] sm:$0xff] %v7165_v40  ;;  %v734_v40 = vlaneseq }
 0x1d5   : > { %v7147_v4 = vpop.permute.xlu1 %1624 }
 0x1d6   : > { %v735_v22 = vshrl.u32 %v734_v40, 7 }
 0x1d7   : > { %v7169_v36 = vpop.permute.xlu0 %1917 }
 0x1d9   : > { %v7151_v21 = vpop.permute.xlu1 %917 }
 0x1da   : > { %8813 = vst [vmem:[#allocation23_spill] sm:$0xff] %v7151_v21 }
 0x1db   : > { %v7173_v24 = vpop.permute.xlu0 %1939 }
 0x1dc   : > { %8822 = vst [vmem:[#allocation32_spill] sm:$0xff] %v7173_v24 }
 0x1dd   : > { %v7155_v55 = vpop.permute.xlu1 %1729 }
 0x1de   : > { %8815 = vst [vmem:[#allocation25_spill] sm:$0xff] %v7155_v55 }
 0x1df   : > { %v7177_v38 = vpop.permute.xlu0 %1961 }
 0x1e0   : > { %8824 = vst [vmem:[#allocation34_spill] sm:$0xff] %v7177_v38 }
 0x1e1   : > { %v7159_v0 = vpop.permute.xlu1 %1740 }
 0x1e2   : > { %8816 = vst [vmem:[#allocation26_spill] sm:$0xff] %v7159_v0 }
 0x1e3   : > { %v7181_v19 = vpop.permute.xlu0 %1232 }
 0x1e5   : > { %v7163_v28 = vpop.permute.xlu1 %1044 }
 0x1e6   : > { %8818 = vst [vmem:[#allocation28_spill] sm:$0xff] %v7163_v28 }
 0x1e7   : > { %v7185_v23 = vpop.permute.xlu0 %1254 }
 0x1e8   : > { %8827 = vst [vmem:[#allocation37_spill] sm:$0xff] %v7185_v23 }
 0x1e9   : > { %v7167_v31 = vpop.permute.xlu1 %1845 }
 0x1ea   : > { %8820 = vst [vmem:[#allocation30_spill] sm:$0xff] %v7167_v31 }
 0x1eb   : > { %v7189_v31 = vpop.permute.xlu0 %1276 }
 0x1ec   : > { %8829 = vst [vmem:[#allocation39_spill] sm:$0xff] %v7189_v31 }
 0x1ed   : > { %v7171_v43 = vpop.permute.xlu1 %1149 }
 0x1ee   : > { %8821 = vst [vmem:[#allocation31_spill] sm:$0xff] %v7171_v43  ;;  %v6621_v43 = vmov 839922192  }
 0x1ef   : > { %v732_v24 = vunpack.c.l.s4 %v6621_v43 }
 0x1f1   : > { %v7175_v39 = vpop.permute.xlu1 %1160  ;;  %v733_v38 = vunpack.c.0.s8 %v732_v24 }
 0x1f2   : > { %8823 = vst [vmem:[#allocation33_spill] sm:$0xff] %v7175_v39  ;;  %v7193_v39 = vpop.permute.xlu0 %1315 }
 0x1f5   : > { %v7179_v35 = vpop.permute.xlu1 %1972 }
 0x1f6   : > { %8825 = vst [vmem:[#allocation35_spill] sm:$0xff] %v7179_v35  ;;  %v7197_v0 = vpop.permute.xlu0 %1337 }
 0x1f9   : > { %v7183_v7 = vpop.permute.xlu1 %1265 }
 0x1fa   : > { %8826 = vst [vmem:[#allocation36_spill] sm:$0xff] %v7183_v7  ;;  %v7199_v7 = vsub.s32 %v733_v38, %v735_v22  ;;  %v7210_v40 = vpop.permute.xlu0 %1359 }
 0x1fb   : > { %8833 = vst [vmem:[#allocation43_spill] sm:$0xff] %v7210_v40 }
 0x1fc   : > { %v1578_v23 = vrot.slane %v1570_v25, %v7199_v7  ;;  %v1589_v43 = vrot.slane %v7021_v11, %v7199_v7  ;;  %v893_v38 = vrot.slane %v7129_v3, %v7199_v7  ;;  %v1705_v11 = vrot.slane %v7033_v14, %v7199_v7 }
 0x1fd   : > { %v7187_v26 = vpop.permute.xlu1 %2077  ;;  %v1009_v14 = vrot.slane %v7037_v15, %v7199_v7  ;;  %v6479_v15 = vld [vmem:[%s8729_s5] sm:$0xff]  }
 0x1fe   : > { %8828 = vst [vmem:[#allocation38_spill] sm:$0xff] %v7187_v26  ;;  %v1462_v26 = vrot.slane %v7012_v9, %v7199_v7  ;;  %v5614_v25 = vcombine.low %v1578_v23, %v1589_v43  ;;  %v882_v9 = vrot.slane %v7025_v12, %v7199_v7  ;;  %v998_v12 = vrot.slane %v7145_v63, %v7199_v7 }
 0x1ff   : > { %v1926_v43 = vrot.slane %v7169_v36, %v7199_v7 }
 0x201   : > { %v7191_v28 = vpop.permute.xlu1 %2088 }
 0x202   : > { %8830 = vst [vmem:[#allocation40_spill] sm:$0xff] %v7191_v28  ;;  %v1473_v28 = vrot.slane %v7016_v10, %v7199_v7  ;;  %v1694_v10 = vrot.slane %v7029_v13, %v7199_v7  ;;  %v1821_v13 = vrot.slane %v7157_v27, %v7199_v7  ;;  %v6478_v27 = vld [vmem:[%s8729_s5 + $0x40] sm:$0xff]  }
 0x203   : > { %5785 = vmatprep.subr.bf16.mxu0 %v6478_v27 }
 0x204   : > { %v5610_v22 = vcombine.low %v1462_v26, %v1473_v28  ;;  %v7240_v26 = vpop.permute.xlu0 %1381  ;;  %v5618_v3 = vcombine.low %v1694_v10, %v1705_v11  ;;  %5786 = vmatpush3.bf16.msra.mxu0 %v6479_v15  ;;  %v1241_v11 = vrot.slane %v7181_v19, %v7199_v7 }
 0x205   : > { %v7195_v35 = vpop.permute.xlu1 %1392 }
 0x206   : > { %8831 = vst [vmem:[#allocation41_spill] sm:$0xff] %v7195_v35 }
 0x208   : > { %v7278_v36 = vpop.permute.xlu0 %2138 }
 0x209   : > { %v7208_v31 = vpop.permute.xlu1 %2193 }
 0x20a   : > { %8832 = vst [vmem:[#allocation42_spill] sm:$0xff] %v7208_v31 }
 0x20d   : > { %v7224_v30 = vpop.permute.xlu1 %2243 }
 0x253   : > { %v5993_v24 = vpop.f32.mrb[0].mxu1 }
 0x254   : > { %v643_v35 = vpop.f32.mrb[1].mxu1 }
 0x255   : > { %v5994_v55 = vpop.f32.mrb[2].mxu1 }
 0x256   : > { %v7220_v31 = vpack.c.bf16 %v5994_v55, %v5993_v24  ;;  %v646_v40 = vpop.f32.mrb[3].mxu1  ;;  %v5590_v55 = vcombine.low %v882_v9, %v893_v38  ;;  %v1114_v38 = vrot.slane %v7045_v17, %v7199_v7  ;;  %v7266_v9 = vpop.permute.xlu1 %2254  ;;  %v6480_v17 = vld [vmem:[%s8729_s5 + $0x48] sm:$0xff]  }
 0x257   : > { %v7222_v21 = vpack.c.bf16 %v646_v40, %v643_v35  ;;  %v1810_v35 = vrot.slane %v7041_v16, %v7199_v7  ;;  %v5594_v40 = vcombine.low %v998_v12, %v1009_v14  ;;  %5787 = vmatprep.subr.bf16.mxu0 %v6480_v17  ;;  %v1230_v12 = vrot.slane %v7061_v37, %v7199_v7  ;;  %v6482_v37 = vld [vmem:[%s8729_s5 + $0x50] sm:$0xff]  }
 0x258   : > { %v7227_v28 = vmul.bf16 %v5610_v22, %v7220_v31  ;;  %v7230_v23 = vmul.bf16 %v5614_v25, %v7220_v31  ;;  %v7253_v16 = vmul.bf16 %v5618_v3, %v7220_v31  ;;  %v7256_v63 = vmul.bf16 %v5590_v55, %v7220_v31 }
 0x259   : > { %v5622_v24 = vcombine.low %v1810_v35, %v1821_v13  ;;  %v1125_v22 = vrot.slane %v7049_v18, %v7199_v7  ;;  %v1937_v25 = vrot.slane %v7055_v20, %v7199_v7  ;;  %v6481_v18 = vld [vmem:[%s8729_s5 + $0x8] sm:$0xff]   ;;  %v7281_v20 = vmul.bf16 %v5594_v40, %v7220_v31 }
 0x25a   : > { %2656 = vrot.lane.b32.xlu1 %v7227_v28, %s8789_s25  ;;  %2668 = vrot.lane.b32.xlu0 %v7230_v23, %s8780_s26  ;;  %8834 = vst [vmem:[#allocation44_spill] sm:$0xff] %v7256_v63  ;;  %v2042_v13 = vrot.slane %v7069_v41, %v7199_v7  ;;  %v2053_v14 = vrot.slane %v7074_v42, %v7199_v7  ;;  %v6483_v41 = vld [vmem:[%s8729_s5 + $0x10] sm:$0xff]   ;;  %v2161_v42 = vpop.permute.xlu0 %2160  ;;  %v7304_v3 = vpop.permute.xlu1 %2276 }
 0x25b   : > { %v7284_v10 = vmul.bf16 %v5622_v24, %v7220_v31  ;;  %5788 = vmatpush3.bf16.msra.mxu0 %v6481_v18  ;;  %v5598_v35 = vcombine.low %v1114_v38, %v1125_v22  ;;  %v5626_v55 = vcombine.low %v1926_v43, %v1937_v25  ;;  %v5602_v40 = vcombine.low %v1230_v12, %v1241_v11 }
 0x25c   : > { %5789 = vmatprep.subr.bf16.mxu0 %v6482_v37  ;;  %v1346_v24 = vrot.slane %v7197_v0, %v7199_v7  ;;  %v5630_v38 = vcombine.low %v2042_v13, %v2053_v14  ;;  %v1357_v22 = vrot.slane %v7080_v33, %v7199_v7  ;;  %v2158_v17 = vrot.slane %v7089_v29, %v7199_v7  ;;  %v6484_v33 = vld [vmem:[%s8729_s5 + $0x58] sm:$0xff]  }
 0x25d   : > { %v7307_v15 = vmul.bf16 %v5598_v35, %v7220_v31  ;;  %v7310_v43 = vmul.bf16 %v5626_v55, %v7220_v31  ;;  %v2169_v18 = vrot.slane %v2161_v42, %v7199_v7  ;;  %v6485_v29 = vld [vmem:[%s8729_s5 + $0x18] sm:$0xff]   ;;  %v7337_v12 = vmul.bf16 %v5602_v40, %v7220_v31 }
 0x25e   : > { %2680 = vrot.lane.b32.xlu0 %v7253_v16, %s8778_s15  ;;  %2596 = vrot.lane.b32.xlu1 %v7256_v63, %s8785_s16  ;;  %v7334_v11 = vmul.bf16 %v5630_v38, %v7220_v31  ;;  %v1440_v13 = vrot.slane %v6881_v44, %v7199_v7  ;;  %v1451_v14 = vrot.slane %v6886_v45, %v7199_v7  ;;  %v6486_v44 = vld [vmem:[%s8729_s5 + $0x60] sm:$0xff]  }
 0x25f   : > { %8835 = vst [vmem:[#allocation45_spill] sm:$0xff] %v7310_v43  ;;  %5790 = vmatpush3.bf16.msra.mxu0 %v6483_v41  ;;  %8837 = vst [vmem:[#allocation47_spill] sm:$0xff] %v7337_v12  ;;  %v1556_v37 = vrot.slane %v6892_v46, %v7199_v7  ;;  %v1567_v41 = vrot.slane %v6898_v47, %v7199_v7  ;;  %v5606_v42 = vcombine.low %v1346_v24, %v1357_v22  ;;  %v6487_v45 = vld [vmem:[%s8729_s5 + $0x20] sm:$0xff]  }
 0x260   : > { %8836 = vst [vmem:[#allocation46_spill] sm:$0xff] %v7334_v11  ;;  %5791 = vmatprep.subr.bf16.mxu0 %v6484_v33  ;;  %v5609_v40 = vcombine.low %v1440_v13, %v1451_v14  ;;  %v860_v24 = vrot.slane %v6902_v48, %v7199_v7  ;;  %v871_v38 = vrot.slane %v6906_v49, %v7199_v7  ;;  %v6488_v48 = vld [vmem:[%s8729_s5 + $0x68] sm:$0xff]  }
 0x261   : > { %v7360_v46 = vmul.bf16 %v5606_v42, %v7220_v31  ;;  %v5613_v22 = vcombine.low %v1556_v37, %v1567_v41  ;;  %v6489_v49 = vld [vmem:[%s8729_s5 + $0x28] sm:$0xff]   ;;  %v1788_v33 = vrot.slane %v6923_v53, %v7199_v7  ;;  %v987_v14 = vrot.slane %v6919_v52, %v7199_v7  ;;  %v6490_v53 = vld [vmem:[%s8729_s5 + $0x70] sm:$0xff]  }
 0x262   : > { %2608 = vrot.lane.b32.xlu1 %v7281_v20, %s8783_s23  ;;  %2692 = vrot.lane.b32.xlu0 %v7284_v10, %s6627_s24  ;;  %v976_v37 = vrot.slane %v7141_v32, %v7199_v7  ;;  %v1092_v42 = vrot.slane %v6954_v57, %v7199_v7  ;;  %v6492_v57 = vld [vmem:[%s8729_s5 + $0x78] sm:$0xff]  }
 0x263   : > { %v5997_v19 = vpop.f32.mrb[4].mxu1  ;;  %5792 = vmatpush3.bf16.msra.mxu0 %v6485_v29  ;;  %8838 = vst [vmem:[#allocation48_spill] sm:$0xff] %v7360_v46  ;;  %v1799_v29 = vrot.slane %v6927_v54, %v7199_v7  ;;  %v6491_v54 = vld [vmem:[%s8729_s5 + $0x30] sm:$0xff]  }
 0x264   : > { %v659_v27 = vpop.f32.mrb[5].mxu1  ;;  %5793 = vmatprep.subr.bf16.mxu0 %v6486_v44  ;;  %v1904_v44 = vrot.slane %v6964_v60, %v7199_v7 }
 0x265   : > { %v5998_v25 = vpop.f32.mrb[6].mxu1  ;;  %v5621_v32 = vcombine.low %v1788_v33, %v1799_v29  ;;  %v2136_v29 = vrot.slane %v7006_v8, %v7199_v7  ;;  %v1622_v8 = vrot.slane %v7125_v56, %v7199_v7 }
 0x266   : > { %v7319_v35 = vpack.c.bf16 %v5998_v25, %v5997_v19  ;;  %v662_v55 = vpop.f32.mrb[7].mxu1  ;;  %2620 = vrot.lane.b32.xlu1 %v7307_v15, %s8766_s17  ;;  %2704 = vrot.lane.b32.xlu0 %v7310_v43, %s6629_s18  ;;  %v5634_v19 = vcombine.low %v2158_v17, %v2169_v18  ;;  %v1672_v25 = vrot.slane %v6910_v50, %v7199_v7  ;;  %v8886_v43 = vld [vmem:[#allocation17_spill] sm:$0xff] }
 0x267   : > { %v7331_v0 = vpack.c.bf16 %v662_v55, %v659_v27  ;;  %v7347_v27 = vpop.permute.xlu1 %2359  ;;  %5794 = vmatpush3.bf16.msra.mxu0 %v6487_v45  ;;  %v1683_v17 = vrot.slane %v6914_v51, %v7199_v7  ;;  %v7386_v51 = vmul.bf16 %v5609_v40, %v7222_v21  ;;  %v7389_v18 = vmul.bf16 %v5613_v22, %v7222_v21 }
 0x268   : > { %v7363_v47 = vmul.bf16 %v5634_v19, %v7220_v31  ;;  %5795 = vmatprep.subr.bf16.mxu0 %v6488_v48  ;;  %v5589_v55 = vcombine.low %v860_v24, %v871_v38  ;;  %v1103_v19 = vrot.slane %v6959_v58, %v7199_v7  ;;  %v1915_v45 = vrot.slane %v6969_v61, %v7199_v7  ;;  %v6493_v58 = vld [vmem:[%s8729_s5 + $0x38] sm:$0xff]  }
 0x269   : > { %v5617_v13 = vcombine.low %v1672_v25, %v1683_v17  ;;  %v5593_v40 = vcombine.low %v976_v37, %v987_v14  ;;  %v7439_v61 = vmul.bf16 %v5621_v32, %v7222_v21  ;;  %v1208_v38 = vrot.slane %v6975_v62, %v7199_v7  ;;  %v7469_v37 = vpop.permute.xlu0 %2182 }
 0x26a   : > { %2716 = vrot.lane.b32.xlu0 %v7334_v11, %s8739_s30  ;;  %2632 = vrot.lane.b32.xlu1 %v7337_v12, %s8764_s13  ;;  %v7410_v41 = vmul.bf16 %v5589_v55, %v7222_v21  ;;  %v1219_v22 = vrot.slane %v6983_v1, %v7199_v7  ;;  %v2020_v25 = vrot.slane %v6987_v2, %v7199_v7  ;;  %s8775_s30 = smov 24  }
 0x26b   : > { %v7383_v50 = vpop.permute.xlu1 %2381  ;;  %5796 = vmatpush3.bf16.msra.mxu0 %v6489_v49  ;;  %v7413_v52 = vmul.bf16 %v5617_v13, %v7222_v21  ;;  %v7436_v60 = vmul.bf16 %v5593_v40, %v7222_v21  ;;  %v2031_v17 = vrot.slane %v6993_v5, %v7199_v7  ;;  %v5597_v48 = vcombine.low %v1092_v42, %v1103_v19 }
 0x26c   : > { %8839 = vst [vmem:[#allocation49_spill] sm:$0xff] %v7410_v41  ;;  %5797 = vmatprep.subr.bf16.mxu0 %v6490_v53  ;;  %v5625_v49 = vcombine.low %v1904_v44, %v1915_v45  ;;  %v5601_v2 = vcombine.low %v1208_v38, %v1219_v22  ;;  %v1335_v5 = vrot.slane %v7000_v6, %v7199_v7  ;;  %v8843_v38 = vld [vmem:[#allocation25_spill] sm:$0xff] }
 0x26d   : > { %v7456_v62 = vmul.bf16 %v5597_v48, %v7222_v21  ;;  %v5629_v33 = vcombine.low %v2020_v25, %v2031_v17  ;;  %v1324_v13 = vrot.slane %v7193_v39, %v7199_v7  ;;  %v2147_v14 = vrot.slane %v7278_v36, %v7199_v7  ;;  %v7491_v44 = vpop.permute.xlu0 %2204  ;;  %v8844_v25 = vld [vmem:[#allocation26_spill] sm:$0xff] }
 0x26e   : > { %2644 = vrot.lane.b32.xlu1 %v7360_v46, %s8791_s19  ;;  %2728 = vrot.lane.b32.xlu0 %v7363_v47, %s6633_s20  ;;  %v7459_v1 = vmul.bf16 %v5625_v49, %v7222_v21  ;;  %v7476_v53 = vmul.bf16 %v5601_v2, %v7222_v21  ;;  %v1506_v39 = vrot.slane %v7139_v59, %v7199_v7  ;;  %v8880_v46 = vld [vmem:[#allocation13_spill] sm:$0xff] }
 0x26f   : > { %5798 = vmatpush3.bf16.msra.mxu0 %v6491_v54  ;;  %v7423_v24 = vpop.permute.xlu1 %2392  ;;  %v7479_v6 = vmul.bf16 %v5629_v33, %v7222_v21  ;;  %v1517_v36 = vrot.slane %v7143_v34, %v7199_v7  ;;  %v1633_v54 = vrot.slane %v7147_v4, %v7199_v7  ;;  %v5605_v32 = vcombine.low %v1324_v13, %v1335_v5  ;;  %v8841_v4 = vld [vmem:[#allocation21_spill] sm:$0xff]  ;;  %v8847_v5 = vld [vmem:[#allocation24_spill] sm:$0xff] }
 0x270   : > { %5799 = vmatprep.subr.bf16.mxu0 %v6492_v57  ;;  %v5633_v42 = vcombine.low %v2136_v29, %v2147_v14  ;;  %v937_v34 = vrot.slane %v8841_v4, %v7199_v7  ;;  %v8842_v57 = vld [vmem:[#allocation23_spill] sm:$0xff]  ;;  %v1738_v22 = vrot.slane %v8843_v38, %v7199_v7  ;;  %v1749_v17 = vrot.slane %v8844_v25, %v7199_v7  ;;  %v8848_v13 = vld [vmem:[#allocation29_spill] sm:$0xff] }
 0x271   : > { %v7498_v56 = vmul.bf16 %v5605_v32, %v7222_v21  ;;  %v5612_v45 = vcombine.low %v1506_v39, %v1517_v36  ;;  %v5616_v40 = vcombine.low %v1622_v8, %v1633_v54  ;;  %v7517_v49 = vpop.permute.xlu0 %2265  ;;  %v1042_v29 = vrot.slane %v8847_v5, %v7199_v7  ;;  %v8849_v8 = vld [vmem:[#allocation28_spill] sm:$0xff]  ;;  %v8850_v36 = vld [vmem:[#allocation30_spill] sm:$0xff]  ;;  %v8856_v5 = vld [vmem:[#allocation35_spill] sm:$0xff] }
 0x272   : > { %2654 = vrot.lane.b32.xlu1 %v7386_v51, %s8789_s25  ;;  %2666 = vrot.lane.b32.xlu0 %v7389_v18, %s8780_s26  ;;  %v7501_v59 = vmul.bf16 %v5633_v42, %v7222_v21  ;;  %v1865_v14 = vrot.slane %v8848_v13, %v7199_v7  ;;  %v1053_v39 = vrot.slane %v8849_v8, %v7199_v7 }
 0x273   : > { %5800 = vmatpush3.bf16.msra.mxu0 %v6493_v58  ;;  %v7453_v55 = vpop.permute.xlu1 %2486  ;;  %v926_v58 = vrot.slane %v8842_v57, %v7199_v7  ;;  %v7520_v2 = vmul.bf16 %v5612_v45, %v7319_v35  ;;  %v7523_v33 = vmul.bf16 %v5616_v40, %v7319_v35  ;;  %v1854_v54 = vrot.slane %v8850_v36, %v7199_v7  ;;  %v8853_v40 = vld [vmem:[#allocation34_spill] sm:$0xff] }
 0x274   : > { %v5620_v42 = vcombine.low %v1738_v22, %v1749_v17  ;;  %v1970_v57 = vrot.slane %v8853_v40, %v7199_v7  ;;  %v5596_v38 = vcombine.low %v1042_v29, %v1053_v39  ;;  %v8855_v22 = vld [vmem:[#allocation33_spill] sm:$0xff]  ;;  %v1981_v13 = vrot.slane %v8856_v5, %v7199_v7  ;;  %v8859_v39 = vld [vmem:[#allocation15_spill] sm:$0xff] }
 0x275   : > { %8845 = vst [vmem:[#allocation21_spill] sm:$0xff] %v7520_v2  ;;  %8846 = vst [vmem:[#allocation23_spill] sm:$0xff] %v7523_v33  ;;  %v5592_v32 = vcombine.low %v926_v58, %v937_v34  ;;  %v5624_v25 = vcombine.low %v1854_v54, %v1865_v14  ;;  %v8854_v34 = vld [vmem:[#allocation31_spill] sm:$0xff]  ;;  %v1169_v17 = vrot.slane %v8855_v22, %v7199_v7  ;;  %v7553_v36 = vpop.permute.xlu0 %2298  ;;  %v8861_v40 = vld [vmem:[#allocation5_spill] sm:$0xff] }
 0x276   : > { %2594 = vrot.lane.b32.xlu1 %v7410_v41, %s8785_s16  ;;  %2678 = vrot.lane.b32.xlu0 %v7413_v52, %s8778_s15  ;;  %v7541_v45 = vmul.bf16 %v5620_v42, %v7319_v35  ;;  %v1158_v58 = vrot.slane %v8854_v34, %v7199_v7  ;;  %v7560_v29 = vmul.bf16 %v5596_v38, %v7319_v35 }
 0x277   : > { %v7489_v19 = vpop.permute.xlu1 %2497  ;;  %v7538_v4 = vmul.bf16 %v5592_v32, %v7319_v35  ;;  %v7563_v14 = vmul.bf16 %v5624_v25, %v7319_v35  ;;  %v1600_v54 = vrot.slane %v8859_v39, %v7199_v7  ;;  %v8860_v32 = vld [vmem:[#allocation39_spill] sm:$0xff]  ;;  %v1611_v34 = vrot.slane %v8861_v40, %v7199_v7 }
 0x278   : > { %8852 = vst [vmem:[#allocation26_spill] sm:$0xff] %v7541_v45  ;;  %8857 = vst [vmem:[#allocation24_spill] sm:$0xff] %v7560_v29  ;;  %v1285_v42 = vrot.slane %v8860_v32, %v7199_v7  ;;  %v5600_v22 = vcombine.low %v1158_v58, %v1169_v17  ;;  %v5628_v5 = vcombine.low %v1970_v57, %v1981_v13  ;;  %v8865_v57 = vld [vmem:[#allocation3_spill] sm:$0xff] }
 0x279   : > { %8851 = vst [vmem:[#allocation25_spill] sm:$0xff] %v7538_v4  ;;  %8858 = vst [vmem:[#allocation29_spill] sm:$0xff] %v7563_v14  ;;  %v7579_v25 = vpop.permute.xlu0 %2309  ;;  %v1484_v58 = vrot.slane %v8865_v57, %v7199_v7  ;;  %v5615_v13 = vcombine.low %v1600_v54, %v1611_v34  ;;  %v8867_v40 = vld [vmem:[#allocation7_spill] sm:$0xff]  ;;  %v2075_v12 = vrot.slane %v8886_v43, %v7199_v7  ;;  %v8889_v43 = vld [vmem:[#allocation37_spill] sm:$0xff] }
 0x27a   : > { %2606 = vrot.lane.b32.xlu1 %v7436_v60, %s8783_s23  ;;  %2690 = vrot.lane.b32.xlu0 %v7439_v61, %s6627_s24  ;;  %v7582_v39 = vmul.bf16 %v5600_v22, %v7319_v35  ;;  %v7585_v32 = vmul.bf16 %v5628_v5, %v7319_v35  ;;  %v8871_v54 = vld [vmem:[#allocation19_spill] sm:$0xff] }
 0x27b   : > { %v7515_v48 = vpop.permute.xlu1 %2287  ;;  %v7603_v5 = vmul.bf16 %v5615_v13, %v7331_v0  ;;  %v915_v34 = vrot.slane %v8871_v54, %v7199_v7  ;;  %v8872_v57 = vld [vmem:[#allocation27_spill] sm:$0xff]  ;;  %v8879_v54 = vld [vmem:[#allocation9_spill] sm:$0xff] }
 0x27c   : > { %8863 = vst [vmem:[#allocation28_spill] sm:$0xff] %v7582_v39  ;;  %8864 = vst [vmem:[#allocation30_spill] sm:$0xff] %v7585_v32 }
 0x27d   : > { %8870 = vst [vmem:[#allocation31_spill] sm:$0xff] %v7603_v5 }
 0x27e   : > { %2618 = vrot.lane.b32.xlu1 %v7456_v62, %s8766_s17  ;;  %2702 = vrot.lane.b32.xlu0 %v7459_v1, %s6629_s18 }
 0x27f   : > { %v7551_v8 = vpop.permute.xlu1 %728 }
 0x282   : > { %2630 = vrot.lane.b32.xlu1 %v7476_v53, %s8764_s13  ;;  %2714 = vrot.lane.b32.xlu0 %v7479_v6, %s8840_s29 }
 0x283   : > { %v7577_v38 = vpop.permute.xlu1 %740 }
 0x286   : > { %2642 = vrot.lane.b32.xlu1 %v7498_v56, %s8791_s19  ;;  %2726 = vrot.lane.b32.xlu0 %v7501_v59, %s6633_s20 }
 0x287   : > { %v7613_v11 = vpop.permute.xlu1 %2320 }
 0x28a   : > { %2660 = vrot.lane.b32.xlu1 %v7520_v2, %s8789_s25  ;;  %2672 = vrot.lane.b32.xlu0 %v7523_v33, %s8780_s26 }
 0x28e   : > { %2600 = vrot.lane.b32.xlu1 %v7538_v4, %s8785_s16  ;;  %2684 = vrot.lane.b32.xlu0 %v7541_v45, %s8778_s15  ;;  %v8862_v4 = vld [vmem:[#allocation36_spill] sm:$0xff] }
 0x28f   : > { %v1274_v33 = vrot.slane %v8862_v4, %v7199_v7  ;;  %v8866_v4 = vld [vmem:[#allocation4_spill] sm:$0xff] }
 0x290   : > { %v1495_v17 = vrot.slane %v8866_v4, %v7199_v7  ;;  %v1843_v4 = vrot.slane %v8872_v57, %v7199_v7  ;;  %v1031_v57 = vrot.slane %v8879_v54, %v7199_v7 }
 0x291   : > { %v5604_v2 = vcombine.low %v1274_v33, %v1285_v42  ;;  %v8873_v33 = vld [vmem:[#allocation6_spill] sm:$0xff] }
 0x292   : > { %2612 = vrot.lane.b32.xlu1 %v7560_v29, %s8783_s23  ;;  %2696 = vrot.lane.b32.xlu0 %v7563_v14, %s6627_s24  ;;  %v1716_v29 = vrot.slane %v8867_v40, %v7199_v7  ;;  %v8868_v14 = vld [vmem:[#allocation8_spill] sm:$0xff]  ;;  %v904_v42 = vrot.slane %v8873_v33, %v7199_v7 }
 0x293   : > { %v1727_v45 = vrot.slane %v8868_v14, %v7199_v7  ;;  %v7600_v22 = vmul.bf16 %v5604_v2, %v7319_v35  ;;  %v5611_v14 = vcombine.low %v1484_v58, %v1495_v17  ;;  %v7615_v2 = vpop.permute.xlu0 %2370 }
 0x294   : > { %v5591_v33 = vcombine.low %v904_v42, %v915_v34  ;;  %v8883_v34 = vld [vmem:[#allocation11_spill] sm:$0xff] }
 0x295   : > { %8869 = vst [vmem:[#allocation34_spill] sm:$0xff] %v7600_v22  ;;  %v5619_v40 = vcombine.low %v1716_v29, %v1727_v45  ;;  %v7622_v13 = vmul.bf16 %v5611_v14, %v7331_v0  ;;  %v8877_v45 = vld [vmem:[#allocation22_spill] sm:$0xff]  ;;  %v7639_v14 = vpop.permute.xlu1 %2414 }
 0x296   : > { %2624 = vrot.lane.b32.xlu1 %v7582_v39, %s8766_s17  ;;  %2708 = vrot.lane.b32.xlu0 %v7585_v32, %s6629_s18  ;;  %v8874_v39 = vld [vmem:[#allocation10_spill] sm:$0xff]  ;;  %v1020_v29 = vrot.slane %v8877_v45, %v7199_v7  ;;  %v7644_v45 = vmul.bf16 %v5591_v33, %v7331_v0 }
 0x297   : > { %v1832_v32 = vrot.slane %v8874_v39, %v7199_v7  ;;  %8875 = vst [vmem:[#allocation33_spill] sm:$0xff] %v7622_v13  ;;  %v7625_v58 = vmul.bf16 %v5619_v40, %v7331_v0  ;;  %v8878_v39 = vld [vmem:[#allocation32_spill] sm:$0xff]  ;;  %v7641_v40 = vpop.permute.xlu0 %2403 }
 0x298   : > { %v1948_v17 = vrot.slane %v8878_v39, %v7199_v7  ;;  %8881 = vst [vmem:[#allocation15_spill] sm:$0xff] %v7644_v45 }
 0x299   : > { %8876 = vst [vmem:[#allocation35_spill] sm:$0xff] %v7625_v58 }
 0x29a   : > { %2636 = vrot.lane.b32.xlu1 %v7600_v22, %s8764_s13  ;;  %2670 = vrot.lane.b32.xlu0 %v7603_v5, %s8780_s26  ;;  %v5623_v22 = vcombine.low %v1832_v32, %v1843_v4  ;;  %v1959_v5 = vrot.slane %v8880_v46, %v7199_v7  ;;  %v5595_v32 = vcombine.low %v1020_v29, %v1031_v57  ;;  %v8884_v4 = vld [vmem:[#allocation12_spill] sm:$0xff]  ;;  %v8890_v57 = vld [vmem:[#allocation14_spill] sm:$0xff] }
 0x29b   : > { %v1136_v46 = vrot.slane %v8883_v34, %v7199_v7  ;;  %v1147_v42 = vrot.slane %v8884_v4, %v7199_v7  ;;  %v1252_v33 = vrot.slane %v8890_v57, %v7199_v7  ;;  %v8891_v4 = vld [vmem:[#allocation20_spill] sm:$0xff] }
 0x29c   : > { %v7647_v39 = vmul.bf16 %v5623_v22, %v7331_v0  ;;  %v5627_v54 = vcombine.low %v1948_v17, %v1959_v5  ;;  %v7664_v22 = vld [vmem:[%s8729_s5 + $0x80] sm:$0xff]   ;;  %v7667_v29 = vmul.bf16 %v5595_v32, %v7331_v0  ;;  %v2191_v32 = vrot.slane %v7469_v37, %v7199_v7 }
 0x29d   : > { %5999 = vmatprep.subr.bf16.mxu0 %v7664_v22  ;;  %v5599_v17 = vcombine.low %v1136_v46, %v1147_v42 }
 0x29e   : > { %2658 = vrot.lane.b32.xlu1 %v7622_v13, %s8789_s25  ;;  %2682 = vrot.lane.b32.xlu0 %v7625_v58, %s8778_s15  ;;  %8882 = vst [vmem:[#allocation39_spill] sm:$0xff] %v7647_v39  ;;  %v8885_v58 = vld [vmem:[#allocation16_spill] sm:$0xff]  ;;  %8887 = vst [vmem:[#allocation5_spill] sm:$0xff] %v7667_v29  ;;  %v7670_v5 = vmul.bf16 %v5627_v54, %v7331_v0  ;;  %v7683_v54 = vpop.permute.xlu0 %2436 }
 0x29f   : > { %v2064_v13 = vrot.slane %v8885_v58, %v7199_v7  ;;  %v1263_v58 = vrot.slane %v8889_v43, %v7199_v7  ;;  %v7690_v46 = vmul.bf16 %v5599_v17, %v7331_v0  ;;  %v8895_v43 = vld [vmem:[#allocation18_spill] sm:$0xff] }
 0x2a0   : > { %8888 = vst [vmem:[#allocation36_spill] sm:$0xff] %v7670_v5  ;;  %v1379_v57 = vrot.slane %v8895_v43, %v7199_v7  ;;  %v8898_v17 = vld [vmem:[#allocation42_spill] sm:$0xff] }
 0x2a1   : > { %v5631_v34 = vcombine.low %v2064_v13, %v2075_v12  ;;  %8892 = vst [vmem:[#allocation3_spill] sm:$0xff] %v7690_v46  ;;  %v8894_v13 = vld [vmem:[#allocation43_spill] sm:$0xff]  ;;  %v5603_v37 = vcombine.low %v1252_v33, %v1263_v58  ;;  %v2213_v58 = vrot.slane %v7491_v44, %v7199_v7  ;;  %v2252_v44 = vrot.slane %v7224_v30, %v7199_v7 }
 0x2a2   : > { %2598 = vrot.lane.b32.xlu1 %v7644_v45, %s8785_s16  ;;  %2694 = vrot.lane.b32.xlu0 %v7647_v39, %s6627_s24  ;;  %v2180_v45 = vrot.slane %v8891_v4, %v7199_v7  ;;  %v7681_v39 = vpop.permute.xlu1 %2425  ;;  %v1368_v42 = vrot.slane %v8894_v13, %v7199_v7  ;;  %v8896_v4 = vld [vmem:[#allocation38_spill] sm:$0xff]  ;;  %v2476_v13 = vpop.permute.xlu0 %2475 }
 0x2a3   : > { %v7693_v12 = vmul.bf16 %v5631_v34, %v7331_v0  ;;  %v2086_v63 = vrot.slane %v8896_v4, %v7199_v7  ;;  %v2202_v34 = vrot.slane %v8898_v17, %v7199_v7  ;;  %v7714_v43 = vmul.bf16 %v5603_v37, %v7331_v0 }
 0x2a5   : > { %8893 = vst [vmem:[#allocation4_spill] sm:$0xff] %v7693_v12  ;;  %8899 = vst [vmem:[#allocation7_spill] sm:$0xff] %v7714_v43  ;;  %v5636_v37 = vcombine.low %v2202_v34, %v2213_v58  ;;  %v2379_v34 = vrot.slane %v7615_v2, %v7199_v7 }
 0x2a6   : > { %2610 = vrot.lane.b32.xlu1 %v7667_v29, %s8783_s23  ;;  %2706 = vrot.lane.b32.xlu0 %v7670_v5, %s6629_s18  ;;  %v8897_v29 = vld [vmem:[#allocation40_spill] sm:$0xff]  ;;  %v5635_v5 = vcombine.low %v2180_v45, %v2191_v32  ;;  %v7711_v33 = vpop.permute.xlu1 %2519  ;;  %v5607_v32 = vcombine.low %v1368_v42, %v1379_v57  ;;  %v2509_v30 = vpop.permute.xlu0 %2508 }
 0x2a7   : > { %v2097_v41 = vrot.slane %v8897_v29, %v7199_v7  ;;  %v1390_v29 = vrot.slane %v7240_v26, %v7199_v7  ;;  %v2263_v26 = vrot.slane %v7266_v9, %v7199_v7  ;;  %v2368_v9 = vrot.slane %v7347_v27, %v7199_v7 }
 0x2a8   : > { %v7717_v45 = vmul.bf16 %v5635_v5, %v7331_v0  ;;  %v2274_v5 = vrot.slane %v7517_v49, %v7199_v7  ;;  %v2401_v49 = vrot.slane %v7423_v24, %v7199_v7  ;;  %v2484_v24 = vrot.slane %v2476_v13, %v7199_v7 }
 0x2a9   : > { %v5632_v4 = vcombine.low %v2086_v63, %v2097_v41  ;;  %v2285_v63 = vrot.slane %v7304_v3, %v7199_v7  ;;  %v7736_v41 = vmul.bf16 %v5607_v32, %v7331_v0  ;;  %v2390_v3 = vrot.slane %v7383_v50, %v7199_v7 }
 0x2aa   : > { %2622 = vrot.lane.b32.xlu1 %v7690_v46, %s8766_s17  ;;  %2718 = vrot.lane.b32.xlu0 %v7693_v12, %s8840_s29  ;;  %v8900_v12 = vld [vmem:[#allocation41_spill] sm:$0xff]  ;;  %v7741_v57 = vpop.permute.xlu1 %2541  ;;  %v5637_v58 = vcombine.low %v2252_v44, %v2263_v26  ;;  %v5641_v50 = vcombine.low %v2368_v9, %v2379_v34  ;;  %v2517_v2 = vrot.slane %v2509_v30, %v7199_v7  ;;  %s6638_s17 = smov 48  }
 0x2ab   : > { %v1401_v17 = vrot.slane %v8900_v12, %v7199_v7  ;;  %8901 = vst [vmem:[#allocation8_spill] sm:$0xff] %v7736_v41  ;;  %v7739_v12 = vmul.bf16 %v5632_v4, %v7319_v35  ;;  %v7759_v4 = vmul.bf16 %v5636_v37, %v7319_v35  ;;  %v5642_v27 = vcombine.low %v2390_v3, %v2401_v49 }
 0x2ac   : > { %v2506_v44 = vrot.slane %v7489_v19, %v7199_v7  ;;  %v7772_v26 = vmul.bf16 %v5637_v58, %v7222_v21  ;;  %v7785_v19 = vmul.bf16 %v5641_v50, %v7222_v21  ;;  %v2296_v3 = vrot.slane %v7515_v48, %v7199_v7 }
 0x2ad   : > { %8902 = vst [vmem:[#allocation19_spill] sm:$0xff] %v7739_v12  ;;  %v5608_v42 = vcombine.low %v1390_v29, %v1401_v17  ;;  %v5638_v29 = vcombine.low %v2274_v5, %v2285_v63  ;;  %v2495_v17 = vrot.slane %v7453_v55, %v7199_v7  ;;  %v2531_v5 = vpop.permute.xlu0 %2530  ;;  %v2307_v49 = vrot.slane %v7553_v36, %v7199_v7 }
 0x2ae   : > { %2634 = vrot.lane.b32.xlu1 %v7714_v43, %s8764_s13  ;;  %2730 = vrot.lane.b32.xlu0 %v7717_v45, %s6633_s20  ;;  %v2553_v37 = vpop.permute.xlu1 %2552  ;;  %v5646_v55 = vcombine.low %v2506_v44, %v2517_v2  ;;  %v2318_v48 = vrot.slane %v7579_v25, %v7199_v7  ;;  %v2329_v36 = vrot.slane %v7613_v11, %v7199_v7  ;;  %s6637_s13 = smov 88  }
 0x2af   : > { %v7756_v32 = vmul.bf16 %v5608_v42, %v7319_v35  ;;  %v7775_v63 = vmul.bf16 %v5638_v29, %v7220_v31  ;;  %v5645_v13 = vcombine.low %v2484_v24, %v2495_v17  ;;  %v7782_v42 = vmul.bf16 %v5642_v27, %v7220_v31 }
 0x2b0   : > { %v2587_v58 = vmul.bf16 %v5646_v55, %v7220_v31  ;;  %v5639_v50 = vcombine.low %v2296_v3, %v2307_v49  ;;  %v2423_v24 = vrot.slane %v7639_v14, %v7199_v7  ;;  %v2412_v2 = vrot.slane %v7641_v40, %v7199_v7 }
 0x2b1   : > { %8903 = vst [vmem:[#allocation27_spill] sm:$0xff] %v7756_v32  ;;  %v7789_v9 = vpop.permute.xlu0 %752  ;;  %v7800_v34 = vmul.bf16 %v5645_v13, %v7222_v21  ;;  %v2434_v25 = vrot.slane %v7681_v39, %v7199_v7  ;;  %v2445_v17 = vrot.slane %v7683_v54, %v7199_v7  ;;  %v2528_v11 = vrot.slane %v7711_v33, %v7199_v7 }
 0x2b2   : > { %2646 = vrot.lane.b32.xlu1 %v7736_v41, %s8791_s19  ;;  %2720 = vrot.lane.b32.xlu0 %v7739_v12, %s8840_s29  ;;  %v7787_v30 = vpop.permute.xlu1 %764  ;;  %v2539_v14 = vrot.slane %v2531_v5, %v7199_v7  ;;  %v5640_v44 = vcombine.low %v2318_v48, %v2329_v36  ;;  %v5643_v40 = vcombine.low %v2412_v2, %v2423_v24 }
 0x2b3   : > { %v7834_v3 = vmul.bf16 %v5639_v50, %v7331_v0  ;;  %v5644_v39 = vcombine.low %v2434_v25, %v2445_v17  ;;  %v2550_v33 = vrot.slane %v7741_v57, %v7199_v7  ;;  %v2561_v5 = vrot.slane %v2553_v37, %v7199_v7 }
 0x2b4   : > { %v5647_v54 = vcombine.low %v2528_v11, %v2539_v14  ;;  %v7848_v50 = vmul.bf16 %v5640_v44, %v7319_v35  ;;  %v7851_v36 = vmul.bf16 %v5643_v40, %v7331_v0 }
 0x2b5   : > { %v7805_v27 = vpop.permute.xlu0 %788  ;;  %v5648_v24 = vcombine.low %v2550_v33, %v2561_v5  ;;  %v7862_v2 = vmul.bf16 %v5644_v39, %v7319_v35 }
 0x2b6   : > { %2648 = vrot.lane.b32.xlu1 %v7756_v32, %s8791_s19  ;;  %2732 = vrot.lane.b32.xlu0 %v7759_v4, %s6633_s20  ;;  %v7803_v29 = vpop.permute.xlu1 %776  ;;  %v7865_v25 = vmul.bf16 %v5647_v54, %v7331_v0 }
 0x2b7   : > { %v7876_v14 = vmul.bf16 %v5648_v24, %v7319_v35 }
 0x2b9   : > { %v7831_v55 = vpop.permute.xlu0 %812 }
 0x2ba   : > { %2738 = vrot.lane.b32.xlu1 %v7772_v26, %s6634_s28  ;;  %2740 = vrot.lane.b32.xlu0 %v7775_v63, %s6634_s28  ;;  %v7829_v13 = vpop.permute.xlu1 %800 }
 0x2be   : > { %2752 = vrot.lane.b32.xlu0 %v7782_v42, %s8775_s30  ;;  %2750 = vrot.lane.b32.xlu1 %v7785_v19, %s8775_s30 }
 0x2c2   : > { %2762 = vrot.lane.b32.xlu1 %v7800_v34, %s8773_s27  ;;  %2764 = vrot.lane.b32.xlu0 %v2587_v58, %s8773_s27 }
 0x2c6   : > { %3179 = vrot.lane.b32.xlu1 %v7222_v21, %s6637_s13  ;;  %3181 = vrot.lane.b32.xlu0 %v7220_v31, %s6637_s13 }
 0x2ca   : > { %3183 = vrot.lane.b32.xlu1 %v7331_v0, %s6637_s13  ;;  %2742 = vrot.lane.b32.xlu0 %v7834_v3, %s6634_s28 }
 0x2cc   : > { %v7843_v49 = vpop.permute.xlu1 %2656  ;;  %v7845_v48 = vpop.permute.xlu0 %2668 }
 0x2ce   : > { %2744 = vrot.lane.b32.xlu1 %v7848_v50, %s6634_s28  ;;  %2754 = vrot.lane.b32.xlu0 %v7851_v36, %s8775_s30 }
 0x2d0   : > { %v7857_v57 = vpop.permute.xlu1 %2596  ;;  %v7859_v37 = vpop.permute.xlu0 %2680 }
 0x2d2   : > { %2756 = vrot.lane.b32.xlu1 %v7862_v2, %s8775_s30  ;;  %2766 = vrot.lane.b32.xlu0 %v7865_v25, %s8773_s27 }
 0x2d4   : > { %v7871_v17 = vpop.permute.xlu1 %2608  ;;  %v7873_v11 = vpop.permute.xlu0 %2692 }
 0x2d6   : > { %2768 = vrot.lane.b32.xlu1 %v7876_v14, %s8773_s27  ;;  %3185 = vrot.lane.b32.xlu0 %v7319_v35, %s6637_s13  ;;  %s8904_s27 = smov 60   ;;  %s8905_s13 = smov 80  }
 0x2d8   : > { %v7882_v44 = vpop.permute.xlu1 %2620  ;;  %v7884_v40 = vpop.permute.xlu0 %2704 }
 0x2da   : > { %3368 = vrot.lane.b32.xlu1 %v7222_v21, %s6638_s17  ;;  %3370 = vrot.lane.b32.xlu0 %v7220_v31, %s6638_s17 }
 0x2dc   : > { %v7888_v39 = vpop.permute.xlu1 %2632  ;;  %v7890_v54 = vpop.permute.xlu0 %2716 }
 0x2de   : > { %3372 = vrot.lane.b32.xlu1 %v7331_v0, %s6638_s17  ;;  %3559 = vrot.lane.b32.xlu0 %v7775_v63, %s6633_s20  ;;  %v737_v63 = vrot.slane %v7551_v8, %v7199_v7 }
 0x2e0   : > { %v7895_v33 = vpop.permute.xlu1 %2644  ;;  %v7897_v5 = vpop.permute.xlu0 %2728 }
 0x2e2   : > { %3374 = vrot.lane.b32.xlu1 %v7319_v35, %s6638_s17  ;;  %3567 = vrot.lane.b32.xlu0 %v7782_v42, %s6634_s28  ;;  %v749_v42 = vrot.slane %v7577_v38, %v7199_v7  ;;  %s8782_s17 = smov 68  }
 0x2e4   : > { %v2655_v24 = vpop.permute.xlu1 %2654  ;;  %v2667_v32 = vpop.permute.xlu0 %2666 }
 0x2e6   : > { %3549 = vrot.lane.b32.xlu1 %v7501_v59, %s8840_s29  ;;  %3575 = vrot.lane.b32.xlu0 %v2587_v58, %s8775_s30  ;;  %v5585_v59 = vcombine.low %v737_v63, %v749_v42 }
 0x2e8   : > { %v2595_v12 = vpop.permute.xlu1 %2594  ;;  %v2679_v41 = vpop.permute.xlu0 %2678  ;;  %v846_v38 = vmul.bf16 %v5585_v59, %v7222_v21 }
 0x2ea   : > { %3557 = vrot.lane.b32.xlu1 %v7772_v26, %s6633_s20  ;;  %3501 = vrot.lane.b32.xlu0 %v7386_v51, %s8791_s19  ;;  %v773_v26 = vrot.slane %v7787_v30, %v7199_v7  ;;  %v761_v51 = vrot.slane %v7789_v9, %v7199_v7  ;;  %v2834_v30 = vsel %vm2832_vm3, %v2655_v24, %v2667_v32 }
 0x2eb   : > { %v2773_v42 = vsel %vm2770_vm4, %v846_v38, %v2595_v12  ;;  %v2836_v32 = vsel %vm2832_vm3, %v7843_v49, %v7845_v48 }
 0x2ec   : > { %v2607_v43 = vpop.permute.xlu1 %2606  ;;  %v2691_v46 = vpop.permute.xlu0 %2690 }
 0x2ee   : > { %3551 = vrot.lane.b32.xlu1 %v7363_v47, %s8840_s29  ;;  %3861 = vrot.lane.b32.xlu0 %v7220_v31, %s8782_s17  ;;  %v5586_v47 = vcombine.low %v761_v51, %v773_v26 }
 0x2f0   : > { %v2619_v8 = vpop.permute.xlu1 %2618  ;;  %v2703_v58 = vpop.permute.xlu0 %2702 }
 0x2f2   : > { %3565 = vrot.lane.b32.xlu1 %v7785_v19, %s6634_s28  ;;  %3517 = vrot.lane.b32.xlu0 %v7413_v52, %s8780_s26  ;;  %v2843_v19 = vsel %vm2841_vm5, %v2834_v30, %v2679_v41  ;;  %v2785_v52 = vsel %vm2783_vm6, %v2773_v42, %v2607_v43  ;;  %v2845_v43 = vsel %vm2841_vm5, %v2836_v32, %v7859_v37 }
 0x2f3   : > { %v2852_v26 = vsel %vm2850_vm7, %v2843_v19, %v2691_v46  ;;  %v2794_v12 = vsel %vm2792_vm8, %v2785_v52, %v2619_v8 }
 0x2f4   : > { %v2631_v63 = vpop.permute.xlu1 %2630  ;;  %v2715_v9 = vpop.permute.xlu0 %2714  ;;  %v2861_v41 = vsel %vm2859_vm9, %v2852_v26, %v2703_v58  ;;  %v847_v58 = vmul.bf16 %v5586_v47, %v7220_v31 }
 0x2f5   : > { %v2803_v46 = vsel %vm2801_vm10, %v2794_v12, %v2631_v63  ;;  %v2870_v59 = vsel %vm2868_vm11, %v2861_v41, %v2715_v9  ;;  %v7964_v63 = vld [vmem:[%s8729_s5 + $0x88] sm:$0xff]  }
 0x2f6   : > { %3573 = vrot.lane.b32.xlu1 %v7800_v34, %s8775_s30  ;;  %3525 = vrot.lane.b32.xlu0 %v7439_v61, %s8778_s15  ;;  %v2854_v61 = vsel %vm2850_vm7, %v2845_v43, %v7873_v11  ;;  %s8787_s30 = smov 108  }
 0x2f7   : > { %v2863_v37 = vsel %vm2859_vm9, %v2854_v61, %v7884_v40  ;;  %v2776_v40 = vsel %vm2770_vm4, %v847_v58, %v7857_v57 }
 0x2f8   : > { %v2643_v34 = vpop.permute.xlu1 %2642  ;;  %v7944_v51 = vpop.permute.xlu0 %2726  ;;  %v2872_v11 = vsel %vm2868_vm11, %v2863_v37, %v7890_v54 }
 0x2f9   : > { %v2812_v48 = vsel %vm2810_vm12, %v2803_v46, %v2643_v34  ;;  %v2879_v8 = vsel %vm2877_vm13, %v2870_v59, %v7944_v51  ;;  %v2882_v47 = vsel %vm2877_vm13, %v2872_v11, %v7897_v5  ;;  %v809_v59 = vrot.slane %v7829_v13, %v7199_v7 }
 0x2fa   : > { %v2821_v30 = vsel %vm2819_vm14, %v2812_v48, %v2655_v24  ;;  %3859 = vrot.lane.b32.xlu1 %v7222_v21, %s8782_s17  ;;  %3533 = vrot.lane.b32.xlu0 %v7459_v1, %s6627_s24  ;;  %v2787_v1 = vsel %vm2783_vm6, %v2776_v40, %v7871_v17  ;;  %v7989_v17 = vld [vmem:[%s8729_s5 + $0x90] sm:$0xff]  }
 0x2fb   : > { %3077 = vmatprep.mubr.bf16.mxu0 %v2879_v8  ;;  %v2796_v54 = vsel %vm2792_vm8, %v2787_v1, %v7882_v44 }
 0x2fc   : > { %3078 = vmatmul.mubr.bf16.vlgmr.msra.gmra.mrb[8].mxu0 %v2821_v30  ;;  %v7968_v24 = vpop.permute.xlu1 %2660  ;;  %v7972_v9 = vpop.permute.xlu0 %2672  ;;  %v2805_v57 = vsel %vm2801_vm10, %v2796_v54, %v7888_v39 }
 0x2fd   : > { %3085 = vmatprep.mubr.bf16.mxu0 %v2882_v47  ;;  %6000 = vmatpush3.bf16.msra.mxu0 %v7664_v22  ;;  %v2814_v42 = vsel %vm2810_vm12, %v2805_v57, %v7895_v33  ;;  %v2840_v30 = vsel %vm2832_vm3, %v7968_v24, %v7972_v9 }
 0x2fe   : > { %3509 = vrot.lane.b32.xlu1 %v7389_v18, %s8789_s25  ;;  %3541 = vrot.lane.b32.xlu0 %v7479_v6, %s6629_s18  ;;  %v2824_v18 = vsel %vm2819_vm14, %v2814_v42, %v7843_v49  ;;  %v8005_v6 = vld [vmem:[%s8729_s5 + $0x98] sm:$0xff]  }
 0x2ff   : > { %6001 = vmatprep.subr.bf16.mxu0 %v7964_v63 }
 0x300   : > { %v7993_v44 = vpop.permute.xlu1 %2600  ;;  %v2685_v19 = vpop.permute.xlu0 %2684 }
 0x301   : > { %6002 = vmatpush3.bf16.msra.mxu0 %v7964_v63  ;;  %v2849_v54 = vsel %vm2841_vm5, %v2840_v30, %v2685_v19 }
 0x302   : > { %3461 = vrot.lane.b32.xlu1 %v846_v38, %s8787_s30  ;;  %3503 = vrot.lane.b32.xlu0 %v7227_v28, %s8791_s19  ;;  %s8918_s19 = smov 20  }
 0x303   : > { %6003 = vmatprep.subr.bf16.mxu0 %v7989_v17 }
 0x304   : > { %3086 = vmatmul.mubr.bf16.gmra.mrb[12].mxu0 %v2824_v18  ;;  %v2613_v39 = vpop.permute.xlu1 %2612  ;;  %v2697_v33 = vpop.permute.xlu0 %2696 }
 0x305   : > { %6004 = vmatpush3.bf16.msra.mxu0 %v7989_v17 }
 0x306   : > { %3469 = vrot.lane.b32.xlu1 %v7436_v60, %s8785_s16  ;;  %3863 = vrot.lane.b32.xlu0 %v7331_v0, %s8782_s17  ;;  %s8912_s17 = smov 24  }
 0x307   : > { %6005 = vmatprep.subr.bf16.mxu0 %v8005_v6 }
 0x308   : > { %v2625_v28 = vpop.permute.xlu1 %2624  ;;  %v2709_v49 = vpop.permute.xlu0 %2708 }
 0x309   : > { %6006 = vmatpush3.bf16.msra.mxu0 %v8005_v6 }
 0x30a   : > { %3477 = vrot.lane.b32.xlu1 %v7456_v62, %s8783_s23  ;;  %3519 = vrot.lane.b32.xlu0 %v7253_v16, %s8780_s26  ;;  %v785_v16 = vrot.slane %v7803_v29, %v7199_v7  ;;  %v797_v62 = vrot.slane %v7805_v27, %v7199_v7  ;;  %s8913_s26 = smov 100  }
 0x30c   : > { %v2637_v38 = vpop.permute.xlu1 %2636  ;;  %v2671_v52 = vpop.permute.xlu0 %2670  ;;  %v5587_v43 = vcombine.low %v785_v16, %v797_v62 }
 0x30e   : > { %3485 = vrot.lane.b32.xlu1 %v7476_v53, %s8904_s27  ;;  %3527 = vrot.lane.b32.xlu0 %v7284_v10, %s8778_s15  ;;  %v8041_v27 = vmul.bf16 %v5587_v43, %v7331_v0  ;;  %s8920_s15 = smov 40  }
 0x310   : > { %v2659_v60 = vpop.permute.xlu1 %2658  ;;  %v2683_v26 = vpop.permute.xlu0 %2682 }
 0x311   : > { %v2838_v10 = vsel %vm2832_vm3, %v2659_v60, %v2671_v52 }
 0x312   : > { %3493 = vrot.lane.b32.xlu1 %v7498_v56, %s8905_s13  ;;  %v2847_v29 = vsel %vm2841_vm5, %v2838_v10, %v2683_v26 }
 0x314   : > { %v2599_v32 = vpop.permute.xlu1 %2598  ;;  %v2695_v12 = vpop.permute.xlu0 %2694 }
 0x315   : > { %v2856_v34 = vsel %vm2850_vm7, %v2847_v29, %v2695_v12 }
 0x316   : > { %3511 = vrot.lane.b32.xlu1 %v7230_v23, %s8789_s25  ;;  %v821_v23 = vrot.slane %v7831_v55, %v7199_v7  ;;  %v2779_v7 = vsel %vm2770_vm4, %v8041_v27, %v2599_v32  ;;  %s8928_s25 = smov 32  }
 0x318   : > { %v2611_v53 = vpop.permute.xlu1 %2610  ;;  %v2707_v41 = vpop.permute.xlu0 %2706  ;;  %v5588_v13 = vcombine.low %v809_v59, %v821_v23 }
 0x319   : > { %v2865_v61 = vsel %vm2859_vm9, %v2856_v34, %v2707_v41  ;;  %v2789_v37 = vsel %vm2783_vm6, %v2779_v7, %v2611_v53 }
 0x31a   : > { %3463 = vrot.lane.b32.xlu1 %v847_v58, %s8787_s30  ;;  %v8057_v1 = vmul.bf16 %v5588_v13, %v7319_v35  ;;  %s8925_s30 = smov 12  }
 0x31c   : > { %v2623_v46 = vpop.permute.xlu1 %2622  ;;  %v2719_v56 = vpop.permute.xlu0 %2718  ;;  %v2782_v18 = vsel %vm2770_vm4, %v8057_v1, %v7993_v44 }
 0x31d   : > { %v2874_v48 = vsel %vm2868_vm11, %v2865_v61, %v2719_v56  ;;  %v2791_v52 = vsel %vm2783_vm6, %v2782_v18, %v2613_v39 }
 0x31e   : > { %3471 = vrot.lane.b32.xlu1 %v7281_v20, %s8785_s16  ;;  %v2798_v20 = vsel %vm2792_vm8, %v2789_v37, %v2623_v46  ;;  %v2800_v19 = vsel %vm2792_vm8, %v2791_v52, %v2625_v28  ;;  %s8923_s16 = smov 68  }
 0x320   : > { %v2635_v8 = vpop.permute.xlu1 %2634  ;;  %v2731_v58 = vpop.permute.xlu0 %2730 }
 0x321   : > { %v2885_v55 = vsel %vm2877_vm13, %v2874_v48, %v2731_v58  ;;  %v2807_v11 = vsel %vm2801_vm10, %v2798_v20, %v2635_v8 }
 0x322   : > { %3479 = vrot.lane.b32.xlu1 %v7307_v15, %s8783_s23  ;;  %3093 = vmatprep.mubr.bf16.mxu0 %v2885_v55  ;;  %v2858_v15 = vsel %vm2850_vm7, %v2849_v54, %v2697_v33  ;;  %v2809_v33 = vsel %vm2801_vm10, %v2800_v19, %v2637_v38  ;;  %v6572_v19 = vld [vmem:[%s8729_s5] sm:$0xff]  }
 0x323   : > { %v2867_v9 = vsel %vm2859_vm9, %v2858_v15, %v2709_v49 }
 0x324   : > { %v2647_v40 = vpop.permute.xlu1 %2646  ;;  %v2721_v47 = vpop.permute.xlu0 %2720 }
 0x325   : > { %v2816_v57 = vsel %vm2810_vm12, %v2807_v11, %v2647_v40  ;;  %v2876_v26 = vsel %vm2868_vm11, %v2867_v9, %v2721_v47 }
 0x326   : > { %v2827_v42 = vsel %vm2819_vm14, %v2816_v57, %v2659_v60 }
 0x327   : > { %3094 = vmatmul.mubr.bf16.gmra.mrb[16].mxu0 %v2827_v42 }
 0x328   : > { %v2649_v32 = vpop.permute.xlu1 %2648  ;;  %v2733_v12 = vpop.permute.xlu0 %2732 }
 0x329   : > { %v2888_v16 = vsel %vm2877_vm13, %v2876_v26, %v2733_v12  ;;  %v2818_v60 = vsel %vm2810_vm12, %v2809_v33, %v2649_v32  ;;  %v6571_v26 = vld [vmem:[%s8729_s5 + $0x40] sm:$0xff]  }
 0x32a   : > { %3101 = vmatprep.mubr.bf16.mxu0 %v2888_v16  ;;  %v2830_v49 = vsel %vm2819_vm14, %v2818_v60, %v7968_v24  ;;  %v6573_v60 = vld [vmem:[%s8729_s5 + $0x48] sm:$0xff]  }
 0x32c   : > { %v2739_v62 = vpop.permute.xlu1 %2738  ;;  %v2741_v44 = vpop.permute.xlu0 %2740 }
 0x32d   : > { %v2892_v28 = vsel %vm2890_vm15, %v7944_v51, %v2739_v62  ;;  %v2894_v38 = vsel %vm2890_vm15, %v7897_v5, %v2741_v44  ;;  %v6574_v62 = vld [vmem:[%s8729_s5 + $0x8] sm:$0xff]  }
 0x32f   : > { %3102 = vmatmul.mubr.bf16.gmra.mrb[20].mxu0 %v2830_v49 }
 0x330   : > { %v2751_v39 = vpop.permute.xlu1 %2750  ;;  %v2753_v53 = vpop.permute.xlu0 %2752 }
 0x331   : > { %v2901_v41 = vsel %vm2899_vm2, %v2892_v28, %v2751_v39  ;;  %v2903_v10 = vsel %vm2899_vm2, %v2894_v38, %v2753_v53  ;;  %v6575_v39 = vld [vmem:[%s8729_s5 + $0x50] sm:$0xff]   ;;  %v6577_v38 = vld [vmem:[%s8729_s5 + $0x58] sm:$0xff]  }
 0x334   : > { %v2763_v43 = vpop.permute.xlu1 %2762  ;;  %v2765_v46 = vpop.permute.xlu0 %2764 }
 0x335   : > { %v2910_v24 = vsel %vm2908_vm1, %v2901_v41, %v2763_v43  ;;  %v2912_v56 = vsel %vm2908_vm1, %v2903_v10, %v2765_v46  ;;  %v6578_v41 = vld [vmem:[%s8729_s5 + $0x18] sm:$0xff]   ;;  %v6579_v46 = vld [vmem:[%s8729_s5 + $0x60] sm:$0xff]  }
 0x336   : > { %6007 = vmatprep.mubr.msk.bf16.mxu0 %vm498_vm0, %v2910_v24  ;;  %v6580_v24 = vld [vmem:[%s8729_s5 + $0x20] sm:$0xff]  }
 0x337   : > { %6008 = vmatmul.mubr.msk.bf16.vlgmr.msra.gmra.mrb[24].mxu0 %vm498_vm0, %v2912_v56 }
 0x338   : > { %v3180_v59 = vpop.permute.xlu1 %3179  ;;  %v3182_v23 = vpop.permute.xlu0 %3181 }
 0x339   : > { %6327 = vmatprep.subr.msk.bf16.mxu0 %vm2770_vm4, %v3180_v59  ;;  %v3200_v5 = vsel %vm2770_vm4, %v3180_v59, 0  ;;  %v3203_v48 = vsel %vm2770_vm4, %v3182_v23, 0  ;;  %v6581_v59 = vld [vmem:[%s8729_s5 + $0x68] sm:$0xff]  }
 0x33a   : > { %6016 = vmatpush3.bf16.xpose.msra.mxu0 %v3200_v5  ;;  %v6582_v5 = vld [vmem:[%s8729_s5 + $0x28] sm:$0xff]  }
 0x33b   : > { %6328 = vmatprep.subr.msk.bf16.mxu0 %vm2770_vm4, %v3182_v23 }
 0x33c   : > { %v3184_v51 = vpop.permute.xlu1 %3183  ;;  %v2743_v29 = vpop.permute.xlu0 %2742 }
 0x33d   : > { %v2896_v8 = vsel %vm2890_vm15, %v2731_v58, %v2743_v29  ;;  %v3206_v58 = vsel %vm2770_vm4, %v3184_v51, 0  ;;  %v6583_v29 = vld [vmem:[%s8729_s5 + $0x70] sm:$0xff]  }
 0x340   : > { %v2745_v34 = vpop.permute.xlu1 %2744  ;;  %v2755_v61 = vpop.permute.xlu0 %2754 }
 0x341   : > { %v2905_v13 = vsel %vm2899_vm2, %v2896_v8, %v2755_v61  ;;  %v2898_v20 = vsel %vm2890_vm15, %v2733_v12, %v2745_v34  ;;  %v6584_v8 = vld [vmem:[%s8729_s5 + $0x30] sm:$0xff]  }
 0x342   : > { %6018 = vmatpush3.bf16.xpose.msra.mxu0 %v3203_v48 }
 0x343   : > { %6329 = vmatprep.subr.msk.bf16.mxu0 %vm2770_vm4, %v3184_v51 }
 0x344   : > { %v2757_v7 = vpop.permute.xlu1 %2756  ;;  %v2767_v55 = vpop.permute.xlu0 %2766 }
 0x345   : > { %v2914_v37 = vsel %vm2908_vm1, %v2905_v13, %v2767_v55  ;;  %v2907_v30 = vsel %vm2899_vm2, %v2898_v20, %v2757_v7 }
 0x346   : > { %6011 = vmatprep.mubr.msk.bf16.mxu0 %vm498_vm0, %v2914_v37  ;;  %v6585_v37 = vld [vmem:[%s8729_s5 + $0x78] sm:$0xff]  }
 0x348   : > { %v2769_v11 = vpop.permute.xlu1 %2768  ;;  %v3186_v40 = vpop.permute.xlu0 %3185 }
 0x349   : > { %v2916_v47 = vsel %vm2908_vm1, %v2907_v30, %v2769_v11  ;;  %v3209_v18 = vsel %vm2770_vm4, %v3186_v40, 0  ;;  %v6586_v11 = vld [vmem:[%s8729_s5 + $0x38] sm:$0xff]  }
 0x34a   : > { %6012 = vmatmul.mubr.msk.bf16.gmra.mrb[28].mxu0 %vm498_vm0, %v2916_v47 }
 0x34b   : > { %6020 = vmatpush3.bf16.xpose.msra.mxu0 %v3206_v58  ;;  %6023 = vmatprep.mubr.msk.bf16.mxu0 %vm2770_vm4, %v7222_v21 }
 0x34c   : > { %6330 = vmatprep.subr.msk.bf16.mxu0 %vm2770_vm4, %v3186_v40  ;;  %v3369_v54 = vpop.permute.xlu1 %3368  ;;  %v3371_v57 = vpop.permute.xlu0 %3370 }
 0x34d   : > { %6031 = vmatprep.subr.bf16.mxu1 %v3369_v54 }
 0x34e   : > { %6032 = vmatpush3.bf16.msra.mxu1 %v3369_v54 }
 0x34f   : > { %6033 = vmatprep.subr.bf16.mxu1 %v3371_v57 }
 0x350   : > { %v3373_v15 = vpop.permute.xlu1 %3372  ;;  %v8102_v42 = vpop.permute.xlu0 %3559 }
 0x352   : > { %6034 = vmatpush3.bf16.msra.mxu1 %v3371_v57  ;;  %v8906_v57 = vld [vmem:[#allocation49_spill] sm:$0xff] }
 0x353   : > { %6022 = vmatpush3.bf16.xpose.msra.mxu0 %v3209_v18  ;;  %6035 = vmatprep.subr.bf16.mxu1 %v3373_v15 }
 0x354   : > { %v3375_v9 = vpop.permute.xlu1 %3374  ;;  %v8105_v52 = vpop.permute.xlu0 %3567  ;;  %5849 = vmatprep.subr.bf16.mxu0 %v6571_v26 }
 0x356   : > { %6036 = vmatpush3.bf16.msra.mxu1 %v3373_v15 }
 0x357   : > { %6037 = vmatprep.subr.bf16.mxu1 %v3375_v9 }
 0x358   : > { %v8110_v32 = vpop.permute.xlu1 %3549  ;;  %v8112_v12 = vpop.permute.xlu0 %3575 }
 0x35a   : > { %6024 = vmatmul.mubr.msk.bf16.vlgmr.msra.gmra.mrb[24].mxu0 %vm2770_vm4, %v7220_v31  ;;  %6038 = vmatpush3.bf16.msra.mxu1 %v3375_v9 }
 0x35b   : > { %6027 = vmatprep.mubr.msk.bf16.mxu0 %vm2770_vm4, %v7331_v0  ;;  %5850 = vmatpush3.bf16.msra.mxu0 %v6572_v19 }
 0x35c   : > { %v8121_v16 = vpop.permute.xlu1 %3557  ;;  %v3502_v33 = vpop.permute.xlu0 %3501  ;;  %5851 = vmatprep.subr.bf16.mxu0 %v6573_v60  ;;  %6047 = vmatprep.subr.bf16.mxu1 %v7664_v22  ;;  %v6576_v22 = vld [vmem:[%s8729_s5 + $0x10] sm:$0xff]  }
 0x35f   : > { %5852 = vmatpush3.bf16.msra.mxu0 %v6574_v62 }
 0x360   : > { %v8130_v44 = vpop.permute.xlu1 %3551  ;;  %v8132_v49 = vpop.permute.xlu0 %3861  ;;  %5853 = vmatprep.subr.bf16.mxu0 %v6575_v39 }
 0x362   : > { %6028 = vmatmul.mubr.msk.bf16.gmra.mrb[28].mxu0 %vm2770_vm4, %v7319_v35 }
 0x363   : > { %5854 = vmatpush3.bf16.msra.mxu0 %v6576_v22 }
 0x364   : > { %v8142_v53 = vpop.permute.xlu1 %3565  ;;  %v3518_v28 = vpop.permute.xlu0 %3517  ;;  %5855 = vmatprep.subr.bf16.mxu0 %v6577_v38 }
 0x367   : > { %5856 = vmatpush3.bf16.msra.mxu0 %v6578_v41 }
 0x368   : > { %v8150_v10 = vpop.permute.xlu1 %3573  ;;  %v3526_v43 = vpop.permute.xlu0 %3525  ;;  %5857 = vmatprep.subr.bf16.mxu0 %v6579_v46  ;;  %v8907_v46 = vld [vmem:[#allocation44_spill] sm:$0xff] }
 0x36b   : > { %5858 = vmatpush3.bf16.msra.mxu0 %v6580_v24 }
 0x36c   : > { %v8158_v56 = vpop.permute.xlu1 %3859  ;;  %5859 = vmatprep.subr.bf16.mxu0 %v6581_v59  ;;  %v3534_v23 = vpop.permute.xlu0 %3533 }
 0x36f   : > { %5860 = vmatpush3.bf16.msra.mxu0 %v6582_v5 }
 0x370   : > { %v3510_v51 = vpop.permute.xlu1 %3509  ;;  %5861 = vmatprep.subr.bf16.mxu0 %v6583_v29  ;;  %v3542_v7 = vpop.permute.xlu0 %3541 }
 0x371   : > { %v3638_v34 = vsel %vm2832_vm3, %v3502_v33, %v3510_v51 }
 0x372   : > { %v3646_v61 = vsel %vm2841_vm5, %v3638_v34, %v3518_v28 }
 0x373   : > { %v3654_v48 = vsel %vm2850_vm7, %v3646_v61, %v3526_v43  ;;  %5862 = vmatpush3.bf16.msra.mxu0 %v6584_v8 }
 0x374   : > { %v3662_v13 = vsel %vm2859_vm9, %v3654_v48, %v3534_v23  ;;  %v3462_v55 = vpop.permute.xlu1 %3461  ;;  %5863 = vmatprep.subr.bf16.mxu0 %v6585_v37  ;;  %v8185_v58 = vpop.permute.xlu0 %3503 }
 0x375   : > { %v3670_v20 = vsel %vm2868_vm11, %v3662_v13, %v3542_v7  ;;  %v3583_v15 = vsel %vm2770_vm4, %v3462_v55, %v8906_v57 }
 0x376   : > { %v3678_v30 = vsel %vm2877_vm13, %v3670_v20, %v8110_v32 }
 0x377   : > { %3753 = vmatprep.mubr.bf16.mxu0 %v3678_v30  ;;  %5864 = vmatpush3.bf16.msra.mxu0 %v6586_v11 }
 0x378   : > { %v3470_v40 = vpop.permute.xlu1 %3469  ;;  %v8190_v9 = vpop.permute.xlu0 %3863 }
 0x379   : > { %v3594_v18 = vsel %vm2783_vm6, %v3583_v15, %v3470_v40 }
 0x37c   : > { %v3478_v47 = vpop.permute.xlu1 %3477  ;;  %v3520_v28 = vpop.permute.xlu0 %3519 }
 0x37d   : > { %v3602_v26 = vsel %vm2792_vm8, %v3594_v18, %v3478_v47 }
 0x380   : > { %v3486_v54 = vpop.permute.xlu1 %3485 }
 0x381   : > { %v3610_v19 = vsel %vm2801_vm10, %v3602_v26, %v3486_v54 }
 0x384   : > { %v3494_v60 = vpop.permute.xlu1 %3493 }
 0x385   : > { %v3618_v62 = vsel %vm2810_vm12, %v3610_v19, %v3494_v60 }
 0x386   : > { %v3626_v39 = vsel %vm2819_vm14, %v3618_v62, %v3502_v33 }
 0x387   : > { %3754 = vmatmul.mubr.bf16.vlgmr.msra.gmra.mrb[32].mxu0 %v3626_v39 }
 0x388   : > { %v3512_v22 = vpop.permute.xlu1 %3511 }
 0x389   : > { %v3640_v38 = vsel %vm2832_vm3, %v8185_v58, %v3512_v22 }
 0x38a   : > { %v8199_v41 = vsel %vm2841_vm5, %v3640_v38, %v3520_v28 }
 0x38c   : > { %v3464_v43 = vpop.permute.xlu1 %3463 }
 0x38d   : > { %v3586_v24 = vsel %vm2770_vm4, %v3464_v43, %v8907_v46 }
 0x390   : > { %v3472_v59 = vpop.permute.xlu1 %3471 }
 0x391   : > { %v8204_v23 = vsel %vm2783_vm6, %v3586_v24, %v3472_v59 }
 0x3cf   : > { %v5801_v5 = vpop.f32.mrb[8].mxu0 }
 0x3d0   : > { %v5802_v51 = vpop.f32.mrb[9].mxu0 }
 0x3d1   : > { %v5803_v33 = vadd.f32 %v5802_v51, %v5801_v5  ;;  %v5804_v29 = vpop.f32.mrb[10].mxu0 }
 0x3d2   : > { %v5805_v34 = vpop.f32.mrb[11].mxu0 }
 0x3d3   : > { %v5806_v61 = vadd.f32 %v5805_v34, %v5804_v29 }
 0x3d7   : > { %v5807_v48 = vpop.f32.mrb[12].mxu0 }
 0x3d8   : > { %v5808_v8 = vpop.f32.mrb[13].mxu0 }
 0x3d9   : > { %v5809_v13 = vadd.f32 %v5808_v8, %v5807_v48  ;;  %v5810_v7 = vpop.f32.mrb[14].mxu0 }
 0x3da   : > { %v5811_v55 = vpop.f32.mrb[15].mxu0 }
 0x3db   : > { %v5812_v37 = vadd.f32 %v5811_v55, %v5810_v7 }
 0x3fa   : > { %v5813_v20 = vpop.f32.mrb[16].mxu0 }
 0x3fb   : > { %v5814_v30 = vpop.f32.mrb[17].mxu0 }
 0x3fc   : > { %v5815_v11 = vadd.f32 %v5814_v30, %v5813_v20  ;;  %v5816_v40 = vpop.f32.mrb[18].mxu0  ;;  %v8909_v20 = vld [vmem:[#allocation45_spill] sm:$0xff] }
 0x3fd   : > { %v5817_v47 = vpop.f32.mrb[19].mxu0 }
 0x3fe   : > { %v5818_v54 = vadd.f32 %v5817_v47, %v5816_v40 }
 0x402   : > { %v5819_v57 = vpop.f32.mrb[20].mxu0 }
 0x403   : > { %v5820_v15 = vpop.f32.mrb[21].mxu0 }
 0x404   : > { %v5821_v18 = vadd.f32 %v5820_v15, %v5819_v57  ;;  %v5822_v26 = vpop.f32.mrb[22].mxu0 }
 0x405   : > { %v5823_v19 = vpop.f32.mrb[23].mxu0 }
 0x406   : > { %v5824_v60 = vadd.f32 %v5823_v19, %v5822_v26 }
 0x42d   : > { %v6025_v62 = vpop.f32.mrb[24].mxu0 }
 0x42e   : > { %v6223_v39 = vadd.f32 %v6025_v62, %v5809_v13  ;;  %v3245_v22 = vpop.f32.mrb[25].mxu0  ;;  %v8911_v62 = vld [vmem:[#allocation46_spill] sm:$0xff] }
 0x42f   : > { %v6224_v28 = vadd.f32 %v5803_v33, %v3245_v22  ;;  %v6026_v38 = vpop.f32.mrb[26].mxu0 }
 0x430   : > { %v6225_v43 = vadd.f32 %v6026_v38, %v5812_v37  ;;  %v3248_v46 = vpop.f32.mrb[27].mxu0  ;;  %v3282_v24 = vsel %vm498_vm0, %v6223_v39, -inf  ;;  %v8908_v37 = vld [vmem:[#allocation47_spill] sm:$0xff] }
 0x431   : > { %v6226_v59 = vadd.f32 %v5806_v61, %v3248_v46  ;;  %3283 = vmax.xlane.f32.xlu0 %v3282_v24  ;;  %v3276_v5 = vsel %vm498_vm0, %v6224_v28, -inf }
 0x432   : > { %3277 = vmax.xlane.f32.xlu1 %v3276_v5  ;;  %v3285_v51 = vsel %vm498_vm0, %v6225_v43, -inf }
 0x433   : > { %v3279_v55 = vsel %vm498_vm0, %v6226_v59, -inf }
 0x435   : > { %3286 = vmax.xlane.f32.xlu0 %v3285_v51  ;;  %v6029_v29 = vpop.f32.mrb[28].mxu0 }
 0x436   : > { %v8209_v34 = vadd.f32 %v6029_v29, %v5821_v18  ;;  %v3261_v48 = vpop.f32.mrb[29].mxu0 }
 0x437   : > { %v8211_v8 = vadd.f32 %v5815_v11, %v3261_v48  ;;  %v6030_v33 = vpop.f32.mrb[30].mxu0 }
 0x438   : > { %v8213_v13 = vadd.f32 %v6030_v33, %v5824_v60  ;;  %v3264_v7 = vpop.f32.mrb[31].mxu0  ;;  %v3294_v18 = vsel %vm498_vm0, %v8209_v34, -inf  ;;  %v8910_v60 = vld [vmem:[#allocation48_spill] sm:$0xff] }
 0x439   : > { %v8216_v61 = vadd.f32 %v5818_v54, %v3264_v7  ;;  %3280 = vmax.xlane.f32.xlu0 %v3279_v55  ;;  %v3288_v54 = vsel %vm498_vm0, %v8211_v8, -inf }
 0x43a   : > { %v3297_v26 = vsel %vm498_vm0, %v8213_v13, -inf }
 0x43b   : > { %v3291_v19 = vsel %vm498_vm0, %v8216_v61, -inf }
 0x443   : > { %3487 = vrot.lane.b32.xlu1 %v8908_v37, %s8904_s27  ;;  %v8916_v37 = vld [vmem:[#allocation31_spill] sm:$0xff] }
 0x44f   : > { %3535 = vrot.lane.b32.xlu0 %v8909_v20, %s6627_s24 }
 0x45a   : > { %v5865_v30 = vpop.f32.mrb[32].mxu0 }
 0x45b   : > { %v5866_v40 = vpop.f32.mrb[33].mxu0 }
 0x45c   : > { %v8222_v47 = vadd.f32 %v5866_v40, %v5865_v30  ;;  %v5868_v11 = vpop.f32.mrb[34].mxu0 }
 0x45d   : > { %v5869_v57 = vpop.f32.mrb[35].mxu0 }
 0x45e   : > { %v8224_v15 = vadd.f32 %v5869_v57, %v5868_v11 }
 0x467   : > { %3295 = vmax.xlane.f32.xlu1 %v3294_v18 }
 0x46b   : > { %3289 = vmax.xlane.f32.xlu1 %v3288_v54 }
 0x46e   : > { %3298 = vmax.xlane.f32.xlu0 %v3297_v26 }
 0x472   : > { %3292 = vmax.xlane.f32.xlu0 %v3291_v19 }
 0x47c   : > { %3553 = vrot.lane.b32.xlu1 %v7717_v45, %s8840_s29  ;;  %v8914_v45 = vld [vmem:[#allocation33_spill] sm:$0xff] }
 0x480   : > { %3495 = vrot.lane.b32.xlu1 %v8910_v60, %s8905_s13 }
 0x484   : > { %3563 = vrot.lane.b32.xlu1 %v7848_v50, %s6633_s20  ;;  %v3528_v50 = vpop.permute.xlu0 %3527 }
 0x488   : > { %3543 = vrot.lane.b32.xlu0 %v8911_v62, %s6629_s18  ;;  %3571 = vrot.lane.b32.xlu1 %v7862_v2, %s6634_s28  ;;  %v3480_v2 = vpop.permute.xlu1 %3479 }
 0x48c   : > { %3561 = vrot.lane.b32.xlu0 %v7834_v3, %s6633_s20  ;;  %3579 = vrot.lane.b32.xlu1 %v7876_v14, %s8912_s17  ;;  %s8915_s20 = smov 120  }
 0x490   : > { %3555 = vrot.lane.b32.xlu0 %v7759_v4, %s8840_s29  ;;  %s8917_s29 = smov 108  }
 0x494   : > { %3569 = vrot.lane.b32.xlu0 %v7851_v36, %s6634_s28 }
 0x498   : > { %3577 = vrot.lane.b32.xlu0 %v7865_v25, %s8912_s17 }
 0x49c   : > { %3505 = vrot.lane.b32.xlu0 %v8914_v45, %s8913_s26 }
 0x4be   : > { %v3284_v22 = vpop.xlane.xlu0 %3283 }
 0x4bf   : > { %v3302_v38 = vsub.f32 %v6223_v39, %v3284_v22  ;;  %v3278_v3 = vpop.xlane.xlu1 %3277 }
 0x4c0   : > { %v3300_v46 = vsub.f32 %v6224_v28, %v3278_v3 }
 0x4c1   : > { %v3312_v24 = vmul.f32 1.442695, %v3302_v38 }
 0x4c2   : > { %v3308_v14 = vmul.f32 1.442695, %v3300_v46  ;;  %v3287_v5 = vpop.xlane.xlu0 %3286 }
 0x4c3   : > { %6507 = vpow2.f32 %v3312_v24  ;;  %v3303_v4 = vsub.f32 %v6225_v43, %v3287_v5  ;;  %v3488_v20 = vpop.permute.xlu1 %3487 }
 0x4c4   : > { %6509 = vpow2.f32 %v3308_v14 }
 0x4c5   : > { %v3314_v51 = vmul.f32 1.442695, %v3303_v4 }
 0x4c6   : > { %v3281_v36 = vpop.xlane.xlu0 %3280 }
 0x4c7   : > { %6511 = vpow2.f32 %v3314_v51  ;;  %v3301_v29 = vsub.f32 %v6226_v59, %v3281_v36 }
 0x4c9   : > { %v3310_v25 = vmul.f32 1.442695, %v3301_v29 }
 0x4ca   : > { %v3536_v11 = vpop.permute.xlu0 %3535 }
 0x4cb   : > { %6513 = vpow2.f32 %v3310_v25 }
 0x4cd   : > { %v8256_v48 = vpop.eup %6507 }
 0x4ce   : > { %v3330_v33 = vsel %vm498_vm0, %v8256_v48, 0.0  ;;  %v8260_v39 = vpop.eup %6509 }
 0x4cf   : > { %3331 = vadd.xlane.f32.xlu1 %v3330_v33  ;;  %v3324_v43 = vsel %vm498_vm0, %v8260_v39, 0.0 }
 0x4d1   : > { %v8262_v28 = vpop.eup %6511 }
 0x4d2   : > { %v3333_v7 = vsel %vm498_vm0, %v8262_v28, 0.0 }
 0x4d3   : > { %3325 = vadd.xlane.f32.xlu1 %v3324_v43  ;;  %3334 = vadd.xlane.f32.xlu0 %v3333_v7 }
 0x4d5   : > { %v8268_v59 = vpop.eup %6513 }
 0x4d6   : > { %v3327_v55 = vsel %vm498_vm0, %v8268_v59, 0.0 }
 0x4d7   : > { %3328 = vadd.xlane.f32.xlu0 %v3327_v55 }
 0x4e4   : > { %3513 = vrot.lane.b32.xlu1 %v8916_v37, %s8915_s20 }
 0x4f4   : > { %v3296_v30 = vpop.xlane.xlu1 %3295 }
 0x4f5   : > { %v3306_v40 = vsub.f32 %v8209_v34, %v3296_v30  ;;  %v3604_v34 = vsel %vm2792_vm8, %v8204_v23, %v3480_v2 }
 0x4f6   : > { %v3612_v46 = vsel %vm2801_vm10, %v3604_v34, %v3488_v20  ;;  %v8932_v34 = vld [vmem:[#allocation4_spill] sm:$0xff] }
 0x4f7   : > { %v3320_v57 = vmul.f32 1.442695, %v3306_v40 }
 0x4f8   : > { %v3290_v18 = vpop.xlane.xlu1 %3289 }
 0x4f9   : > { %6515 = vpow2.f32 %v3320_v57  ;;  %v3304_v54 = vsub.f32 %v8211_v8, %v3290_v18  ;;  %v3656_v8 = vsel %vm2850_vm7, %v8199_v41, %v3528_v50 }
 0x4fb   : > { %v3316_v26 = vmul.f32 1.442695, %v3304_v54  ;;  %v3299_v19 = vpop.xlane.xlu0 %3298  ;;  %v8919_v54 = vld [vmem:[#allocation5_spill] sm:$0xff] }
 0x4fc   : > { %v3307_v60 = vsub.f32 %v8213_v13, %v3299_v19  ;;  %v8277_v62 = vpop.permute.xlu1 %3553  ;;  %v3664_v13 = vsel %vm2859_vm9, %v3656_v8, %v3536_v11  ;;  %v8922_v19 = vld [vmem:[#allocation7_spill] sm:$0xff]  ;;  %v8934_v8 = vld [vmem:[#allocation30_spill] sm:$0xff] }
 0x4fd   : > { %6517 = vpow2.f32 %v3316_v26  ;;  %v8921_v26 = vld [vmem:[#allocation3_spill] sm:$0xff] }
 0x4fe   : > { %v3322_v45 = vmul.f32 1.442695, %v3307_v60  ;;  %v8924_v60 = vld [vmem:[#allocation8_spill] sm:$0xff] }
 0x4ff   : > { %v3293_v22 = vpop.xlane.xlu0 %3292 }
 0x500   : > { %6519 = vpow2.f32 %v3322_v45  ;;  %v3305_v38 = vsub.f32 %v8216_v61, %v3293_v22  ;;  %v3496_v3 = vpop.permute.xlu1 %3495  ;;  %v8926_v45 = vld [vmem:[#allocation35_spill] sm:$0xff] }
 0x501   : > { %v3620_v5 = vsel %vm2810_vm12, %v3612_v46, %v3496_v3  ;;  %v8929_v22 = vld [vmem:[#allocation39_spill] sm:$0xff]  ;;  %v8931_v3 = vld [vmem:[#allocation26_spill] sm:$0xff]  ;;  %v8933_v46 = vld [vmem:[#allocation29_spill] sm:$0xff] }
 0x502   : > { %v3318_v24 = vmul.f32 1.442695, %v3305_v38  ;;  %v3629_v41 = vsel %vm2819_vm14, %v3620_v5, %v8185_v58  ;;  %v8930_v38 = vld [vmem:[#allocation36_spill] sm:$0xff] }
 0x503   : > { %v8285_v14 = vpop.eup %6515  ;;  %v3544_v4 = vpop.permute.xlu0 %3543  ;;  %v8937_v5 = vld [vmem:[#allocation24_spill] sm:$0xff] }
 0x504   : > { %6521 = vpow2.f32 %v3318_v24  ;;  %v3672_v61 = vsel %vm2868_vm11, %v3664_v13, %v3544_v4  ;;  %v3342_v51 = vsel %vm498_vm0, %v8285_v14, 0.0  ;;  %v3564_v2 = vpop.permute.xlu1 %3563  ;;  %v8935_v24 = vld [vmem:[#allocation23_spill] sm:$0xff]  ;;  %v8938_v4 = vld [vmem:[#allocation28_spill] sm:$0xff] }
 0x505   : > { %3343 = vadd.xlane.f32.xlu0 %v3342_v51  ;;  %v3681_v23 = vsel %vm2877_vm13, %v3672_v61, %v8130_v44  ;;  %v8936_v13 = vld [vmem:[#allocation19_spill] sm:$0xff]  ;;  %v8939_v61 = vld [vmem:[#allocation34_spill] sm:$0xff] }
 0x506   : > { %3761 = vmatprep.mubr.bf16.mxu0 %v3681_v23  ;;  %v8940_v51 = vld [vmem:[#allocation27_spill] sm:$0xff] }
 0x507   : > { %v8296_v50 = vpop.eup %6517  ;;  %3762 = vmatmul.mubr.bf16.gmra.mrb[36].mxu0 %v3629_v41  ;;  %v3562_v36 = vpop.permute.xlu0 %3561 }
 0x508   : > { %v3336_v29 = vsel %vm498_vm0, %v8296_v50, 0.0  ;;  %v3572_v7 = vpop.permute.xlu1 %3571  ;;  %v3694_v20 = vsel %vm2890_vm15, %v8277_v62, %v3562_v36 }
 0x509   : > { %3337 = vadd.xlane.f32.xlu1 %v3336_v29 }
 0x50a   : > { %v8300_v25 = vpop.eup %6519 }
 0x50b   : > { %v8302_v33 = vpop.permute.xlu0 %3555  ;;  %v3345_v43 = vsel %vm498_vm0, %v8300_v25, 0.0 }
 0x50c   : > { %v3696_v55 = vsel %vm2890_vm15, %v8302_v33, %v3564_v2  ;;  %3346 = vadd.xlane.f32.xlu0 %v3345_v43  ;;  %v8371_v23 = vpop.permute.xlu1 %3579 }
 0x50d   : > { %v8309_v58 = vsel %vm2899_vm2, %v3696_v55, %v3572_v7 }
 0x50e   : > { %v8311_v37 = vpop.eup %6521 }
 0x50f   : > { %v3570_v30 = vpop.permute.xlu0 %3569  ;;  %v3339_v40 = vsel %vm498_vm0, %v8311_v37, 0.0 }
 0x510   : > { %v3702_v11 = vsel %vm2899_vm2, %v3694_v20, %v3570_v30  ;;  %3340 = vadd.xlane.f32.xlu0 %v3339_v40 }
 0x513   : > { %v3578_v57 = vpop.permute.xlu0 %3577 }
 0x514   : > { %v8319_v18 = vsel %vm2908_vm1, %v3702_v11, %v3578_v57 }
 0x51a   : > { %3465 = vrot.lane.b32.xlu1 %v8041_v27, %s8917_s29  ;;  %v8927_v27 = vld [vmem:[#allocation21_spill] sm:$0xff] }
 0x51e   : > { %3473 = vrot.lane.b32.xlu1 %v8919_v54, %s8918_s19 }
 0x522   : > { %3481 = vrot.lane.b32.xlu1 %v8921_v26, %s8920_s15 }
 0x526   : > { %3489 = vrot.lane.b32.xlu1 %v8922_v19, %s8904_s27  ;;  %3865 = vrot.lane.b32.xlu0 %v7319_v35, %s8923_s16  ;;  %v6587_v19 = vld [vmem:[%s8729_s5 + $0x80] sm:$0xff]  }
 0x52a   : > { %3497 = vrot.lane.b32.xlu1 %v8924_v60, %s8905_s13  ;;  %3521 = vrot.lane.b32.xlu0 %v8926_v45, %s8925_s30 }
 0x52e   : > { %3507 = vrot.lane.b32.xlu1 %v8927_v27, %s8913_s26  ;;  %3529 = vrot.lane.b32.xlu0 %v8929_v22, %s8928_s25 }
 0x532   : > { %3853 = vrot.lane.b32.xlu1 %v7220_v31, %s8917_s29  ;;  %3537 = vrot.lane.b32.xlu0 %v8930_v38, %s6627_s24 }
 0x536   : > { %3523 = vrot.lane.b32.xlu1 %v8931_v3, %s8925_s30  ;;  %3545 = vrot.lane.b32.xlu0 %v8932_v34, %s6629_s18 }
 0x53a   : > { %3531 = vrot.lane.b32.xlu1 %v8933_v46, %s8928_s25  ;;  %3851 = vrot.lane.b32.xlu0 %v7222_v21, %s8917_s29 }
 0x53e   : > { %3539 = vrot.lane.b32.xlu1 %v8934_v8, %s6627_s24  ;;  %3515 = vrot.lane.b32.xlu0 %v8935_v24, %s8915_s20 }
 0x542   : > { %3547 = vrot.lane.b32.xlu1 %v8936_v13, %s6629_s18  ;;  %3467 = vrot.lane.b32.xlu0 %v8057_v1, %s8917_s29  ;;  %v8373_v1 = vpop.permute.xlu0 %3505 }
 0x546   : > { %3855 = vrot.lane.b32.xlu1 %v7331_v0, %s8917_s29  ;;  %3475 = vrot.lane.b32.xlu0 %v8937_v5, %s8918_s19 }
 0x54a   : > { %3483 = vrot.lane.b32.xlu0 %v8938_v4, %s8920_s15 }
 0x54e   : > { %3491 = vrot.lane.b32.xlu0 %v8939_v61, %s8904_s27  ;;  %s8943_s27 = smov 44  }
 0x552   : > { %3499 = vrot.lane.b32.xlu0 %v8940_v51, %s8905_s13  ;;  %s8979_s13 = sshll.u32 %s8981_s22, 6 }
 0x553   : > { %s8696_s26 = scalar_lea.vmem %s8736_s12, %s8979_s13 }
 0x556   : > { %3857 = vrot.lane.b32.xlu0 %v7319_v35, %s8917_s29 }
 0x55c   : > { %v3332_v2 = vpop.xlane.xlu1 %3331 }
 0x560   : > { %v3326_v41 = vpop.xlane.xlu1 %3325  ;;  %v3335_v36 = vpop.xlane.xlu0 %3334 }
 0x561   : > { %6523 = vrcp.f32 %v3335_v36 }
 0x562   : > { %6525 = vrcp.f32 %v3326_v41 }
 0x563   : > { %6527 = vrcp.f32 %v3332_v2  ;;  %v3690_v2 = vsel %vm2890_vm15, %v8110_v32, %v8121_v16  ;;  %v3692_v32 = vsel %vm2890_vm15, %v8130_v44, %v8102_v42 }
 0x564   : > { %v3329_v29 = vpop.xlane.xlu0 %3328  ;;  %v3698_v36 = vsel %vm2899_vm2, %v3690_v2, %v8142_v53 }
 0x565   : > { %6529 = vrcp.f32 %v3329_v29  ;;  %v8941_v29 = vld [vmem:[#allocation15_spill] sm:$0xff] }
 0x56b   : > { %v6524_v43 = vpop.eup %6523 }
 0x56c   : > { %v6526_v7 = vpop.eup %6525  ;;  %v3359_v30 = vmul.f32 %v6524_v43, %v8262_v28 }
 0x56d   : > { %v6528_v55 = vpop.eup %6527  ;;  %v3356_v40 = vmul.f32 %v6526_v7, %v8260_v39 }
 0x56e   : > { %v3358_v57 = vmul.f32 %v6528_v55, %v8256_v48  ;;  %v3514_v48 = vpop.permute.xlu1 %3513 }
 0x56f   : > { %v6530_v20 = vpop.eup %6529 }
 0x570   : > { %v3357_v11 = vmul.f32 %v6530_v20, %v8268_v59  ;;  %v3365_v26 = vpack.c.bf16 %v3359_v30, %v3358_v57 }
 0x572   : > { %v3364_v54 = vpack.c.bf16 %v3357_v11, %v3356_v40  ;;  %v3700_v11 = vsel %vm2899_vm2, %v3692_v32, %v8105_v52 }
 0x574   : > { %6039 = vmatprep.mubr.msk.bf16.mxu1 %vm498_vm0, %v3364_v54 }
 0x575   : > { %6040 = vmatmul.mubr.msk.bf16.vlgmr.msra.gmra.mrb[8].mxu1 %vm498_vm0, %v3365_v26  ;;  %v3708_v26 = vsel %vm2908_vm1, %v3700_v11, %v8112_v12  ;;  %v3712_v12 = vsel %vm2908_vm1, %v8309_v58, %v8371_v23 }
 0x576   : > { %6048 = vmatpush3.bf16.msra.mxu1 %v6587_v19 }
 0x577   : > { %6049 = vmatprep.subr.bf16.mxu1 %v7964_v63 }
 0x57a   : > { %6050 = vmatpush3.bf16.msra.mxu1 %v7964_v63 }
 0x57b   : > { %6051 = vmatprep.subr.bf16.mxu1 %v7989_v17 }
 0x57e   : > { %6052 = vmatpush3.bf16.msra.mxu1 %v7989_v17 }
 0x57f   : > { %6053 = vmatprep.subr.bf16.mxu1 %v8005_v6 }
 0x582   : > { %6054 = vmatpush3.bf16.msra.mxu1 %v8005_v6 }
 0x583   : > { %6331 = vmatprep.subr.msk.bf16.mxu1 %vm2770_vm4, %v8158_v56 }
 0x592   : > { %v3344_v39 = vpop.xlane.xlu0 %3343 }
 0x596   : > { %v3338_v28 = vpop.xlane.xlu1 %3337 }
 0x599   : > { %v3347_v59 = vpop.xlane.xlu0 %3346 }
 0x59a   : > { %v3466_v60 = vpop.permute.xlu1 %3465  ;;  %6531 = vrcp.f32 %v3347_v59 }
 0x59b   : > { %6533 = vrcp.f32 %v3338_v28 }
 0x59c   : > { %6535 = vrcp.f32 %v3344_v39 }
 0x59d   : > { %v3341_v63 = vpop.xlane.xlu0 %3340 }
 0x59e   : > { %6537 = vrcp.f32 %v3341_v63  ;;  %v3474_v45 = vpop.permute.xlu1 %3473 }
 0x5a1   : > { %v8392_v27 = vpop.permute.xlu0 %3865 }
 0x5a2   : > { %v3482_v17 = vpop.permute.xlu1 %3481 }
 0x5a4   : > { %v6532_v22 = vpop.eup %6531 }
 0x5a5   : > { %v3522_v38 = vpop.permute.xlu0 %3521  ;;  %v6534_v6 = vpop.eup %6533  ;;  %v3363_v8 = vmul.f32 %v6532_v22, %v8300_v25  ;;  %v3589_v25 = vsel %vm2770_vm4, %v3466_v60, %v8941_v29 }
 0x5a6   : > { %v3490_v3 = vpop.permute.xlu1 %3489  ;;  %v6536_v34 = vpop.eup %6535  ;;  %v3360_v13 = vmul.f32 %v6534_v6, %v8296_v50  ;;  %v3598_v43 = vsel %vm2783_vm6, %v3589_v25, %v3474_v45  ;;  %v8942_v6 = vld [vmem:[#allocation25_spill] sm:$0xff] }
 0x5a7   : > { %v3362_v61 = vmul.f32 %v6536_v34, %v8285_v14  ;;  %v3642_v14 = vsel %vm2832_vm3, %v8373_v1, %v3514_v48  ;;  %v3606_v16 = vsel %vm2792_vm8, %v3598_v43, %v3482_v17  ;;  %v3880_v48 = vsel %vm2770_vm4, %v8158_v56, 0 }
 0x5a8   : > { %v6538_v46 = vpop.eup %6537  ;;  %v3650_v53 = vsel %vm2841_vm5, %v3642_v14, %v3522_v38 }
 0x5a9   : > { %v3530_v24 = vpop.permute.xlu0 %3529  ;;  %v3361_v5 = vmul.f32 %v6538_v46, %v8311_v37  ;;  %v3367_v41 = vpack.c.bf16 %v3363_v8, %v3362_v61  ;;  %v3706_v37 = vsel %vm2908_vm1, %v3698_v36, %v8150_v10  ;;  %v3614_v10 = vsel %vm2801_vm10, %v3606_v16, %v3490_v3 }
 0x5aa   : > { %v3498_v4 = vpop.permute.xlu1 %3497  ;;  %v3658_v55 = vsel %vm2850_vm7, %v3650_v53, %v3530_v24  ;;  %v3889_v24 = vsel %vm2770_vm4, %v8392_v27, 0  ;;  %vm8944_vm1 = vcmask 130048  }
 0x5ab   : > { %v3366_v51 = vpack.c.bf16 %v3361_v5, %v3360_v13  ;;  %v3622_v20 = vsel %vm2810_vm12, %v3614_v10, %v3498_v4  ;;  %vm8957_vm2 = vmmov %vm8944_vm1 }
 0x5ac   : > { %v3632_v54 = vsel %vm2819_vm14, %v3622_v20, %v8373_v1 }
 0x5ad   : > { %6043 = vmatprep.mubr.msk.bf16.mxu1 %vm498_vm0, %v3366_v51  ;;  %v3538_v50 = vpop.permute.xlu0 %3537 }
 0x5ae   : > { %v3508_v7 = vpop.permute.xlu1 %3507  ;;  %6044 = vmatmul.mubr.msk.bf16.gmra.mrb[12].mxu1 %vm498_vm0, %v3367_v41  ;;  %v3666_v30 = vsel %vm2859_vm9, %v3658_v55, %v3538_v50 }
 0x5af   : > { %6055 = vmatprep.mubr.msk.bf16.mxu1 %vm498_vm0, %v3706_v37 }
 0x5b1   : > { %v3546_v40 = vpop.permute.xlu0 %3545 }
 0x5b2   : > { %v3674_v42 = vsel %vm2868_vm11, %v3666_v30, %v3546_v40  ;;  %v3854_v44 = vpop.permute.xlu1 %3853 }
 0x5b3   : > { %v3684_v57 = vsel %vm2877_vm13, %v3674_v42, %v8277_v62 }
 0x5b4   : > { %3769 = vmatprep.mubr.bf16.mxu0 %v3684_v57 }
 0x5b5   : > { %3770 = vmatmul.mubr.bf16.gmra.mrb[40].mxu0 %v3632_v54  ;;  %v3852_v19 = vpop.permute.xlu0 %3851 }
 0x5b6   : > { %v3524_v39 = vpop.permute.xlu1 %3523  ;;  %6056 = vmatmul.mubr.msk.bf16.vlgmr.msra.gmra.mrb[16].mxu1 %vm498_vm0, %v3708_v26 }
 0x5b7   : > { %6064 = vmatpush3.bf16.xpose.msra.mxu1 %v3880_v48  ;;  %6059 = vmatprep.mubr.msk.bf16.mxu1 %vm498_vm0, %v8319_v18  ;;  %v3883_v18 = vsel %vm2770_vm4, %v8132_v49, 0 }
 0x5b8   : > { %6332 = vmatprep.subr.msk.bf16.mxu1 %vm2770_vm4, %v8132_v49  ;;  %v3886_v49 = vsel %vm2770_vm4, %v8190_v9, 0 }
 0x5b9   : > { %v3516_v52 = vpop.permute.xlu0 %3515 }
 0x5ba   : > { %v3532_v62 = vpop.permute.xlu1 %3531  ;;  %v3644_v1 = vsel %vm2832_vm3, %v3508_v7, %v3516_v52  ;;  %vm8945_vm3 = vmmov %vm8944_vm1 }
 0x5bb   : > { %v3652_v56 = vsel %vm2841_vm5, %v3644_v1, %v3524_v39  ;;  %vm8947_vm5 = vmmov %vm8944_vm1 }
 0x5bc   : > { %v3660_v60 = vsel %vm2850_vm7, %v3652_v56, %v3532_v62  ;;  %vm8949_vm7 = vmmov %vm8944_vm1 }
 0x5bd   : > { %v3468_v28 = vpop.permute.xlu0 %3467 }
 0x5be   : > { %v3540_v59 = vpop.permute.xlu1 %3539  ;;  %6060 = vmatmul.mubr.msk.bf16.gmra.mrb[20].mxu1 %vm498_vm0, %v3712_v12  ;;  %v3592_v3 = vsel %vm2770_vm4, %v3468_v28, %v8942_v6 }
 0x5bf   : > { %6066 = vmatpush3.bf16.xpose.msra.mxu1 %v3883_v18  ;;  %6071 = vmatprep.mubr.msk.bf16.mxu1 %vm2770_vm4, %v3852_v19  ;;  %v3668_v58 = vsel %vm2859_vm9, %v3660_v60, %v3540_v59  ;;  %vm8951_vm9 = vmmov %vm8944_vm1 }
 0x5c0   : > { %6333 = vmatprep.subr.msk.bf16.mxu1 %vm2770_vm4, %v8190_v9 }
 0x5c1   : > { %v3476_v63 = vpop.permute.xlu0 %3475 }
 0x5c2   : > { %v3548_v23 = vpop.permute.xlu1 %3547  ;;  %v3600_v34 = vsel %vm2783_vm6, %v3592_v3, %v3476_v63  ;;  %vm8948_vm6 = vmmov %vm8944_vm1 }
 0x5c3   : > { %v3676_v45 = vsel %vm2868_vm11, %v3668_v58, %v3548_v23  ;;  %vm8953_vm11 = vmmov %vm8944_vm1 }
 0x5c4   : > { %v3687_v17 = vsel %vm2877_vm13, %v3676_v45, %v8302_v33  ;;  %vm8955_vm13 = vmmov %vm8944_vm1 }
 0x5c5   : > { %3777 = vmatprep.mubr.bf16.mxu0 %v3687_v17  ;;  %v3484_v22 = vpop.permute.xlu0 %3483 }
 0x5c6   : > { %v3608_v46 = vsel %vm2792_vm8, %v3600_v34, %v3484_v22  ;;  %v3856_v5 = vpop.permute.xlu1 %3855  ;;  %vm8950_vm8 = vmmov %vm8944_vm1 }
 0x5c7   : > { %6068 = vmatpush3.bf16.xpose.msra.mxu1 %v3886_v49 }
 0x5c8   : > { %6334 = vmatprep.subr.msk.bf16.mxu1 %vm2770_vm4, %v8392_v27 }
 0x5c9   : > { %v3492_v38 = vpop.permute.xlu0 %3491 }
 0x5ca   : > { %v3616_v8 = vsel %vm2801_vm10, %v3608_v46, %v3492_v38  ;;  %vm8952_vm10 = vmmov %vm8944_vm1 }
 0x5cd   : > { %v3500_v33 = vpop.permute.xlu0 %3499 }
 0x5ce   : > { %v3624_v9 = vsel %vm2810_vm12, %v3616_v8, %v3500_v33  ;;  %vm8954_vm12 = vmmov %vm8944_vm1 }
 0x5cf   : > { %6070 = vmatpush3.bf16.xpose.msra.mxu1 %v3889_v24  ;;  %v3635_v13 = vsel %vm2819_vm14, %v3624_v9, %v3508_v7  ;;  %vm8956_vm14 = vmmov %vm8944_vm1 }
 0x5d0   : > { %3778 = vmatmul.mubr.bf16.gmra.mrb[44].mxu0 %v3635_v13 }
 0x5d1   : > { %v3858_v41 = vpop.permute.xlu0 %3857 }
 0x5d6   : > { %6072 = vmatmul.mubr.msk.bf16.vlgmr.msra.gmra.mrb[16].mxu1 %vm2770_vm4, %v3854_v44 }
 0x5d7   : > { %6075 = vmatprep.mubr.msk.bf16.mxu1 %vm2770_vm4, %v3856_v5 }
 0x5da   : > { %v5871_v4 = vpop.f32.mrb[36].mxu0 }
 0x5db   : > { %v5872_v61 = vpop.f32.mrb[37].mxu0 }
 0x5dc   : > { %v5873_v51 = vadd.f32 %v5872_v61, %v5871_v4  ;;  %v5874_v2 = vpop.f32.mrb[38].mxu0 }
 0x5dd   : > { %v5875_v36 = vpop.f32.mrb[39].mxu0 }
 0x5de   : > { %v5876_v29 = vadd.f32 %v5875_v36, %v5874_v2  ;;  %6076 = vmatmul.mubr.msk.bf16.gmra.mrb[20].mxu1 %vm2770_vm4, %v3858_v41  ;;  %vm8946_vm4 = vmmov %vm8944_vm1 }
 0x648   : > { %v8470_v27 = vpop.f32.mrb[8].mxu1 }
 0x649   : > { %v8472_v25 = vpop.f32.mrb[9].mxu1 }
 0x64a   : > { %v8474_v50 = vpop.f32.mrb[10].mxu1 }
 0x64b   : > { %v8476_v37 = vpop.f32.mrb[11].mxu1 }
 0x681   : > { %v8478_v14 = vpop.f32.mrb[12].mxu1 }
 0x682   : > { %v8480_v43 = vpop.f32.mrb[13].mxu1 }
 0x683   : > { %v8482_v7 = vpop.f32.mrb[14].mxu1 }
 0x684   : > { %v8484_v32 = vpop.f32.mrb[15].mxu1 }
 0x688   : > { %v5877_v16 = vpop.f32.mrb[40].mxu0 }
 0x689   : > { %v5878_v53 = vpop.f32.mrb[41].mxu0 }
 0x68a   : > { %v5879_v10 = vadd.f32 %v5878_v53, %v5877_v16  ;;  %v5880_v55 = vpop.f32.mrb[42].mxu0 }
 0x68b   : > { %v5881_v20 = vpop.f32.mrb[43].mxu0 }
 0x68c   : > { %v5882_v30 = vadd.f32 %v5881_v20, %v5880_v55 }
 0x6a3   : > { %v5883_v40 = vpop.f32.mrb[44].mxu0 }
 0x6a4   : > { %v5884_v11 = vpop.f32.mrb[45].mxu0 }
 0x6a5   : > { %v5885_v42 = vadd.f32 %v5884_v11, %v5883_v40  ;;  %v5886_v44 = vpop.f32.mrb[46].mxu0 }
 0x6a6   : > { %v5887_v57 = vpop.f32.mrb[47].mxu0 }
 0x6a7   : > { %v5888_v54 = vadd.f32 %v5887_v57, %v5886_v44 }
 0x6a9   : > { %v6073_v26 = vpop.f32.mrb[16].mxu1 }
 0x6aa   : > { %v6231_v19 = vadd.f32 %v6073_v26, %v5873_v51  ;;  %v3925_v48 = vpop.f32.mrb[17].mxu1 }
 0x6ab   : > { %v6232_v39 = vadd.f32 %v8222_v47, %v3925_v48  ;;  %v6074_v52 = vpop.f32.mrb[18].mxu1 }
 0x6ac   : > { %v6233_v62 = vadd.f32 %v6074_v52, %v5876_v29  ;;  %v3928_v1 = vpop.f32.mrb[19].mxu1  ;;  %v3962_v12 = vsel %vm498_vm0, %v6231_v19, -inf }
 0x6ad   : > { %v6234_v28 = vadd.f32 %v8224_v15, %v3928_v1  ;;  %3963 = vmax.xlane.f32.xlu0 %v3962_v12  ;;  %v3956_v56 = vsel %vm498_vm0, %v6232_v39, -inf }
 0x6ae   : > { %3957 = vmax.xlane.f32.xlu1 %v3956_v56  ;;  %v3965_v17 = vsel %vm498_vm0, %v6233_v62, -inf }
 0x6af   : > { %v3959_v59 = vsel %vm498_vm0, %v6234_v28, -inf }
 0x6b1   : > { %3960 = vmax.xlane.f32.xlu0 %v3959_v59  ;;  %v6077_v18 = vpop.f32.mrb[20].mxu1 }
 0x6b2   : > { %v6235_v60 = vadd.f32 %v6077_v18, %v5885_v42  ;;  %v3941_v63 = vpop.f32.mrb[21].mxu1 }
 0x6b3   : > { %v6236_v58 = vadd.f32 %v5879_v10, %v3941_v63  ;;  %v6078_v23 = vpop.f32.mrb[22].mxu1 }
 0x6b4   : > { %v6237_v47 = vadd.f32 %v6078_v23, %v5888_v54  ;;  %v3944_v45 = vpop.f32.mrb[23].mxu1  ;;  %v3974_v38 = vsel %vm498_vm0, %v6235_v60, -inf }
 0x6b5   : > { %v6238_v22 = vadd.f32 %v5882_v30, %v3944_v45  ;;  %3966 = vmax.xlane.f32.xlu0 %v3965_v17  ;;  %v3968_v15 = vsel %vm498_vm0, %v6236_v58, -inf }
 0x6b6   : > { %3969 = vmax.xlane.f32.xlu1 %v3968_v15  ;;  %v3977_v6 = vsel %vm498_vm0, %v6237_v47, -inf }
 0x6b7   : > { %v3971_v49 = vsel %vm498_vm0, %v6238_v22, -inf }
 0x6b9   : > { %3972 = vmax.xlane.f32.xlu0 %v3971_v49 }
 0x6ba   : > { %3975 = vmax.xlane.f32.xlu1 %v3974_v38 }
 0x6bd   : > { %3978 = vmax.xlane.f32.xlu0 %v3977_v6 }
 0x6cb   : > { %4048 = vrot.lane.b32.xlu1 %v7222_v21, %s8943_s27 }
 0x73a   : > { %v3964_v3 = vpop.xlane.xlu0 %3963 }
 0x73b   : > { %v3982_v34 = vsub.f32 %v6231_v19, %v3964_v3  ;;  %v3958_v46 = vpop.xlane.xlu1 %3957 }
 0x73c   : > { %v3980_v8 = vsub.f32 %v6232_v39, %v3958_v46 }
 0x73d   : > { %v3992_v33 = vmul.f32 1.442695, %v3982_v34 }
 0x73e   : > { %v3988_v24 = vmul.f32 1.442695, %v3980_v8  ;;  %v3961_v9 = vpop.xlane.xlu0 %3960 }
 0x73f   : > { %6539 = vpow2.f32 %v3992_v33  ;;  %v3981_v13 = vsub.f32 %v6234_v28, %v3961_v9 }
 0x740   : > { %6541 = vpow2.f32 %v3988_v24 }
 0x741   : > { %v3990_v51 = vmul.f32 1.442695, %v3981_v13 }
 0x742   : > { %v3967_v5 = vpop.xlane.xlu0 %3966 }
 0x743   : > { %v3983_v4 = vsub.f32 %v6233_v62, %v3967_v5  ;;  %v3970_v61 = vpop.xlane.xlu1 %3969 }
 0x744   : > { %v3984_v41 = vsub.f32 %v6236_v58, %v3970_v61 }
 0x745   : > { %v3994_v2 = vmul.f32 1.442695, %v3983_v4  ;;  %v6498_v4 = vld [vmem:[%s8730_s6 + $0x8] sm:$0xff]  }
 0x746   : > { %v3973_v36 = vpop.xlane.xlu0 %3972  ;;  %v3996_v10 = vmul.f32 1.442695, %v3984_v41 }
 0x747   : > { %6543 = vpow2.f32 %v3994_v2  ;;  %v3976_v29 = vpop.xlane.xlu1 %3975  ;;  %v3985_v53 = vsub.f32 %v6238_v22, %v3973_v36  ;;  %v4221_v36 = vld [vmem:[#allocation2 + $0x1] sm:$0xff] }
 0x748   : > { %v3986_v21 = vsub.f32 %v6235_v60, %v3976_v29  ;;  %6545 = vpow2.f32 %v3990_v51  ;;  %v8524_v29 = vld [vmem:[#allocation2 + $0x11] sm:$0xff] }
 0x749   : > { %v8498_v16 = vpop.eup %6539  ;;  %v3998_v44 = vmul.f32 1.442695, %v3985_v53 }
 0x74a   : > { %v4000_v55 = vmul.f32 1.442695, %v3986_v21  ;;  %v3979_v20 = vpop.xlane.xlu0 %3978  ;;  %v4010_v30 = vsel %vm498_vm0, %v8498_v16, 0.0  ;;  %v6542_v40 = vpop.eup %6541 }
 0x74b   : > { %v3987_v11 = vsub.f32 %v6237_v47, %v3979_v20  ;;  %v4049_v42 = vpop.permute.xlu1 %4048  ;;  %4011 = vadd.xlane.f32.xlu1 %v4010_v30  ;;  %v4004_v54 = vsel %vm498_vm0, %v6542_v40, 0.0  ;;  %v4229_v20 = vpack.c.bf16 %v8524_v29, %v4221_v36  ;;  %v8536_v30 = vld [vmem:[#allocation2 + $0x51] sm:$0xff] }
 0x74c   : > { %6547 = vpow2.f32 %v4000_v55  ;;  %6079 = vmatprep.subr.bf16.mxu0 %v4049_v42  ;;  %6215 = vmatprep.subr.bf16.mxu1 %v4049_v42  ;;  %v6499_v55 = vld [vmem:[%s8730_s6] sm:$0xff]  }
 0x74d   : > { %v4002_v57 = vmul.f32 1.442695, %v3987_v11  ;;  %6080 = vmatpush3.bf16.msra.mxu0 %v4049_v42  ;;  %6219 = vmatpush3.bf16.msra.mxu1 %v4049_v42  ;;  %6549 = vpow2.f32 %v3996_v10  ;;  %v8544_v42 = vld [vmem:[#allocation2 + $0x41] sm:$0xff] }
 0x74f   : > { %6551 = vpow2.f32 %v4002_v57  ;;  %4005 = vadd.xlane.f32.xlu1 %v4004_v54  ;;  %v8551_v57 = vpack.c.bf16 %v8536_v30, %v8544_v42  ;;  %v4227_v54 = vld [vmem:[#allocation2 + $0x61] sm:$0xff] }
 0x750   : > { %6553 = vpow2.f32 %v3998_v44  ;;  %v6500_v44 = vld [vmem:[%s8730_s6 + $0x10] sm:$0xff]  }
 0x751   : > { %v6544_v26 = vpop.eup %6543 }
 0x752   : > { %v4013_v19 = vsel %vm498_vm0, %v6544_v26, 0.0  ;;  %v6546_v48 = vpop.eup %6545 }
 0x753   : > { %4014 = vadd.xlane.f32.xlu0 %v4013_v19  ;;  %v4007_v52 = vsel %vm498_vm0, %v6546_v48, 0.0  ;;  %v4207_v19 = vld [vmem:[#allocation2] sm:$0xff] }
 0x756   : > { %v8504_v39 = vpop.eup %6547 }
 0x757   : > { %4008 = vadd.xlane.f32.xlu0 %v4007_v52  ;;  %v4022_v62 = vsel %vm498_vm0, %v8504_v39, 0.0  ;;  %v6550_v1 = vpop.eup %6549 }
 0x758   : > { %4023 = vadd.xlane.f32.xlu1 %v4022_v62  ;;  %v4016_v59 = vsel %vm498_vm0, %v6550_v1, 0.0  ;;  %v4209_v62 = vld [vmem:[#allocation2 + $0x20] sm:$0xff] }
 0x759   : > { %v6552_v12 = vpop.eup %6551 }
 0x75a   : > { %v4025_v28 = vsel %vm498_vm0, %v6552_v12, 0.0  ;;  %v6554_v56 = vpop.eup %6553 }
 0x75b   : > { %4026 = vadd.xlane.f32.xlu0 %v4025_v28  ;;  %v4019_v18 = vsel %vm498_vm0, %v6554_v56, 0.0 }
 0x75c   : > { %4017 = vadd.xlane.f32.xlu1 %v4016_v59  ;;  %v6501_v59 = vld [vmem:[%s8730_s6 + $0x18] sm:$0xff]  }
 0x75f   : > { %4020 = vadd.xlane.f32.xlu0 %v4019_v18 }
 0x76d   : > { %4052 = vrot.lane.b32.xlu1 %v7331_v0, %s8943_s27 }
 0x771   : > { %4054 = vrot.lane.b32.xlu1 %v7319_v35, %s8943_s27 }
 0x775   : > { %4050 = vrot.lane.b32.xlu0 %v7220_v31, %s8943_s27 }
 0x7d8   : > { %v4012_v60 = vpop.xlane.xlu1 %4011 }
 0x7dc   : > { %v4006_v63 = vpop.xlane.xlu1 %4005 }
 0x7dd   : > { %6555 = vrcp.f32 %v4006_v63  ;;  %v4214_v63 = vld [vmem:[#allocation2 + $0x70] sm:$0xff] }
 0x7e0   : > { %v4015_v58 = vpop.xlane.xlu0 %4014 }
 0x7e4   : > { %v4009_v23 = vpop.xlane.xlu0 %4008 }
 0x7e5   : > { %6557 = vrcp.f32 %v4009_v23  ;;  %v4024_v47 = vpop.xlane.xlu1 %4023  ;;  %v4403_v23 = vld [vmem:[#allocation2 + $0x12] sm:$0xff] }
 0x7e6   : > { %6559 = vrcp.f32 %v4012_v60  ;;  %v4213_v60 = vld [vmem:[#allocation2 + $0x60] sm:$0xff] }
 0x7e7   : > { %6561 = vrcp.f32 %v4015_v58  ;;  %v6556_v22 = vpop.eup %6555  ;;  %v4402_v58 = vld [vmem:[#allocation2 + $0x2] sm:$0xff] }
 0x7e8   : > { %v4027_v45 = vpop.xlane.xlu0 %4026  ;;  %v4036_v49 = vmul.f32 %v6556_v22, %v6542_v40  ;;  %v8538_v40 = vld [vmem:[#allocation2 + $0x31] sm:$0xff] }
 0x7e9   : > { %v4018_v17 = vpop.xlane.xlu1 %4017  ;;  %6563 = vrcp.f32 %v4027_v45  ;;  %v4410_v45 = vpack.c.bf16 %v4403_v23, %v4402_v58  ;;  %v4405_v22 = vld [vmem:[#allocation2 + $0x32] sm:$0xff] }
 0x7ea   : > { %6565 = vrcp.f32 %v4018_v17  ;;  %v4404_v17 = vld [vmem:[#allocation2 + $0x22] sm:$0xff] }
 0x7eb   : > { %6567 = vrcp.f32 %v4024_v47  ;;  %v4218_v47 = vpack.c.bf16 %v4214_v63, %v4213_v60 }
 0x7ec   : > { %v4021_v0 = vpop.xlane.xlu0 %4020 }
 0x7ed   : > { %6569 = vrcp.f32 %v4021_v0  ;;  %v4053_v15 = vpop.permute.xlu1 %4052  ;;  %v4407_v0 = vld [vmem:[#allocation2 + $0x52] sm:$0xff] }
 0x7ef   : > { %v6558_v35 = vpop.eup %6557 }
 0x7f0   : > { %v4051_v31 = vpop.permute.xlu0 %4050  ;;  %v4037_v38 = vmul.f32 %v6558_v35, %v6546_v48  ;;  %v6560_v6 = vpop.eup %6559  ;;  %v4208_v48 = vld [vmem:[#allocation2 + $0x10] sm:$0xff]  ;;  %v8578_v35 = vpack.c.bf16 %v4405_v22, %v4404_v17 }
 0x7f1   : > { %6081 = vmatprep.subr.bf16.mxu0 %v4051_v31  ;;  %6216 = vmatprep.subr.bf16.mxu1 %v4051_v31  ;;  %v6562_v34 = vpop.eup %6561  ;;  %v4055_v24 = vpop.permute.xlu1 %4054  ;;  %v4038_v2 = vmul.f32 %v6560_v6, %v8498_v16  ;;  %v8534_v16 = vld [vmem:[#allocation2 + $0x21] sm:$0xff]  ;;  %v4215_v52 = vpack.c.bf16 %v4208_v48, %v4207_v19  ;;  %v4409_v6 = vld [vmem:[#allocation2 + $0x72] sm:$0xff] }
 0x7f2   : > { %6082 = vmatpush3.bf16.msra.mxu0 %v4051_v31  ;;  %6220 = vmatpush3.bf16.msra.mxu1 %v4051_v31  ;;  %v4044_v3 = vpack.c.bf16 %v4037_v38, %v4036_v49  ;;  %v4039_v13 = vmul.f32 %v6562_v34, %v6544_v26  ;;  %v8542_v11 = vpack.c.bf16 %v8538_v40, %v8534_v16  ;;  %v8557_v26 = vld [vmem:[#allocation2 + $0x71] sm:$0xff]  ;;  %v6502_v31 = vld [vmem:[%s8730_s6 + $0x20] sm:$0xff]  }
 0x7f3   : > { %6083 = vmatprep.subr.bf16.mxu0 %v4053_v15  ;;  %6217 = vmatprep.subr.bf16.mxu1 %v4053_v15  ;;  %v6564_v46 = vpop.eup %6563  ;;  %v4408_v38 = vld [vmem:[#allocation2 + $0x62] sm:$0xff]  ;;  %v4516_v34 = vpack.c.bf16 %v4209_v62, %v4208_v48 }
 0x7f4   : > { %6087 = vmatprep.mubr.msk.bf16.mxu0 %vm498_vm0, %v4044_v3  ;;  %v6566_v8 = vpop.eup %6565  ;;  %v4043_v5 = vmul.f32 %v6564_v46, %v6552_v12  ;;  %v4045_v53 = vpack.c.bf16 %v4039_v13, %v4038_v2  ;;  %v4210_v12 = vld [vmem:[#allocation2 + $0x30] sm:$0xff]  ;;  %v4413_v3 = vpack.c.bf16 %v4409_v6, %v4408_v38  ;;  %v4622_v13 = vpack.c.bf16 %v8534_v16, %v8524_v29  ;;  %v6505_v29 = vld [vmem:[%s8730_s6 + $0x38] sm:$0xff]  }
 0x7f5   : > { %v6568_v33 = vpop.eup %6567  ;;  %v4040_v61 = vmul.f32 %v6566_v8, %v6550_v1  ;;  %v4212_v1 = vld [vmem:[#allocation2 + $0x50] sm:$0xff]  ;;  %v8565_v28 = vpack.c.bf16 %v4210_v12, %v4209_v62  ;;  %v6503_v8 = vld [vmem:[%s8730_s6 + $0x28] sm:$0xff]  }
 0x7f6   : > { %6084 = vmatpush3.bf16.msra.mxu0 %v4053_v15  ;;  %6221 = vmatpush3.bf16.msra.mxu1 %v4053_v15  ;;  %v4042_v41 = vmul.f32 %v6568_v33, %v8504_v39  ;;  %v8560_v39 = vpack.c.bf16 %v8557_v26, %v4227_v54  ;;  %v4406_v15 = vld [vmem:[#allocation2 + $0x42] sm:$0xff]  ;;  %v4518_v33 = vpack.c.bf16 %v4213_v60, %v4212_v1 }
 0x7f7   : > { %v6570_v9 = vpop.eup %6569  ;;  %6085 = vmatprep.subr.bf16.mxu0 %v4055_v24  ;;  %6218 = vmatprep.subr.bf16.mxu1 %v4055_v24  ;;  %v4412_v49 = vpack.c.bf16 %v4407_v0, %v4406_v15  ;;  %v4729_v36 = vpack.c.bf16 %v4406_v15, %v4405_v22 }
 0x7f8   : > { %v4041_v51 = vmul.f32 %v6570_v9, %v6554_v56  ;;  %v4047_v10 = vpack.c.bf16 %v4043_v5, %v4042_v41  ;;  %v4211_v56 = vld [vmem:[#allocation2 + $0x40] sm:$0xff]  ;;  %v4623_v5 = vpack.c.bf16 %v8544_v42, %v8538_v40  ;;  %v4728_v41 = vpack.c.bf16 %v4404_v17, %v4403_v23  ;;  %v5046_v42 = vld [vmem:[#allocation2 + $0x92] sm:$0xff] }
 0x7f9   : > { %v8570_v18 = vpack.c.bf16 %v4212_v1, %v4211_v56  ;;  %v4517_v46 = vpack.c.bf16 %v4211_v56, %v4210_v12 }
 0x7fa   : > { %6086 = vmatpush3.bf16.msra.mxu0 %v4055_v24  ;;  %6222 = vmatpush3.bf16.msra.mxu1 %v4055_v24  ;;  %v4046_v21 = vpack.c.bf16 %v4041_v51, %v4040_v61  ;;  %v4515_v24 = vld [vmem:[#allocation2 + $0x80] sm:$0xff]  ;;  %v4624_v61 = vpack.c.bf16 %v4227_v54, %v8536_v30  ;;  %v4940_v30 = vld [vmem:[#allocation2 + $0x91] sm:$0xff] }
 0x7fb   : > { %6095 = vmatprep.subr.bf16.mxu1 %v6498_v4  ;;  %v4519_v9 = vpack.c.bf16 %v4515_v24, %v4214_v63  ;;  %v4621_v51 = vld [vmem:[#allocation2 + $0x81] sm:$0xff] }
 0x7fc   : > { %6091 = vmatprep.mubr.msk.bf16.mxu1 %vm498_vm0, %v4046_v21  ;;  %v4625_v2 = vpack.c.bf16 %v4621_v51, %v8557_v26  ;;  %v4730_v21 = vpack.c.bf16 %v4408_v38, %v4407_v0  ;;  %v4944_v40 = vpack.c.bf16 %v4940_v30, %v4621_v51 }
 0x7fd   : > { %6088 = vmatmul.mubr.msk.bf16.vlgmr.msra.gmra.mrb[48].mxu0 %vm498_vm0, %v4045_v53  ;;  %6092 = vmatmul.mubr.msk.bf16.vlgmr.msra.gmra.mrb[24].mxu1 %vm498_vm0, %v4047_v10  ;;  %v4727_v53 = vld [vmem:[#allocation2 + $0x82] sm:$0xff] }
 0x7fe   : > { %6097 = vmatprep.mubr.msk.bf16.mxu1 %vm8944_vm1, %v4229_v20  ;;  %6096 = vmatpush3.bf16.msra.mxu1 %v6498_v4  ;;  %v6504_v4 = vld [vmem:[%s8730_s6 + $0x30] sm:$0xff]   ;;  %v4731_v10 = vpack.c.bf16 %v4727_v53, %v4409_v6 }
 0x7ff   : > { %6105 = vmatprep.subr.bf16.mxu1 %v6499_v55  ;;  %v4834_v20 = vld [vmem:[#allocation2 + $0x90] sm:$0xff] }
 0x800   : > { %v4838_v16 = vpack.c.bf16 %v4834_v20, %v4515_v24 }
 0x805   : > { %6098 = vmatmul.mubr.msk.bf16.vlgmr.msra.gmra.mrb[28].mxu1 %vm8945_vm3, %v8542_v11  ;;  %vm8958_vm3 = vmmov %vm8944_vm1 }
 0x806   : > { %6101 = vmatprep.mubr.msk.bf16.mxu1 %vm8946_vm4, %v8551_v57  ;;  %6106 = vmatpush3.bf16.msra.mxu1 %v6499_v55  ;;  %vm8959_vm4 = vmmov %vm8944_vm1  ;;  %v6506_v55 = vld [vmem:[%s8730_s6 + $0x40] sm:$0xff]  }
 0x807   : > { %6115 = vmatprep.subr.bf16.mxu1 %v6500_v44 }
 0x80d   : > { %6102 = vmatmul.mubr.msk.bf16.gmra.mrb[32].mxu1 %vm8947_vm5, %v8560_v39  ;;  %vm8960_vm5 = vmmov %vm8944_vm1 }
 0x80e   : > { %6107 = vmatprep.mubr.msk.bf16.mxu1 %vm8948_vm6, %v4215_v52  ;;  %vm8961_vm6 = vmmov %vm8944_vm1 }
 0x815   : > { %6108 = vmatmul.mubr.msk.bf16.vlgmr.msra.gmra.mrb[28].mxu1 %vm8949_vm7, %v8565_v28  ;;  %vm8962_vm7 = vmmov %vm8944_vm1 }
 0x816   : > { %6111 = vmatprep.mubr.msk.bf16.mxu1 %vm8950_vm8, %v8570_v18  ;;  %6116 = vmatpush3.bf16.msra.mxu1 %v6500_v44  ;;  %vm8963_vm8 = vmmov %vm8944_vm1  ;;  %v5172_v44 = vld [vmem:[%s8732_s8] sm:$0xf] }
 0x817   : > { %6125 = vmatprep.subr.bf16.mxu1 %v6501_v59 }
 0x81d   : > { %6112 = vmatmul.mubr.msk.bf16.gmra.mrb[32].mxu1 %vm8951_vm9, %v4218_v47  ;;  %vm8964_vm9 = vmmov %vm8944_vm1 }
 0x81e   : > { %6117 = vmatprep.mubr.msk.bf16.mxu1 %vm8952_vm10, %v4410_v45  ;;  %vm8965_vm10 = vmmov %vm8944_vm1 }
 0x825   : > { %6118 = vmatmul.mubr.msk.bf16.vlgmr.msra.gmra.mrb[28].mxu1 %vm8953_vm11, %v8578_v35  ;;  %vm8966_vm11 = vmmov %vm8944_vm1 }
 0x826   : > { %6121 = vmatprep.mubr.msk.bf16.mxu1 %vm8954_vm12, %v4412_v49  ;;  %6126 = vmatpush3.bf16.msra.mxu1 %v6501_v59  ;;  %vm8967_vm12 = vmmov %vm8944_vm1 }
 0x827   : > { %6135 = vmatprep.subr.bf16.mxu1 %v6502_v31 }
 0x82d   : > { %6122 = vmatmul.mubr.msk.bf16.gmra.mrb[32].mxu1 %vm8955_vm13, %v4413_v3  ;;  %vm8968_vm13 = vmmov %vm8944_vm1 }
 0x82e   : > { %6127 = vmatprep.mubr.msk.bf16.mxu1 %vm8956_vm14, %v4516_v34  ;;  %vm8969_vm14 = vmmov %vm8944_vm1 }
 0x835   : > { %6128 = vmatmul.mubr.msk.bf16.vlgmr.msra.gmra.mrb[28].mxu1 %vm8957_vm2, %v4517_v46  ;;  %vm8970_vm2 = vmmov %vm8944_vm1 }
 0x836   : > { %6131 = vmatprep.mubr.msk.bf16.mxu1 %vm8944_vm1, %v4518_v33  ;;  %6136 = vmatpush3.bf16.msra.mxu1 %v6502_v31 }
 0x837   : > { %6145 = vmatprep.subr.bf16.mxu1 %v6503_v8 }
 0x83d   : > { %6132 = vmatmul.mubr.msk.bf16.gmra.mrb[32].mxu1 %vm8958_vm3, %v4519_v9  ;;  %vm8971_vm3 = vmmov %vm8944_vm1 }
 0x83e   : > { %6137 = vmatprep.mubr.msk.bf16.mxu1 %vm8959_vm4, %v4622_v13  ;;  %vm8972_vm4 = vmmov %vm8944_vm1 }
 0x845   : > { %6138 = vmatmul.mubr.msk.bf16.vlgmr.msra.gmra.mrb[28].mxu1 %vm8960_vm5, %v4623_v5  ;;  %vm8973_vm5 = vmmov %vm8944_vm1 }
 0x846   : > { %6141 = vmatprep.mubr.msk.bf16.mxu1 %vm8961_vm6, %v4624_v61  ;;  %6146 = vmatpush3.bf16.msra.mxu1 %v6503_v8  ;;  %vm8974_vm6 = vmmov %vm8944_vm1 }
 0x847   : > { %6155 = vmatprep.subr.bf16.mxu1 %v6504_v4 }
 0x84d   : > { %6142 = vmatmul.mubr.msk.bf16.gmra.mrb[32].mxu1 %vm8962_vm7, %v4625_v2  ;;  %vm8975_vm7 = vmmov %vm8944_vm1 }
 0x84e   : > { %6147 = vmatprep.mubr.msk.bf16.mxu1 %vm8963_vm8, %v4728_v41  ;;  %vm8976_vm8 = vmmov %vm8944_vm1 }
 0x855   : > { %6148 = vmatmul.mubr.msk.bf16.vlgmr.msra.gmra.mrb[28].mxu1 %vm8964_vm9, %v4729_v36  ;;  %vm8977_vm9 = vmmov %vm8944_vm1 }
 0x856   : > { %6151 = vmatprep.mubr.msk.bf16.mxu1 %vm8965_vm10, %v4730_v21  ;;  %6156 = vmatpush3.bf16.msra.mxu1 %v6504_v4  ;;  %vm5189_vm10 = vcmask 1043456  }
 0x857   : > { %6165 = vmatprep.subr.bf16.mxu1 %v6505_v29  ;;  %6335 = vmatprep.subr.msk.bf16.mxu0 %vm5189_vm10, %v5172_v44 }
 0x85d   : > { %6152 = vmatmul.mubr.msk.bf16.gmra.mrb[32].mxu1 %vm8966_vm11, %v4731_v10  ;;  %vm5176_vm11 = vcmask 64512  }
 0x85e   : > { %6157 = vmatprep.mubr.msk.bf16.mxu1 %vm8967_vm12, %v8565_v28 }
 0x865   : > { %6158 = vmatmul.mubr.msk.bf16.vlgmr.msra.gmra.mrb[28].mxu1 %vm8968_vm13, %v8570_v18  ;;  %v5754_v18 = vld [vmem:[%s8731_s7] ss:$0 sm:$0xff] }
 0x866   : > { %6161 = vmatprep.mubr.msk.bf16.mxu1 %vm8969_vm14, %v4218_v47  ;;  %6166 = vmatpush3.bf16.msra.mxu1 %v6505_v29 }
 0x867   : > { %6175 = vmatprep.subr.bf16.mxu1 %v6506_v55 }
 0x86d   : > { %6162 = vmatmul.mubr.msk.bf16.gmra.mrb[32].mxu1 %vm8970_vm2, %v4838_v16 }
 0x86e   : > { %6167 = vmatprep.mubr.msk.bf16.mxu1 %vm8944_vm1, %v8542_v11  ;;  %v5050_v11 = vpack.c.bf16 %v5046_v42, %v4727_v53 }
 0x875   : > { %6168 = vmatmul.mubr.msk.bf16.vlgmr.msra.gmra.mrb[28].mxu1 %vm8971_vm3, %v8551_v57  ;;  %v5191_v57 = vsel %vm5189_vm10, %v5172_v44, 0 }
 0x876   : > { %6171 = vmatprep.mubr.msk.bf16.mxu1 %vm8972_vm4, %v8560_v39  ;;  %6176 = vmatpush3.bf16.msra.mxu1 %v6506_v55 }
 0x877   : > { %6186 = vmatpush3.bf16.msra.mxu0 %v5191_v57 }
 0x87d   : > { %6172 = vmatmul.mubr.msk.bf16.gmra.mrb[32].mxu1 %vm8973_vm5, %v4944_v40 }
 0x87e   : > { %6177 = vmatprep.mubr.msk.bf16.mxu1 %vm8974_vm6, %v8578_v35 }
 0x885   : > { %6178 = vmatmul.mubr.msk.bf16.vlgmr.msra.gmra.mrb[28].mxu1 %vm8975_vm7, %v4412_v49 }
 0x886   : > { %6181 = vmatprep.mubr.msk.bf16.mxu1 %vm8976_vm8, %v4413_v3 }
 0x88d   : > { %6182 = vmatmul.mubr.msk.bf16.gmra.mrb[32].mxu1 %vm8977_vm9, %v5050_v11 }
 0x8d0   : > { %v6089_v54 = vpop.f32.mrb[48].mxu0  ;;  %v6093_v26 = vpop.f32.mrb[24].mxu1 }
 0x8d1   : > { %v4106_v19 = vpop.f32.mrb[49].mxu0  ;;  %v4122_v48 = vpop.f32.mrb[25].mxu1 }
 0x8d2   : > { %v6090_v39 = vpop.f32.mrb[50].mxu0  ;;  %v6094_v52 = vpop.f32.mrb[26].mxu1 }
 0x8d3   : > { %v6457_v62 = vpack.i.bf16 %v6090_v39, %v6089_v54  ;;  %v6467_v1 = vpack.i.bf16 %v6094_v52, %v6093_v26  ;;  %v4109_v12 = vpop.f32.mrb[51].mxu0  ;;  %v4125_v28 = vpop.f32.mrb[27].mxu1  ;;  %v5275_v26 = vld [vmem:[%s8734_s10] sm:$0xf] }
 0x8d4   : > { %v6452_v56 = vpack.i.bf16 %v4109_v12, %v4106_v19  ;;  %v6462_v59 = vpack.i.bf16 %v4125_v28, %v4122_v48  ;;  %6336 = vmatprep.subr.msk.bf16.mxu0 %vm5189_vm10, %v5275_v26  ;;  %v5289_v19 = vsel %vm5189_vm10, %v5275_v26, 0  ;;  %v5270_v48 = vld [vmem:[%s8733_s9] sm:$0xf]  ;;  %v6591_v26 = vld [vmem:[%s6737_s14 + $0x18] sm:$0xff] }
 0x8d5   : > { %6458 = vrot.lane.b32.xlu0 %v6457_v62, %s6634_s28 }
 0x8d6   : > { %6453 = vrot.lane.b32.xlu1 %v6452_v56, %s6634_s28 }
 0x8d9   : > { %6468 = vrot.lane.b32.xlu0 %v6467_v1, %s6634_s28 }
 0x8da   : > { %6463 = vrot.lane.b32.xlu1 %v6462_v59, %s6634_s28 }
 0x8de   : > { %5173 = vrot.lane.b32.xlu1 %v5754_v18, %s8915_s20 }
 0x947   : > { %v6459_v60 = vpop.permute.xlu0 %6458 }
 0x948   : > { %v6461_v63 = vunpack.i.h.bf16 %v6459_v60  ;;  %v6460_v58 = vunpack.i.l.bf16 %v6459_v60  ;;  %v6454_v23 = vpop.permute.xlu1 %6453 }
 0x949   : > { %v6456_v47 = vunpack.i.h.bf16 %v6454_v23  ;;  %v6455_v45 = vunpack.i.l.bf16 %v6454_v23 }
 0x94a   : > { %v4172_v17 = vsel %vm2890_vm15, %v8474_v50, %v6461_v63  ;;  %v4171_v0 = vsel %vm2890_vm15, %v8470_v27, %v6460_v58 }
 0x94b   : > { %v5169_v22 = vpack.c.bf16 %v4172_v17, %v4171_v0  ;;  %v4170_v35 = vsel %vm2890_vm15, %v8476_v37, %v6456_v47  ;;  %v4169_v15 = vsel %vm2890_vm15, %v8472_v25, %v6455_v45  ;;  %v6469_v31 = vpop.permute.xlu0 %6468 }
 0x94c   : > { %v5168_v49 = vpack.c.bf16 %v4170_v35, %v4169_v15  ;;  %v6471_v38 = vunpack.i.h.bf16 %v6469_v31  ;;  %v6470_v6 = vunpack.i.l.bf16 %v6469_v31  ;;  %v6464_v3 = vpop.permute.xlu1 %6463  ;;  %v5369_v35 = vsel %vm5189_vm10, %v5270_v48, 0 }
 0x94d   : > { %v6466_v34 = vunpack.i.h.bf16 %v6464_v3  ;;  %v6465_v46 = vunpack.i.l.bf16 %v6464_v3 }
 0x94e   : > { %v4176_v50 = vsel %vm2890_vm15, %v8482_v7, %v6471_v38  ;;  %v4175_v27 = vsel %vm2890_vm15, %v8478_v14, %v6470_v6  ;;  %6187 = vmatprep.mubr.msk.bf16.mxu0 %vm5176_vm11, %v5168_v49 }
 0x94f   : > { %v5171_v37 = vpack.c.bf16 %v4176_v50, %v4175_v27  ;;  %v4174_v25 = vsel %vm2890_vm15, %v8484_v32, %v6466_v34  ;;  %v4173_v8 = vsel %vm2890_vm15, %v8480_v43, %v6465_v46  ;;  %6188 = vmatmul.mubr.msk.bf16.vlgmr.msra.gmra.mrb[52].mxu0 %vm5176_vm11, %v5169_v22 }
 0x950   : > { %v5170_v33 = vpack.c.bf16 %v4174_v25, %v4173_v8  ;;  %6196 = vmatpush3.bf16.msra.mxu0 %v5289_v19  ;;  %v5174_v39 = vpop.permute.xlu1 %5173  ;;  %v5767_v25 = vld [vmem:[%s8735_s11] ss:$0 sm:$0xff] }
 0x951   : > { %6337 = vmatprep.subr.msk.bf16.mxu0 %vm5189_vm10, %v5270_v48 }
 0x952   : > { %6191 = vmatprep.mubr.msk.bf16.mxu0 %vm5176_vm11, %v5170_v33 }
 0x957   : > { %6192 = vmatmul.mubr.msk.bf16.gmra.mrb[56].mxu0 %vm5176_vm11, %v5171_v37 }
 0x958   : > { %v6179_v7 = vpop.f32.mrb[28].mxu1 }
 0x959   : > { %v5154_v24 = vadd.f32 %v6179_v7, %v5754_v18  ;;  %v5106_v9 = vpop.f32.mrb[29].mxu1 }
 0x95a   : > { %v5152_v14 = vadd.f32 %v5754_v18, %v5106_v9  ;;  %v6180_v13 = vpop.f32.mrb[30].mxu1 }
 0x95b   : > { %v5155_v5 = vadd.f32 %v6180_v13, %v5754_v18  ;;  %v5109_v4 = vpop.f32.mrb[31].mxu1  ;;  %v5162_v51 = vmax.f32 %v5154_v24, 0.0 }
 0x95c   : > { %v5153_v61 = vadd.f32 %v5754_v18, %v5109_v4  ;;  %v5160_v2 = vmax.f32 %v5152_v14, 0.0 }
 0x95d   : > { %v5163_v32 = vmax.f32 %v5155_v5, 0.0 }
 0x95e   : > { %v5161_v41 = vmax.f32 %v5153_v61, 0.0 }
 0x95f   : > { %v5267_v43 = vpack.c.bf16 %v5163_v32, %v5162_v51 }
 0x960   : > { %v5266_v36 = vpack.c.bf16 %v5161_v41, %v5160_v2  ;;  %v6183_v29 = vpop.f32.mrb[32].mxu1 }
 0x961   : > { %v5158_v21 = vadd.f32 %v6183_v29, %v5754_v18  ;;  %v5122_v53 = vpop.f32.mrb[33].mxu1  ;;  %v8978_v29 = vmov 15  }
 0x962   : > { %v5156_v10 = vadd.f32 %v5754_v18, %v5122_v53  ;;  %v6184_v55 = vpop.f32.mrb[34].mxu1  ;;  %v6588_v53 = vld [vmem:[%s6737_s14] sm:$0xff] }
 0x963   : > { %v5159_v20 = vadd.f32 %v6184_v55, %v5754_v18  ;;  %v5125_v16 = vpop.f32.mrb[35].mxu1  ;;  %v5166_v40 = vmax.f32 %v5158_v21, 0.0 }
 0x964   : > { %v5157_v30 = vadd.f32 %v5754_v18, %v5125_v16  ;;  %v5164_v11 = vmax.f32 %v5156_v10, 0.0  ;;  %v6589_v16 = vld [vmem:[%s6737_s14 + $0x8] sm:$0xff] }
 0x965   : > { %v5167_v42 = vmax.f32 %v5159_v20, 0.0 }
 0x966   : > { %v5165_v44 = vmax.f32 %v5157_v30, 0.0 }
 0x967   : > { %v5269_v57 = vpack.c.bf16 %v5167_v42, %v5166_v40 }
 0x968   : > { %v5268_v54 = vpack.c.bf16 %v5165_v44, %v5164_v11  ;;  %v6590_v11 = vld [vmem:[%s6737_s14 + $0x10] sm:$0xff] }
 0xa22   : > { %v6189_v52 = vpop.f32.mrb[52].mxu0 }
 0xa23   : > { %v5236_v62 = vadd.f32 %v6189_v52, %v5174_v39  ;;  %v5227_v1 = vpop.f32.mrb[53].mxu0  ;;  %v6592_v52 = vld [vmem:[%s6737_s14 + $0x20] sm:$0xff] }
 0xa24   : > { %v5228_v12 = vadd.f32 %v5227_v1, %v5174_v39  ;;  %v6190_v28 = vpop.f32.mrb[54].mxu0 }
 0xa25   : > { %v5239_v56 = vadd.f32 %v6190_v28, %v5174_v39  ;;  %v5230_v59 = vpop.f32.mrb[55].mxu0  ;;  %v5260_v60 = vmax.f32 %v5236_v62, 0.0  ;;  %v6593_v28 = vld [vmem:[%s6737_s14 + $0x28] sm:$0xff] }
 0xa26   : > { %v5231_v18 = vadd.f32 %v5230_v59, %v5174_v39  ;;  %v5258_v58 = vmax.f32 %v5228_v12, 0.0 }
 0xa27   : > { %v5261_v63 = vmax.f32 %v5239_v56, 0.0 }
 0xa28   : > { %v5259_v23 = vmax.f32 %v5231_v18, 0.0 }
 0xa29   : > { %v5272_v47 = vpack.c.bf16 %v5261_v63, %v5260_v60  ;;  %v6594_v60 = vld [vmem:[%s6737_s14 + $0x30] sm:$0xff] }
 0xa2a   : > { %v5271_v45 = vpack.c.bf16 %v5259_v23, %v5258_v58  ;;  %v6193_v17 = vpop.f32.mrb[56].mxu0 }
 0xa2b   : > { %v5252_v0 = vadd.f32 %v6193_v17, %v5174_v39  ;;  %v5243_v22 = vpop.f32.mrb[57].mxu0 }
 0xa2c   : > { %v5244_v15 = vadd.f32 %v5243_v22, %v5174_v39  ;;  %v6194_v31 = vpop.f32.mrb[58].mxu0  ;;  %6197 = vmatprep.mubr.msk.bf16.mxu0 %vm5176_vm11, %v5271_v45 }
 0xa2d   : > { %v5255_v49 = vadd.f32 %v6194_v31, %v5174_v39  ;;  %v5246_v38 = vpop.f32.mrb[59].mxu0  ;;  %6198 = vmatmul.mubr.msk.bf16.vlgmr.msra.gmra.mrb[60].mxu0 %vm5176_vm11, %v5272_v47  ;;  %v5264_v3 = vmax.f32 %v5252_v0, 0.0  ;;  %v6595_v47 = vld [vmem:[%s6737_s14 + $0x38] sm:$0xff] }
 0xa2e   : > { %v5247_v6 = vadd.f32 %v5246_v38, %v5174_v39  ;;  %6206 = vmatpush3.bf16.msra.mxu0 %v5369_v35  ;;  %v5262_v46 = vmax.f32 %v5244_v15, 0.0 }
 0xa2f   : > { %v5265_v34 = vmax.f32 %v5255_v49, 0.0 }
 0xa30   : > { %v5263_v50 = vmax.f32 %v5247_v6, 0.0 }
 0xa31   : > { %v5274_v27 = vpack.c.bf16 %v5265_v34, %v5264_v3 }
 0xa32   : > { %v5273_v37 = vpack.c.bf16 %v5263_v50, %v5262_v46 }
 0xa34   : > { %6201 = vmatprep.mubr.msk.bf16.mxu0 %vm5176_vm11, %v5273_v37 }
 0xa35   : > { %6202 = vmatmul.mubr.msk.bf16.gmra.mrb[64].mxu0 %vm5176_vm11, %v5274_v27 }
 0xa36   : > { %6207 = vmatprep.mubr.msk.bf16.mxu0 %vm5176_vm11, %v5266_v36 }
 0xa3d   : > { %6208 = vmatmul.mubr.msk.bf16.vlgmr.msra.gmra.mrb[60].mxu0 %vm5176_vm11, %v5267_v43 }
 0xa3e   : > { %6211 = vmatprep.mubr.msk.bf16.mxu0 %vm5176_vm11, %v5268_v54 }
 0xa45   : > { %6212 = vmatmul.mubr.msk.bf16.gmra.mrb[64].mxu0 %vm5176_vm11, %v5269_v57 }
 0xb10   : > { %v6209_v8 = vpop.f32.mrb[60].mxu0 }
 0xb11   : > { %v5405_v33 = vpop.f32.mrb[61].mxu0  ;;  %v5445_v4 = vadd.f32 %v6209_v8, %v5767_v25 }
 0xb12   : > { %v5443_v7 = vadd.f32 %v5767_v25, %v5405_v33  ;;  %v6210_v24 = vpop.f32.mrb[62].mxu0 }
 0xb13   : > { %v5408_v9 = vpop.f32.mrb[63].mxu0  ;;  %v5446_v32 = vadd.f32 %v6210_v24, %v5767_v25 }
 0xb14   : > { %5451 = vxpose.xlu0.b32.start [1/8] (short) (narrow) %v5443_v7, 64  ;;  %v5444_v14 = vadd.f32 %v5767_v25, %v5408_v9 }
 0xb18   : > { %5452 = vxpose.xlu0.b32.cont [2/8] (short) (narrow) %v5444_v14, 64  ;;  %v6213_v13 = vpop.f32.mrb[64].mxu0 }
 0xb19   : > { %v5421_v5 = vpop.f32.mrb[65].mxu0  ;;  %v5449_v43 = vadd.f32 %v6213_v13, %v5767_v25 }
 0xb1a   : > { %v6214_v61 = vpop.f32.mrb[66].mxu0  ;;  %v5447_v2 = vadd.f32 %v5767_v25, %v5421_v5 }
 0xb1b   : > { %v5424_v51 = vpop.f32.mrb[67].mxu0  ;;  %v5450_v36 = vadd.f32 %v6214_v61, %v5767_v25 }
 0xb1c   : > { %5453 = vxpose.xlu0.b32.cont [3/8] (short) (narrow) %v5445_v4, 64  ;;  %v5448_v41 = vadd.f32 %v5767_v25, %v5424_v51 }
 0xb20   : > { %5454 = vxpose.xlu0.b32.cont [4/8] (short) (narrow) %v5446_v32, 64 }
 0xb24   : > { %5455 = vxpose.xlu0.b32.cont [5/8] (short) (narrow) %v5447_v2, 64 }
 0xb28   : > { %5456 = vxpose.xlu0.b32.cont [6/8] (short) (narrow) %v5448_v41, 64 }
 0xb2c   : > { %5457 = vxpose.xlu0.b32.cont [7/8] (short) (narrow) %v5449_v43, 64 }
 0xb30   : > { %5458 = vxpose.xlu0.b32.end [8/8] (short) (narrow) %v5450_v36, 64 }
 0xb59   : > { %6472 = vset.pattern.permute.xlu0 %v8978_v29 }
 0xb94   : > { %v5467_v21 = vpop.trf.xlu0 }
 0xb95   : > { %v5483_v10 = vadd.f32 %v6588_v53, %v5467_v21 }
 0xb97   : > { %v5491_v55 = vmax.f32 %v5483_v10, 0.0 }
 0xb98   : > { %v5468_v20 = vpop.trf.xlu0 }
 0xb99   : > { %5499 = vst.msk [vmem:[%s8696_s26] sm:$0xff] %vm498_vm0, %v5491_v55  ;;  %v5484_v30 = vadd.f32 %v6589_v16, %v5468_v20 }
 0xb9b   : > { %v5492_v40 = vmax.f32 %v5484_v30, 0.0 }
 0xb9c   : > { %v5469_v42 = vpop.trf.xlu0 }
 0xb9d   : > { %5500 = vst.msk [vmem:[%s8696_s26 + $0x8] sm:$0xff] %vm498_vm0, %v5492_v40  ;;  %v5485_v44 = vadd.f32 %v6590_v11, %v5469_v42 }
 0xb9f   : > { %v5493_v57 = vmax.f32 %v5485_v44, 0.0 }
 0xba0   : > { %v5470_v54 = vpop.trf.xlu0 }
 0xba1   : > { %5501 = vst.msk [vmem:[%s8696_s26 + $0x10] sm:$0xff] %vm498_vm0, %v5493_v57  ;;  %v5486_v19 = vadd.f32 %v6591_v26, %v5470_v54 }
 0xba3   : > { %v5494_v48 = vmax.f32 %v5486_v19, 0.0 }
 0xba4   : > { %v5471_v39 = vpop.trf.xlu0 }
 0xba5   : > { %5502 = vst.msk [vmem:[%s8696_s26 + $0x18] sm:$0xff] %vm498_vm0, %v5494_v48  ;;  %v5487_v62 = vadd.f32 %v6592_v52, %v5471_v39 }
 0xba7   : > { %v5495_v1 = vmax.f32 %v5487_v62, 0.0 }
 0xba8   : > { %v5472_v12 = vpop.trf.xlu0 }
 0xba9   : > { %5503 = vst.msk [vmem:[%s8696_s26 + $0x20] sm:$0xff] %vm498_vm0, %v5495_v1  ;;  %v5488_v56 = vadd.f32 %v6593_v28, %v5472_v12 }
 0xbab   : > { %v5496_v59 = vmax.f32 %v5488_v56, 0.0 }
 0xbac   : > { %v5473_v18 = vpop.trf.xlu0 }
 0xbad   : > { %5504 = vst.msk [vmem:[%s8696_s26 + $0x28] sm:$0xff] %vm498_vm0, %v5496_v59  ;;  %v5489_v63 = vadd.f32 %v6594_v60, %v5473_v18 }
 0xbaf   : > { %v5497_v58 = vmax.f32 %v5489_v63, 0.0 }
 0xbb0   : > { %v5474_v23 = vpop.trf.xlu0 }
 0xbb1   : > { %5505 = vst.msk [vmem:[%s8696_s26 + $0x30] sm:$0xff] %vm498_vm0, %v5497_v58  ;;  %v5490_v45 = vadd.f32 %v6595_v47, %v5474_v23 }
 0xbb3   : > { %v5498_v17 = vmax.f32 %v5490_v45, 0.0 }
 0xbb5   : > { %5506 = vst.msk [vmem:[%s8696_s26 + $0x38] sm:$0xff] %vm498_vm0, %v5498_v17 }
 0xbb6 PF: > { %s22_s21 = sadd.s32 1, %s6602_s21  }
 0xbb7   : > { %p19_p4 = scmp.ge.s32.totalorder %s22_s21, 4  }
 0xbb9   :  { %21 = sbr.rel (!%p19_p4) target bundleno = 1 (0x1), region = 108 }

</bundles_post_ra>
